<compile_context>
chip_gen: v7x
topology: tpu7x:2x2x1
jax: 0.10.0
libtpu: 0.0.40
codegen_flags: <defaults>
</compile_context>

<pallas_src>
import functools

import jax
import jax.numpy as jnp
from jax.experimental import pallas as pl
from jax.experimental.pallas import tpu as pltpu


def _leaky_relu(x, slope=0.2):
    # max(x, a*x) == LeakyReLU(a) for 0 < a < 1: mul+max (2 VPU ops) instead of
    # mul+cmp+select (3 VPU ops).
    return jnp.maximum(x, slope * x)


def disc_kernel(x_ref,
                w1_ref, b1_ref,
                w2_ref, b2_ref,
                w3_ref, b3_ref,
                w4_ref, b4_ref,
                o_ref, *, act_dtype):
    # In-kernel f32 -> bf16 cast (cheap VPU work hidden under the MXU); avoids a
    # separate wrapper-side pad/cast pass over x in HBM.
    x = x_ref[...].astype(jnp.bfloat16)

    # Layer 1: (TB, 784) bf16 @ (784, 1024) bf16 -> f32 accumulation on MXU.
    h = jnp.dot(x, w1_ref[...], preferred_element_type=jnp.float32)
    h = _leaky_relu(h.astype(act_dtype) + b1_ref[...])
    # TODO(synk): Dropout(0.3) implemented as identity (eval-mode semantics).

    # Layer 2: (TB, 1024) @ (1024, 512)
    h = jnp.dot(h.astype(jnp.bfloat16), w2_ref[...],
                preferred_element_type=jnp.float32)
    h = _leaky_relu(h.astype(act_dtype) + b2_ref[...])

    # Layer 3: (TB, 512) @ (512, 256)
    h = jnp.dot(h.astype(jnp.bfloat16), w3_ref[...],
                preferred_element_type=jnp.float32)
    h = _leaky_relu(h.astype(act_dtype) + b3_ref[...])

    # Layer 4: N=1 "matmul" as VPU elementwise mul + XLU lane reduce (frees MXU);
    # logit and sigmoid stay in f32.
    logit = jnp.sum(h.astype(jnp.float32) * w4_ref[...],
                    axis=-1, keepdims=True) + b4_ref[0]
    o_ref[...] = jax.nn.sigmoid(logit)


def _choose_batch_tile(B):
    """Biggest tile in {512, 256, 128} that still leaves >= 2 grid steps.

    Large tiles amortize per-step pipeline overhead and MXU fill/drain; keeping
    the grid length >= 2 lets the parallel batch axis shard across both v7x
    TensorCores instead of idling one of them.
    """
    for tb in (512, 256):
        if pl.cdiv(B, tb) >= 2:
            return tb
    return 128


def _epilogue_dtype():
    """bf16 bias+LeakyReLU epilogue on chips with bf16 VALUs (v6e/v7x); f32 on
    v5e (no bf16 VPU datapath -> converts would be pure cost)."""
    try:
        kind = jax.devices()[0].device_kind.lower()
    except Exception:
        return jnp.float32
    return jnp.bfloat16 if ("v6" in kind or "v7" in kind) else jnp.float32


def discriminator_forward(x, params, *, tb=None, act_dtype=None):
    """x: (B, 1, 28, 28) or (B, 784) float32. Returns (B, 1) float32."""
    B = x.shape[0]
    x2d = x.reshape(B, 784)
    if x2d.dtype != jnp.float32:
        x2d = x2d.astype(jnp.float32)

    if tb is None:
        tb = _choose_batch_tile(B)
    if act_dtype is None:
        act_dtype = _epilogue_dtype()

    (w1, b1), (w2, b2), (w3, b3), (w4, b4) = params

    # Pad only the batch up to a multiple of the tile (no K pad / dtype pass
    # over x: the kernel reads the original f32 rows directly).
    Bp = pl.cdiv(B, tb) * tb
    if Bp != B:
        x2d = jnp.pad(x2d, ((0, Bp - B), (0, 0)))

    # bf16 operands / f32 accumulation for the MXU layers.
    w1_bf = w1.astype(jnp.bfloat16)
    w2_bf = w2.astype(jnp.bfloat16)
    w3_bf = w3.astype(jnp.bfloat16)
    w4_row = w4.reshape(1, 256).astype(jnp.float32)   # (256,1) -> row, VPU path
    b1_e = b1.reshape(1, -1).astype(act_dtype)
    b2_e = b2.reshape(1, -1).astype(act_dtype)
    b3_e = b3.reshape(1, -1).astype(act_dtype)
    b4_s = b4.reshape(1).astype(jnp.float32)          # scalar bias in SMEM

    resident = lambda i: (0, 0)   # weights/biases: same block every grid step
    # NOTE: pipeline_mode=pl.Buffered(1) on the resident specs would save ~3 MiB
    # of double-buffered weights on v7x, but VMEM is far under budget here so we
    # keep the default for maximum lowering robustness.

    in_specs = [
        pl.BlockSpec((tb, 784), lambda i: (i, 0)),          # x tile (batch-tiled)
        pl.BlockSpec((784, 1024), resident),                # w1 (VMEM-resident)
        pl.BlockSpec((1, 1024), resident),                  # b1
        pl.BlockSpec((1024, 512), resident),                # w2
        pl.BlockSpec((1, 512), resident),                   # b2
        pl.BlockSpec((512, 256), resident),                 # w3
        pl.BlockSpec((1, 256), resident),                   # b3
        pl.BlockSpec((1, 256), resident),                   # w4 row (VPU path)
        pl.BlockSpec(memory_space=pltpu.MemorySpace.SMEM),  # b4 scalar
    ]
    out_spec = pl.BlockSpec((tb, 1), lambda i: (i, 0))

    flops = 2 * Bp * (784 * 1024 + 1024 * 512 + 512 * 256 + 256)
    bytes_accessed = (Bp * 784 * 4 + Bp * 4
                      + (784 * 1024 + 1024 * 512 + 512 * 256) * 2
                      + (1024 + 512 + 256 + 1 + 256) * 4)
    cost = pl.CostEstimate(flops=flops, transcendentals=Bp,
                           bytes_accessed=bytes_accessed)

    # ~3 MiB bf16 weights (x2 buffers) + x tile (x2) + activations; 24 MiB is
    # ample up to tb=256, give tb=512 extra headroom for compiler temporaries.
    vmem_limit = (32 << 20) if tb >= 512 else (24 << 20)

    out = pl.pallas_call(
        functools.partial(disc_kernel, act_dtype=act_dtype),
        out_shape=jax.ShapeDtypeStruct((Bp, 1), jnp.float32),
        grid=(Bp // tb,),
        in_specs=in_specs,
        out_specs=out_spec,
        compiler_params=pltpu.CompilerParams(
            dimension_semantics=("parallel",),   # v7x: shard batch across 2 TCs
            vmem_limit_bytes=vmem_limit,
        ),
        cost_estimate=cost,
    )(x2d, w1_bf, b1_e, w2_bf, b2_e, w3_bf, b3_e, w4_row, b4_s)
    return out[:B]


def init_params(key):
    """Deterministic init matching PyTorch Linear shapes; weights stored (in, out)."""
    dims = [(784, 1024), (1024, 512), (512, 256), (256, 1)]
    params = []
    for (fan_in, fan_out) in dims:
        key, kw, kb = jax.random.split(key, 3)
        bound = 1.0 / jnp.sqrt(fan_in)
        w = jax.random.uniform(kw, (fan_in, fan_out), jnp.float32, -bound, bound)
        b = jax.random.uniform(kb, (fan_out,), jnp.float32, -bound, bound)
        params.append((w, b))
    return params


def reference_forward(x, params):
    B = x.shape[0]
    h = x.reshape(B, 784).astype(jnp.float32)
    for i, (w, b) in enumerate(params):
        h = h @ w + b
        if i < 3:
            h = jnp.where(h > 0, h, 0.2 * h)
    return jax.nn.sigmoid(h)


if __name__ == "__main__":
    key = jax.random.PRNGKey(0)
    kx, kp = jax.random.split(key)

    # MNIST-shaped input: batch=2, NCHW (2, 1, 28, 28) -> flattened to 784 inside.
    x = jax.random.normal(kx, (2, 1, 28, 28), jnp.float32)
    params = init_params(kp)

    out = discriminator_forward(x, params)
    out = jax.block_until_ready(out)

    ref = reference_forward(x, params)
    assert out.shape == (2, 1), out.shape
    # bf16 MXU operands (+ bf16 epilogue on v6e/v7x) vs pure-f32 reference:
    # expected mixed-precision drift, so tolerance is relaxed.
    assert jnp.allclose(out, ref, atol=3e-2, rtol=3e-2), (out, ref)

    print("KERNEL_OK")
</pallas_src>

<mosaic_0001>
module attributes {stable_mosaic.version = 11 : i64} {
  func.func @disc_kernel(%arg0: i32, %arg1: memref<128x784xf32, #tpu.memory_space<vmem>>, %arg2: memref<784x1024xbf16, #tpu.memory_space<vmem>>, %arg3: memref<1x1024xf32, #tpu.memory_space<vmem>>, %arg4: memref<1024x512xbf16, #tpu.memory_space<vmem>>, %arg5: memref<1x512xf32, #tpu.memory_space<vmem>>, %arg6: memref<512x256xbf16, #tpu.memory_space<vmem>>, %arg7: memref<1x256xf32, #tpu.memory_space<vmem>>, %arg8: memref<1x256xf32, #tpu.memory_space<vmem>>, %arg9: memref<1xf32, #tpu.memory_space<smem>>, %arg10: memref<128x1xf32, #tpu.memory_space<vmem>>) attributes {dimension_semantics = [#tpu.dimension_semantics<parallel>], iteration_bounds = array<i64: 1>, scalar_prefetch = 0 : i64, scratch_operands = 0 : i64, tpu.core_type = #tpu.core_type<tc>, window_params = [{transform_indices = @transform_0, window_bounds = array<i64: 128, 784>}, {pipeline_mode = #tpu.pipeline_mode<synchronous>, transform_indices = @transform_1, window_bounds = array<i64: 784, 1024>}, {pipeline_mode = #tpu.pipeline_mode<synchronous>, transform_indices = @transform_2, window_bounds = array<i64: 1, 1024>}, {pipeline_mode = #tpu.pipeline_mode<synchronous>, transform_indices = @transform_3, window_bounds = array<i64: 1024, 512>}, {pipeline_mode = #tpu.pipeline_mode<synchronous>, transform_indices = @transform_4, window_bounds = array<i64: 1, 512>}, {pipeline_mode = #tpu.pipeline_mode<synchronous>, transform_indices = @transform_5, window_bounds = array<i64: 512, 256>}, {pipeline_mode = #tpu.pipeline_mode<synchronous>, transform_indices = @transform_6, window_bounds = array<i64: 1, 256>}, {pipeline_mode = #tpu.pipeline_mode<synchronous>, transform_indices = @transform_7, window_bounds = array<i64: 1, 256>}, {transform_indices = @transform_8, window_bounds = array<i64: 1>}, {transform_indices = @transform_9, window_bounds = array<i64: 128, 1>}]} {
    %c0 = arith.constant 0 : index
    %c0_0 = arith.constant 0 : index
    %0 = vector.load %arg1[%c0, %c0_0] : memref<128x784xf32, #tpu.memory_space<vmem>>, vector<128x784xf32>
    %1 = arith.truncf %0 : vector<128x784xf32> to vector<128x784xbf16>
    %c0_1 = arith.constant 0 : index
    %c0_2 = arith.constant 0 : index
    %2 = vector.load %arg2[%c0_1, %c0_2] : memref<784x1024xbf16, #tpu.memory_space<vmem>>, vector<784x1024xbf16>
    %cst = arith.constant dense<0.000000e+00> : vector<128x1024xf32>
    %3 = tpu.matmul %1, %2, %cst {dimension_numbers = #tpu.dot_dimension_numbers<[1], [0], [0], [1], [0, 0, 1, 1], [], []>} : vector<128x784xbf16>, vector<784x1024xbf16>, vector<128x1024xf32> -> vector<128x1024xf32>
    %c0_3 = arith.constant 0 : index
    %c0_4 = arith.constant 0 : index
    %4 = vector.load %arg3[%c0_3, %c0_4] : memref<1x1024xf32, #tpu.memory_space<vmem>>, vector<1x1024xf32>
    %5 = vector.broadcast %4 : vector<1x1024xf32> to vector<128x1024xf32>
    %6 = arith.addf %3, %5 : vector<128x1024xf32>
    %cst_5 = arith.constant 2.000000e-01 : f32
    %7 = vector.broadcast %cst_5 : f32 to vector<128x1024xf32>
    %8 = arith.mulf %7, %6 : vector<128x1024xf32>
    %9 = arith.maximumf %6, %8 : vector<128x1024xf32>
    %10 = arith.truncf %9 : vector<128x1024xf32> to vector<128x1024xbf16>
    %c0_6 = arith.constant 0 : index
    %c0_7 = arith.constant 0 : index
    %11 = vector.load %arg4[%c0_6, %c0_7] : memref<1024x512xbf16, #tpu.memory_space<vmem>>, vector<1024x512xbf16>
    %cst_8 = arith.constant dense<0.000000e+00> : vector<128x512xf32>
    %12 = tpu.matmul %10, %11, %cst_8 {dimension_numbers = #tpu.dot_dimension_numbers<[1], [0], [0], [1], [0, 0, 1, 1], [], []>} : vector<128x1024xbf16>, vector<1024x512xbf16>, vector<128x512xf32> -> vector<128x512xf32>
    %c0_9 = arith.constant 0 : index
    %c0_10 = arith.constant 0 : index
    %13 = vector.load %arg5[%c0_9, %c0_10] : memref<1x512xf32, #tpu.memory_space<vmem>>, vector<1x512xf32>
    %14 = vector.broadcast %13 : vector<1x512xf32> to vector<128x512xf32>
    %15 = arith.addf %12, %14 : vector<128x512xf32>
    %cst_11 = arith.constant 2.000000e-01 : f32
    %16 = vector.broadcast %cst_11 : f32 to vector<128x512xf32>
    %17 = arith.mulf %16, %15 : vector<128x512xf32>
    %18 = arith.maximumf %15, %17 : vector<128x512xf32>
    %19 = arith.truncf %18 : vector<128x512xf32> to vector<128x512xbf16>
    %c0_12 = arith.constant 0 : index
    %c0_13 = arith.constant 0 : index
    %20 = vector.load %arg6[%c0_12, %c0_13] : memref<512x256xbf16, #tpu.memory_space<vmem>>, vector<512x256xbf16>
    %cst_14 = arith.constant dense<0.000000e+00> : vector<128x256xf32>
    %21 = tpu.matmul %19, %20, %cst_14 {dimension_numbers = #tpu.dot_dimension_numbers<[1], [0], [0], [1], [0, 0, 1, 1], [], []>} : vector<128x512xbf16>, vector<512x256xbf16>, vector<128x256xf32> -> vector<128x256xf32>
    %c0_15 = arith.constant 0 : index
    %c0_16 = arith.constant 0 : index
    %22 = vector.load %arg7[%c0_15, %c0_16] : memref<1x256xf32, #tpu.memory_space<vmem>>, vector<1x256xf32>
    %23 = vector.broadcast %22 : vector<1x256xf32> to vector<128x256xf32>
    %24 = arith.addf %21, %23 : vector<128x256xf32>
    %cst_17 = arith.constant 2.000000e-01 : f32
    %25 = vector.broadcast %cst_17 : f32 to vector<128x256xf32>
    %26 = arith.mulf %25, %24 : vector<128x256xf32>
    %27 = arith.maximumf %24, %26 : vector<128x256xf32>
    %c0_18 = arith.constant 0 : index
    %c0_19 = arith.constant 0 : index
    %28 = vector.load %arg8[%c0_18, %c0_19] : memref<1x256xf32, #tpu.memory_space<vmem>>, vector<1x256xf32>
    %29 = vector.broadcast %28 : vector<1x256xf32> to vector<128x256xf32>
    %30 = arith.mulf %27, %29 : vector<128x256xf32>
    %cst_20 = arith.constant dense<0.000000e+00> : vector<128xf32>
    %31 = vector.multi_reduction <add>, %30, %cst_20 [1] : vector<128x256xf32> to vector<128xf32>
    %32 = vector.shape_cast %31 : vector<128xf32> to vector<128x1xf32>
    %c0_21 = arith.constant 0 : index
    %33 = memref.load %arg9[%c0_21] : memref<1xf32, #tpu.memory_space<smem>>
    %34 = vector.broadcast %33 : f32 to vector<128x1xf32>
    %35 = arith.addf %32, %34 : vector<128x1xf32>
    %36 = arith.negf %35 : vector<128x1xf32>
    %37 = math.exp %36 : vector<128x1xf32>
    %cst_22 = arith.constant 1.000000e+00 : f32
    %38 = vector.broadcast %cst_22 : f32 to vector<128x1xf32>
    %39 = arith.addf %38, %37 : vector<128x1xf32>
    %40 = arith.divf %38, %39 : vector<128x1xf32>
    %c0_23 = arith.constant 0 : index
    %c0_24 = arith.constant 0 : index
    %41 = vector.load %arg10[%c0_23, %c0_24] : memref<128x1xf32, #tpu.memory_space<vmem>>, vector<128x1xf32>
    tpu.vector_store %arg10[%c0_23, %c0_24], %40 {strides = array<i32>} : memref<128x1xf32, #tpu.memory_space<vmem>>, vector<128x1xf32>,
    return
  }
  func.func @transform_0(%arg0: i32) -> (i32, i32) {
    %c0_i32 = arith.constant 0 : i32
    %c0_i32_0 = arith.constant 0 : i32
    return %arg0, %c0_i32 : i32, i32
  }
  func.func @transform_1(%arg0: i32) -> (i32, i32) {
    %c0_i32 = arith.constant 0 : i32
    %c0_i32_0 = arith.constant 0 : i32
    %c0_i32_1 = arith.constant 0 : i32
    return %c0_i32, %c0_i32_0 : i32, i32
  }
  func.func @transform_2(%arg0: i32) -> (i32, i32) {
    %c0_i32 = arith.constant 0 : i32
    %c0_i32_0 = arith.constant 0 : i32
    %c0_i32_1 = arith.constant 0 : i32
    return %c0_i32, %c0_i32_0 : i32, i32
  }
  func.func @transform_3(%arg0: i32) -> (i32, i32) {
    %c0_i32 = arith.constant 0 : i32
    %c0_i32_0 = arith.constant 0 : i32
    %c0_i32_1 = arith.constant 0 : i32
    return %c0_i32, %c0_i32_0 : i32, i32
  }
  func.func @transform_4(%arg0: i32) -> (i32, i32) {
    %c0_i32 = arith.constant 0 : i32
    %c0_i32_0 = arith.constant 0 : i32
    %c0_i32_1 = arith.constant 0 : i32
    return %c0_i32, %c0_i32_0 : i32, i32
  }
  func.func @transform_5(%arg0: i32) -> (i32, i32) {
    %c0_i32 = arith.constant 0 : i32
    %c0_i32_0 = arith.constant 0 : i32
    %c0_i32_1 = arith.constant 0 : i32
    return %c0_i32, %c0_i32_0 : i32, i32
  }
  func.func @transform_6(%arg0: i32) -> (i32, i32) {
    %c0_i32 = arith.constant 0 : i32
    %c0_i32_0 = arith.constant 0 : i32
    %c0_i32_1 = arith.constant 0 : i32
    return %c0_i32, %c0_i32_0 : i32, i32
  }
  func.func @transform_7(%arg0: i32) -> (i32, i32) {
    %c0_i32 = arith.constant 0 : i32
    %c0_i32_0 = arith.constant 0 : i32
    %c0_i32_1 = arith.constant 0 : i32
    return %c0_i32, %c0_i32_0 : i32, i32
  }
  func.func @transform_8(%arg0: i32) -> i32 {
    %c0_i32 = arith.constant 0 : i32
    %c0_i32_0 = arith.constant 0 : i32
    return %c0_i32 : i32
  }
  func.func @transform_9(%arg0: i32) -> (i32, i32) {
    %c0_i32 = arith.constant 0 : i32
    %c0_i32_0 = arith.constant 0 : i32
    return %arg0, %c0_i32 : i32, i32
  }
}

</mosaic_0001>

<bundles_post_ra>
// kernel: tpu_custom_call.1
= control target key start
LH: loop header
LB: loop body
LE: loop exit
PB: predicated region body
PF: predicated region fallthrough
CT: control target
= control target key end

     0   :  { %15 = vsyncpa [#allocation4], 0  ;;  %s12368_s0 = inlined_call_operand.vmem [shape: f32[128,784], index: 0, kind: input, shape index: {}]   ;;  %s12369_s1 = inlined_call_operand.hbm [shape: bf16[784,1024], index: 1, kind: input, shape index: {}]   ;;  %s12370_s2 = inlined_call_operand.hbm [shape: f32[1,1024], index: 2, kind: input, shape index: {}]   ;;  %s12371_s3 = inlined_call_operand.hbm [shape: bf16[1024,512], index: 3, kind: input, shape index: {}]   ;;  %s12372_s4 = inlined_call_operand.hbm [shape: f32[1,512], index: 4, kind: input, shape index: {}]   ;;  %s12373_s5 = inlined_call_operand.hbm [shape: bf16[512,256], index: 5, kind: input, shape index: {}]   ;;  %s12374_s6 = inlined_call_operand.hbm [shape: f32[1,256], index: 6, kind: input, shape index: {}]   ;;  %s12375_s7 = inlined_call_operand.hbm [shape: f32[1,256], index: 7, kind: input, shape index: {}]   ;;  %s12376_s8 = inlined_call_operand.<no memory space> [shape: f32[1], index: 8, kind: input, shape index: {}]   ;;  %s12377_s9 = inlined_call_operand.vmem [shape: f32[128,1], index: 9, kind: output, shape index: {}]  }
   0x1   :  { %16 = vsyncpa [#allocation6], 0 }
   0x2   :  { %17 = vsyncpa [#allocation9], 0 }
   0x3   :  { %18 = vsyncpa [#allocation12], 0  ;;  %s10688_s30 = smov [#allocation5]   ;;  %s10689_s11 = smov [#allocation8]  }
   0x4   :  { %s39_s10 = sshll.u32 %s10688_s30, 4  ;;  %s61_s12 = sshll.u32 %s10689_s11, 4  ;;  %s40_s10 = int_to_ptr.vmem [resolvable:$true] %s39_s10  ;;  %s62_s12 = int_to_ptr.vmem [resolvable:$true] %s61_s12 }
   0x5   :  { %s10526_s15 = scalar_lea.hbm %s12370_s2, 128 }
   0x6   :  { %p10527_p0 = scmp.ne.s32.totalorder %s12370_s2, %s10526_s15  ;;  %p10530_p1 = scmp.lt.u32.totalorder %s10526_s15, %s12370_s2 }
   0x8   :  { %p10532_p2 = pnand %p10530_p1, %p10527_p0 }
   0xa   :  { %10535 = shalt.err (!%p10532_p2)
}
   0xb   :  { %s10536_s20 = scalar_lea.vmem %s40_s10, 128  ;;  %p10541_p4 = scmp.lt.s32.totalorder %s40_s10, %s40_s10 }
   0xc   :  { %p10537_p3 = scmp.ne.s32.totalorder %s40_s10, %s10536_s20  ;;  %p10542_p5 = scmp.lt.s32.totalorder %s10536_s20, %s10536_s20 }
   0xe   :  { %p10543_p6 = por %p10542_p5, %p10541_p4 }
  0x10   :  { %p10544_p7 = pnand %p10543_p6, %p10537_p3 }
  0x12   :  { %10547 = shalt.err (!%p10544_p7)
}
  0x13   :  { %42 = dma.hbm_to_vmem [thread:$0]  %s12370_s2, 128, %s40_s10, [#allocation6]  }
  0x14   :  { %s10548_s25 = scalar_lea.hbm %s12372_s4, 64 }
  0x15   :  { %p10549_p8 = scmp.ne.s32.totalorder %s12372_s4, %s10548_s25  ;;  %p10552_p9 = scmp.lt.u32.totalorder %s10548_s25, %s12372_s4 }
  0x17   :  { %p10554_p10 = pnand %p10552_p9, %p10549_p8 }
  0x19   :  { %10557 = shalt.err (!%p10554_p10)
}
  0x1a   :  { %s10558_s30 = scalar_lea.vmem %s62_s12, 64  ;;  %p10563_p12 = scmp.lt.s32.totalorder %s62_s12, %s62_s12 }
  0x1b   :  { %p10559_p11 = scmp.ne.s32.totalorder %s62_s12, %s10558_s30  ;;  %p10564_p13 = scmp.lt.s32.totalorder %s10558_s30, %s10558_s30 }
  0x1d   :  { %p10565_p0 = por %p10564_p13, %p10563_p12 }
  0x1f   :  { %p10566_p1 = pnand %p10565_p0, %p10559_p11 }
  0x21   :  { %10569 = shalt.err (!%p10566_p1)
}
  0x22   :  { %64 = dma.hbm_to_vmem [thread:$0]  %s12372_s4, 64, %s62_s12, [#allocation9]  }
  0x23   :  { %s10690_s11 = smov [#allocation11]   ;;  %s10691_s14 = smov [#allocation3]  }
  0x24   :  { %s83_s13 = sshll.u32 %s10690_s11, 4  ;;  %s26_s15 = sshll.u32 %s10691_s14, 4  ;;  %s84_s13 = int_to_ptr.vmem [resolvable:$true] %s83_s13  ;;  %s10776_s15 = int_to_ptr.vmem [resolvable:$true] %s26_s15 }
  0x25   :  { %s10570_s18 = scalar_lea.hbm %s12374_s6, 32 }
  0x26   :  { %p10571_p2 = scmp.ne.s32.totalorder %s12374_s6, %s10570_s18  ;;  %p10574_p3 = scmp.lt.u32.totalorder %s10570_s18, %s12374_s6 }
  0x28   :  { %p10576_p4 = pnand %p10574_p3, %p10571_p2 }
  0x2a   :  { %10579 = shalt.err (!%p10576_p4)
}
  0x2b   :  { %s10580_s4 = scalar_lea.vmem %s84_s13, 32  ;;  %p10585_p6 = scmp.lt.s32.totalorder %s84_s13, %s84_s13 }
  0x2c   :  { %p10581_p5 = scmp.ne.s32.totalorder %s84_s13, %s10580_s4  ;;  %p10586_p7 = scmp.lt.s32.totalorder %s10580_s4, %s10580_s4 }
  0x2e   :  { %p10587_p8 = por %p10586_p7, %p10585_p6 }
  0x30   :  { %p10588_p9 = pnand %p10587_p8, %p10581_p5 }
  0x32   :  { %10591 = shalt.err (!%p10588_p9)
}
  0x33   :  { %86 = dma.hbm_to_vmem [thread:$0]  %s12374_s6, 32, %s84_s13, [#allocation12]  }
  0x34   :  { %s10592_s26 = scalar_lea.hbm %s12369_s1, 50176 }
  0x35   :  { %p10593_p10 = scmp.ne.s32.totalorder %s12369_s1, %s10592_s26  ;;  %p10596_p11 = scmp.lt.u32.totalorder %s10592_s26, %s12369_s1 }
  0x37   :  { %p10598_p12 = pnand %p10596_p11, %p10593_p10 }
  0x39   :  { %10601 = shalt.err (!%p10598_p12)
}
  0x3a   :  { %s10602_s2 = scalar_lea.vmem %s10776_s15, 50176  ;;  %p10607_p0 = scmp.lt.s32.totalorder %s10776_s15, %s10776_s15 }
  0x3b   :  { %p10603_p13 = scmp.ne.s32.totalorder %s10776_s15, %s10602_s2  ;;  %p10608_p1 = scmp.lt.s32.totalorder %s10602_s2, %s10602_s2 }
  0x3d   :  { %p10609_p2 = por %p10608_p1, %p10607_p0 }
  0x3f   :  { %p10610_p3 = pnand %p10609_p2, %p10603_p13 }
  0x41   :  { %10613 = shalt.err (!%p10610_p3)
}
  0x42   :  { %s10692_s6 = smov 512   ;;  %s10693_s10 = smov 32  }
  0x43   :  { %32 = dma.hbm_to_vmem [thread:$0]  %s12369_s1, 50176, %s10776_s15, [#allocation4], %s10692_s6, %s10692_s6, %s10693_s10  }
  0x44   :  { %s10694_s14 = smov [#allocation7]   ;;  %s10614_s19 = scalar_lea.hbm %s12371_s3, 32768 }
  0x45   :  { %s48_s16 = sshll.u32 %s10694_s14, 4  ;;  %p10615_p4 = scmp.ne.s32.totalorder %s12371_s3, %s10614_s19  ;;  %s49_s16 = int_to_ptr.vmem [resolvable:$true] %s48_s16 }
  0x46   :  { %p10618_p5 = scmp.lt.u32.totalorder %s10614_s19, %s12371_s3 }
  0x48   :  { %p10620_p6 = pnand %p10618_p5, %p10615_p4 }
  0x4a   :  { %10623 = shalt.err (!%p10620_p6)
}
  0x4b   :  { %s10624_s12 = scalar_lea.vmem %s49_s16, 32768  ;;  %p10629_p8 = scmp.lt.s32.totalorder %s49_s16, %s49_s16 }
  0x4c   :  { %p10625_p7 = scmp.ne.s32.totalorder %s49_s16, %s10624_s12  ;;  %p10630_p9 = scmp.lt.s32.totalorder %s10624_s12, %s10624_s12 }
  0x4e   :  { %p10631_p10 = por %p10630_p9, %p10629_p8 }
  0x50   :  { %p10632_p11 = pnand %p10631_p10, %p10625_p7 }
  0x52   :  { %10635 = shalt.err (!%p10632_p11)
}
  0x53   :  { %s10695_s1 = smov 256   ;;  %s10696_s15 = smov 16  }
  0x54   :  { %54 = dma.hbm_to_vmem [thread:$0]  %s12371_s3, 32768, %s49_s16, [#allocation6], %s10695_s1, %s10695_s1, %s10696_s15  }
  0x55   :  { %s10697_s25 = smov [#allocation10]   ;;  %s10636_s29 = scalar_lea.hbm %s12373_s5, 8192 }
  0x56   :  { %s70_s26 = sshll.u32 %s10697_s25, 4  ;;  %p10637_p12 = scmp.ne.s32.totalorder %s12373_s5, %s10636_s29  ;;  %s71_s26 = int_to_ptr.vmem [resolvable:$true] %s70_s26 }
  0x57   :  { %p10640_p13 = scmp.lt.u32.totalorder %s10636_s29, %s12373_s5 }
  0x59   :  { %p10642_p0 = pnand %p10640_p13, %p10637_p12 }
  0x5b   :  { %10645 = shalt.err (!%p10642_p0)
}
  0x5c   :  { %s10646_s11 = scalar_lea.vmem %s71_s26, 8192  ;;  %p10651_p2 = scmp.lt.s32.totalorder %s71_s26, %s71_s26 }
  0x5d   :  { %p10647_p1 = scmp.ne.s32.totalorder %s71_s26, %s10646_s11  ;;  %p10652_p3 = scmp.lt.s32.totalorder %s10646_s11, %s10646_s11 }
  0x5f   :  { %p10653_p4 = por %p10652_p3, %p10651_p2 }
  0x61   :  { %p10654_p5 = pnand %p10653_p4, %p10647_p1 }
  0x63   :  { %10657 = shalt.err (!%p10654_p5)
}
  0x64   :  { %s10698_s3 = smov 128   ;;  %s10699_s13 = smov 8  }
  0x65   :  { %76 = dma.hbm_to_vmem [thread:$0]  %s12373_s5, 8192, %s71_s26, [#allocation9], %s10698_s3, %s10698_s3, %s10699_s13  }
  0x66   :  { %s10700_s17 = smov [#allocation13]   ;;  %s10658_s21 = scalar_lea.hbm %s12375_s7, 32 }
  0x67   :  { %s93_s18 = sshll.u32 %s10700_s17, 4  ;;  %p10659_p6 = scmp.ne.s32.totalorder %s12375_s7, %s10658_s21  ;;  %s94_s18 = int_to_ptr.vmem [resolvable:$true] %s93_s18 }
  0x68   :  { %p10662_p7 = scmp.lt.u32.totalorder %s10658_s21, %s12375_s7 }
  0x6a   :  { %p10664_p8 = pnand %p10662_p7, %p10659_p6 }
  0x6c   :  { %10667 = shalt.err (!%p10664_p8)
}
  0x6d   :  { %s10668_s15 = scalar_lea.vmem %s94_s18, 32  ;;  %p10673_p10 = scmp.lt.s32.totalorder %s94_s18, %s94_s18 }
  0x6e   :  { %p10669_p9 = scmp.ne.s32.totalorder %s94_s18, %s10668_s15  ;;  %p10674_p11 = scmp.lt.s32.totalorder %s10668_s15, %s10668_s15 }
  0x70   :  { %p10675_p12 = por %p10674_p11, %p10673_p10 }
  0x72   :  { %p10676_p13 = pnand %p10675_p12, %p10669_p9 }
  0x74   :  { %10679 = shalt.err (!%p10676_p13)
}
  0x75   :  { %96 = dma.hbm_to_vmem [thread:$0]  %s12375_s7, 32, %s94_s18, [#allocation12]  }
  0x76   :  { %10680 = dma.done.wait [#allocation4], 50176  }
  0x77   :  { %10681 = vsyncadd [#allocation4], 4294917120 }
  0x78   :  { %10682 = dma.done.wait [#allocation6], 32896  }
  0x79   :  { %10683 = vsyncadd [#allocation6], 4294934400 }
  0x7a   :  { %10684 = dma.done.wait [#allocation9], 8256  }
  0x7b   :  { %10685 = vsyncadd [#allocation9], 4294959040 }
  0x7c   :  { %10686 = dma.done.wait [#allocation12], 64  }
  0x7d   :  { %10687 = vsyncadd [#allocation12], 4294967232  ;;  %v289_v0 = vld [vmem:[#allocation3] sm:$0xff]  ;;  %v122_v54 = vld [vmem:[%s12368_s0 + $0x8] sm:$0xff]  ;;  %vm2683_vm0 = vcmask 130048   ;;  %vm8350_vm1 = vcmask 7168  }
  0x7e   :  { %v293_v1 = vld [vmem:[#allocation3 + $0x20] sm:$0xff]  ;;  %v124_v59 = vld [vmem:[%s12368_s0 + $0x18] sm:$0xff]  ;;  %v131_v60 = vld [vmem:[%s12368_s0 + $0x50] sm:$0xff] }
  0x7f   :  { %v417_v2 = vld [vmem:[#allocation3 + $0x400] sm:$0xff]  ;;  %v8376_v3 = vcombine.high %v289_v0, %v293_v1  ;;  %v8375_v5 = vcombine.low %v289_v0, %v293_v1  ;;  %v10857_v63 = vpack.c.bf16 %v131_v60, %v124_v59 }
  0x80   :  { %v421_v4 = vld [vmem:[#allocation3 + $0x420] sm:$0xff] }
  0x81   :  { %v297_v6 = vld [vmem:[#allocation3 + $0x40] sm:$0xff]  ;;  %v8504_v8 = vcombine.high %v417_v2, %v421_v4  ;;  %v8503_v9 = vcombine.low %v417_v2, %v421_v4  ;;  %2708 = vmatprep.subr.bf16.mxu1 %v8376_v3  ;;  %12445 = vst [vmem:[#allocation18_spill] sm:$0xff] %v10857_v63  ;;  %2853 = vmatprep.mubr.bf16.mxu0 %v10857_v63 }
  0x82   :  { %v301_v7 = vld [vmem:[#allocation3 + $0x60] sm:$0xff]  ;;  %2709 = vmatpush1.bf16.msra.mxu1 %v8375_v5 }
  0x83   :  { %v8384_v10 = vcombine.high %v297_v6, %v301_v7  ;;  %v425_v11 = vld [vmem:[#allocation3 + $0x440] sm:$0xff]  ;;  %2821 = vmatprep.subr.bf16.mxu0 %v8504_v8  ;;  %v8383_v18 = vcombine.low %v297_v6, %v301_v7 }
  0x84   :  { %v429_v12 = vld [vmem:[#allocation3 + $0x460] sm:$0xff]  ;;  %2822 = vmatpush1.bf16.msra.mxu0 %v8503_v9 }
  0x85   :  { %v305_v13 = vld [vmem:[#allocation3 + $0x80] sm:$0xff]  ;;  %v8512_v14 = vcombine.high %v425_v11, %v429_v12  ;;  %2710 = vmatprep.subr.bf16.mxu1 %v8384_v10  ;;  %v8511_v19 = vcombine.low %v425_v11, %v429_v12 }
  0x86   :  { %v309_v15 = vld [vmem:[#allocation3 + $0xa0] sm:$0xff]  ;;  %2711 = vmatpush1.bf16.msra.mxu1 %v8383_v18 }
  0x87   :  { %v433_v16 = vld [vmem:[#allocation3 + $0x480] sm:$0xff]  ;;  %v8392_v20 = vcombine.high %v305_v13, %v309_v15  ;;  %2823 = vmatprep.subr.bf16.mxu0 %v8512_v14  ;;  %v8391_v26 = vcombine.low %v305_v13, %v309_v15 }
  0x88   :  { %v437_v17 = vld [vmem:[#allocation3 + $0x4a0] sm:$0xff]  ;;  %2824 = vmatpush1.bf16.msra.mxu0 %v8511_v19 }
  0x89   :  { %v8520_v21 = vcombine.high %v433_v16, %v437_v17  ;;  %v313_v22 = vld [vmem:[#allocation3 + $0xc0] sm:$0xff]  ;;  %2712 = vmatprep.subr.bf16.mxu1 %v8392_v20  ;;  %v8519_v27 = vcombine.low %v433_v16, %v437_v17 }
  0x8a   :  { %v317_v23 = vld [vmem:[#allocation3 + $0xe0] sm:$0xff]  ;;  %2713 = vmatpush1.bf16.msra.mxu1 %v8391_v26 }
  0x8b   :  { %v441_v24 = vld [vmem:[#allocation3 + $0x4c0] sm:$0xff]  ;;  %v8400_v28 = vcombine.high %v313_v22, %v317_v23  ;;  %2825 = vmatprep.subr.bf16.mxu0 %v8520_v21  ;;  %v8399_v34 = vcombine.low %v313_v22, %v317_v23 }
  0x8c   :  { %v445_v25 = vld [vmem:[#allocation3 + $0x4e0] sm:$0xff]  ;;  %2826 = vmatpush1.bf16.msra.mxu0 %v8519_v27 }
  0x8d   :  { %v8528_v29 = vcombine.high %v441_v24, %v445_v25  ;;  %v321_v30 = vld [vmem:[#allocation3 + $0x100] sm:$0xff]  ;;  %2714 = vmatprep.subr.bf16.mxu1 %v8400_v28  ;;  %v8527_v35 = vcombine.low %v441_v24, %v445_v25 }
  0x8e   :  { %v325_v31 = vld [vmem:[#allocation3 + $0x120] sm:$0xff]  ;;  %2715 = vmatpush1.bf16.msra.mxu1 %v8399_v34 }
  0x8f   :  { %v449_v32 = vld [vmem:[#allocation3 + $0x500] sm:$0xff]  ;;  %v8408_v36 = vcombine.high %v321_v30, %v325_v31  ;;  %2827 = vmatprep.subr.bf16.mxu0 %v8528_v29  ;;  %v8407_v42 = vcombine.low %v321_v30, %v325_v31 }
  0x90   :  { %v453_v33 = vld [vmem:[#allocation3 + $0x520] sm:$0xff]  ;;  %2828 = vmatpush1.bf16.msra.mxu0 %v8527_v35 }
  0x91   :  { %v8536_v37 = vcombine.high %v449_v32, %v453_v33  ;;  %v329_v38 = vld [vmem:[#allocation3 + $0x140] sm:$0xff]  ;;  %2716 = vmatprep.subr.bf16.mxu1 %v8408_v36  ;;  %v8535_v43 = vcombine.low %v449_v32, %v453_v33 }
  0x92   :  { %v333_v39 = vld [vmem:[#allocation3 + $0x160] sm:$0xff]  ;;  %2717 = vmatpush1.bf16.msra.mxu1 %v8407_v42 }
  0x93   :  { %v457_v40 = vld [vmem:[#allocation3 + $0x540] sm:$0xff]  ;;  %v8416_v44 = vcombine.high %v329_v38, %v333_v39  ;;  %2829 = vmatprep.subr.bf16.mxu0 %v8536_v37  ;;  %v8415_v50 = vcombine.low %v329_v38, %v333_v39 }
  0x94   :  { %v461_v41 = vld [vmem:[#allocation3 + $0x560] sm:$0xff]  ;;  %2830 = vmatpush1.bf16.msra.mxu0 %v8535_v43 }
  0x95   :  { %v8544_v45 = vcombine.high %v457_v40, %v461_v41  ;;  %v337_v46 = vld [vmem:[#allocation3 + $0x180] sm:$0xff]  ;;  %2718 = vmatprep.subr.bf16.mxu1 %v8416_v44  ;;  %v8543_v51 = vcombine.low %v457_v40, %v461_v41 }
  0x96   :  { %v341_v47 = vld [vmem:[#allocation3 + $0x1a0] sm:$0xff]  ;;  %2719 = vmatpush1.bf16.msra.mxu1 %v8415_v50 }
  0x97   :  { %v465_v48 = vld [vmem:[#allocation3 + $0x580] sm:$0xff]  ;;  %v8424_v52 = vcombine.high %v337_v46, %v341_v47  ;;  %2831 = vmatprep.subr.bf16.mxu0 %v8544_v45  ;;  %v8423_v0 = vcombine.low %v337_v46, %v341_v47 }
  0x98   :  { %v469_v49 = vld [vmem:[#allocation3 + $0x5a0] sm:$0xff]  ;;  %2832 = vmatpush1.bf16.msra.mxu0 %v8543_v51 }
  0x99   :  { %v345_v53 = vld [vmem:[#allocation3 + $0x1c0] sm:$0xff]  ;;  %v8552_v56 = vcombine.high %v465_v48, %v469_v49  ;;  %2720 = vmatprep.subr.bf16.mxu1 %v8424_v52  ;;  %v8551_v1 = vcombine.low %v465_v48, %v469_v49 }
  0x9a   :  { %v129_v55 = vld [vmem:[%s12368_s0 + $0x40] sm:$0xff]  ;;  %2721 = vmatpush1.bf16.msra.mxu1 %v8423_v0 }
  0x9b   :  { %v349_v57 = vld [vmem:[#allocation3 + $0x1e0] sm:$0xff]  ;;  %v10849_v58 = vpack.c.bf16 %v129_v55, %v122_v54  ;;  %2833 = vmatprep.subr.bf16.mxu0 %v8552_v56 }
  0x9c   :  { %v473_v61 = vld [vmem:[#allocation3 + $0x5c0] sm:$0xff]  ;;  %v8432_v2 = vcombine.high %v345_v53, %v349_v57  ;;  %v8431_v8 = vcombine.low %v345_v53, %v349_v57  ;;  %2834 = vmatpush1.bf16.msra.mxu0 %v8551_v1 }
  0x9d   :  { %v477_v62 = vld [vmem:[#allocation3 + $0x5e0] sm:$0xff]  ;;  %2740 = vmatprep.mubr.bf16.mxu1 %v10849_v58 }
  0x9e   :  { %v8560_v3 = vcombine.high %v473_v61, %v477_v62  ;;  %v353_v4 = vld [vmem:[#allocation3 + $0x200] sm:$0xff]  ;;  %2722 = vmatprep.subr.bf16.mxu1 %v8432_v2  ;;  %v8559_v9 = vcombine.low %v473_v61, %v477_v62 }
  0x9f   :  { %v357_v5 = vld [vmem:[#allocation3 + $0x220] sm:$0xff]  ;;  %2723 = vmatpush1.bf16.msra.mxu1 %v8431_v8 }
  0xa0   :  { %v481_v6 = vld [vmem:[#allocation3 + $0x600] sm:$0xff]  ;;  %v8440_v10 = vcombine.high %v353_v4, %v357_v5  ;;  %2835 = vmatprep.subr.bf16.mxu0 %v8560_v3  ;;  %v8439_v16 = vcombine.low %v353_v4, %v357_v5 }
  0xa1   :  { %v485_v7 = vld [vmem:[#allocation3 + $0x620] sm:$0xff]  ;;  %2836 = vmatpush1.bf16.msra.mxu0 %v8559_v9 }
  0xa2   :  { %v8568_v11 = vcombine.high %v481_v6, %v485_v7  ;;  %v361_v12 = vld [vmem:[#allocation3 + $0x240] sm:$0xff]  ;;  %2724 = vmatprep.subr.bf16.mxu1 %v8440_v10  ;;  %v8567_v17 = vcombine.low %v481_v6, %v485_v7  ;;  %v290_v6 = vld [vmem:[#allocation3 + $0x8] sm:$0xff] }
  0xa3   :  { %v365_v13 = vld [vmem:[#allocation3 + $0x260] sm:$0xff]  ;;  %2725 = vmatpush1.bf16.msra.mxu1 %v8439_v16  ;;  %v294_v7 = vld [vmem:[#allocation3 + $0x28] sm:$0xff] }
  0xa4   :  { %v489_v14 = vld [vmem:[#allocation3 + $0x640] sm:$0xff]  ;;  %v8448_v18 = vcombine.high %v361_v12, %v365_v13  ;;  %2837 = vmatprep.subr.bf16.mxu0 %v8568_v11  ;;  %v8447_v24 = vcombine.low %v361_v12, %v365_v13  ;;  %v128_v12 = vld [vmem:[%s12368_s0 + $0x38] sm:$0xff]  ;;  %v8378_v16 = vcombine.high %v290_v6, %v294_v7 }
  0xa5   :  { %v493_v15 = vld [vmem:[#allocation3 + $0x660] sm:$0xff]  ;;  %2838 = vmatpush1.bf16.msra.mxu0 %v8567_v17 }
  0xa6   :  { %v8576_v19 = vcombine.high %v489_v14, %v493_v15  ;;  %v369_v20 = vld [vmem:[#allocation3 + $0x280] sm:$0xff]  ;;  %2726 = vmatprep.subr.bf16.mxu1 %v8448_v18  ;;  %v8575_v25 = vcombine.low %v489_v14, %v493_v15  ;;  %v123_v14 = vld [vmem:[%s12368_s0 + $0x10] sm:$0xff]  ;;  %v130_v15 = vld [vmem:[%s12368_s0 + $0x48] sm:$0xff] }
  0xa7   :  { %v373_v21 = vld [vmem:[#allocation3 + $0x2a0] sm:$0xff]  ;;  %2727 = vmatpush1.bf16.msra.mxu1 %v8447_v24  ;;  %v143_v24 = vld [vmem:[%s12368_s0 + $0xb0] sm:$0xff] }
  0xa8   :  { %v497_v22 = vld [vmem:[#allocation3 + $0x680] sm:$0xff]  ;;  %v8456_v26 = vcombine.high %v369_v20, %v373_v21  ;;  %2839 = vmatprep.subr.bf16.mxu0 %v8576_v19  ;;  %v8455_v32 = vcombine.low %v369_v20, %v373_v21  ;;  %v298_v19 = vld [vmem:[#allocation3 + $0x48] sm:$0xff] }
  0xa9   :  { %v501_v23 = vld [vmem:[#allocation3 + $0x6a0] sm:$0xff]  ;;  %2840 = vmatpush1.bf16.msra.mxu0 %v8575_v25  ;;  %v302_v20 = vld [vmem:[#allocation3 + $0x68] sm:$0xff]  ;;  %v10881_v25 = vpack.c.bf16 %v130_v15, %v123_v14 }
  0xaa   :  { %v8584_v27 = vcombine.high %v497_v22, %v501_v23  ;;  %v377_v28 = vld [vmem:[#allocation3 + $0x2c0] sm:$0xff]  ;;  %2728 = vmatprep.subr.bf16.mxu1 %v8456_v26  ;;  %v8583_v33 = vcombine.low %v497_v22, %v501_v23  ;;  %v136_v23 = vld [vmem:[%s12368_s0 + $0x78] sm:$0xff]  ;;  %v8377_v26 = vcombine.low %v290_v6, %v294_v7  ;;  %v334_v14 = vld [vmem:[#allocation3 + $0x168] sm:$0xff] }
  0xab   :  { %v381_v29 = vld [vmem:[#allocation3 + $0x2e0] sm:$0xff]  ;;  %2729 = vmatpush1.bf16.msra.mxu1 %v8455_v32  ;;  %12446 = vst [vmem:[#allocation19_spill] sm:$0xff] %v10881_v25  ;;  %v10889_v32 = vpack.c.bf16 %v143_v24, %v136_v23  ;;  %v156_v6 = vld [vmem:[%s12368_s0 + $0x118] sm:$0xff] }
  0xac   :  { %v505_v30 = vld [vmem:[#allocation3 + $0x6c0] sm:$0xff]  ;;  %v8464_v34 = vcombine.high %v377_v28, %v381_v29  ;;  %2841 = vmatprep.subr.bf16.mxu0 %v8584_v27  ;;  %v8463_v40 = vcombine.low %v377_v28, %v381_v29  ;;  %v138_v27 = vld [vmem:[%s12368_s0 + $0x88] sm:$0xff] }
  0xad   :  { %v509_v31 = vld [vmem:[#allocation3 + $0x6e0] sm:$0xff]  ;;  %2842 = vmatpush1.bf16.msra.mxu0 %v8583_v33  ;;  %v306_v33 = vld [vmem:[#allocation3 + $0x88] sm:$0xff] }
  0xae   :  { %v8592_v35 = vcombine.high %v505_v30, %v509_v31  ;;  %v385_v36 = vld [vmem:[#allocation3 + $0x300] sm:$0xff]  ;;  %2730 = vmatprep.subr.bf16.mxu1 %v8464_v34  ;;  %v8591_v41 = vcombine.low %v505_v30, %v509_v31  ;;  %v8386_v30 = vcombine.high %v298_v19, %v302_v20  ;;  %v310_v34 = vld [vmem:[#allocation3 + $0xa8] sm:$0xff] }
  0xaf   :  { %v389_v37 = vld [vmem:[#allocation3 + $0x320] sm:$0xff]  ;;  %2731 = vmatpush1.bf16.msra.mxu1 %v8463_v40  ;;  %v142_v40 = vld [vmem:[%s12368_s0 + $0xa8] sm:$0xff] }
  0xb0   :  { %v513_v38 = vld [vmem:[#allocation3 + $0x700] sm:$0xff]  ;;  %v8472_v42 = vcombine.high %v385_v36, %v389_v37  ;;  %2843 = vmatprep.subr.bf16.mxu0 %v8592_v35  ;;  %v8471_v48 = vcombine.low %v385_v36, %v389_v37 }
  0xb1   :  { %v517_v39 = vld [vmem:[#allocation3 + $0x720] sm:$0xff]  ;;  %2844 = vmatpush1.bf16.msra.mxu0 %v8591_v41 }
  0xb2   :  { %v8600_v43 = vcombine.high %v513_v38, %v517_v39  ;;  %v393_v44 = vld [vmem:[#allocation3 + $0x340] sm:$0xff]  ;;  %2732 = vmatprep.subr.bf16.mxu1 %v8472_v42  ;;  %v8599_v49 = vcombine.low %v513_v38, %v517_v39  ;;  %v8385_v38 = vcombine.low %v298_v19, %v302_v20  ;;  %v135_v39 = vld [vmem:[%s12368_s0 + $0x70] sm:$0xff] }
  0xb3   :  { %v397_v45 = vld [vmem:[#allocation3 + $0x360] sm:$0xff]  ;;  %2733 = vmatpush1.bf16.msra.mxu1 %v8471_v48  ;;  %v318_v48 = vld [vmem:[#allocation3 + $0xe8] sm:$0xff] }
  0xb4   :  { %v521_v46 = vld [vmem:[#allocation3 + $0x740] sm:$0xff]  ;;  %v8480_v50 = vcombine.high %v393_v44, %v397_v45  ;;  %2845 = vmatprep.subr.bf16.mxu0 %v8600_v43  ;;  %v8479_v56 = vcombine.low %v393_v44, %v397_v45  ;;  %v144_v43 = vld [vmem:[%s12368_s0 + $0xb8] sm:$0xff]  ;;  %v8394_v44 = vcombine.high %v306_v33, %v310_v34 }
  0xb5   :  { %v525_v47 = vld [vmem:[#allocation3 + $0x760] sm:$0xff]  ;;  %2846 = vmatpush1.bf16.msra.mxu0 %v8599_v49  ;;  %v10909_v49 = vpack.c.bf16 %v142_v40, %v135_v39 }
  0xb6   :  { %v8608_v51 = vcombine.high %v521_v46, %v525_v47  ;;  %v401_v52 = vld [vmem:[#allocation3 + $0x380] sm:$0xff]  ;;  %2734 = vmatprep.subr.bf16.mxu1 %v8480_v50  ;;  %v8607_v57 = vcombine.low %v521_v46, %v525_v47  ;;  %v314_v47 = vld [vmem:[#allocation3 + $0xc8] sm:$0xff] }
  0xb7   :  { %v405_v53 = vld [vmem:[#allocation3 + $0x3a0] sm:$0xff]  ;;  %2735 = vmatpush1.bf16.msra.mxu1 %v8479_v56  ;;  %v159_v56 = vld [vmem:[%s12368_s0 + $0x130] sm:$0xff] }
  0xb8   :  { %v529_v54 = vld [vmem:[#allocation3 + $0x780] sm:$0xff]  ;;  %v8488_v59 = vcombine.high %v401_v52, %v405_v53  ;;  %2847 = vmatprep.subr.bf16.mxu0 %v8608_v51  ;;  %v8487_v2 = vcombine.low %v401_v52, %v405_v53  ;;  %v150_v51 = vld [vmem:[%s12368_s0 + $0xe8] sm:$0xff] }
  0xb9   :  { %v533_v55 = vld [vmem:[#allocation3 + $0x7a0] sm:$0xff]  ;;  %2848 = vmatpush1.bf16.msra.mxu0 %v8607_v57 }
  0xba   :  { %v8616_v60 = vcombine.high %v529_v54, %v533_v55  ;;  %v409_v61 = vld [vmem:[#allocation3 + $0x3c0] sm:$0xff]  ;;  %2736 = vmatprep.subr.bf16.mxu1 %v8488_v59  ;;  %v8615_v3 = vcombine.low %v529_v54, %v533_v55  ;;  %v8393_v54 = vcombine.low %v306_v33, %v310_v34  ;;  %v152_v55 = vld [vmem:[%s12368_s0 + $0xf8] sm:$0xff]  ;;  %v8402_v59 = vcombine.high %v314_v47, %v318_v48 }
  0xbb   :  { %v413_v62 = vld [vmem:[#allocation3 + $0x3e0] sm:$0xff]  ;;  %2737 = vmatpush1.bf16.msra.mxu1 %v8487_v2 }
  0xbc   :  { %v537_v0 = vld [vmem:[#allocation3 + $0x7c0] sm:$0xff]  ;;  %v8496_v4 = vcombine.high %v409_v61, %v413_v62  ;;  %2849 = vmatprep.subr.bf16.mxu0 %v8616_v60  ;;  %v8495_v10 = vcombine.low %v409_v61, %v413_v62  ;;  %v322_v62 = vld [vmem:[#allocation3 + $0x108] sm:$0xff] }
  0xbd   :  { %v541_v1 = vld [vmem:[#allocation3 + $0x7e0] sm:$0xff]  ;;  %2850 = vmatpush1.bf16.msra.mxu0 %v8615_v3 }
  0xbe   :  { %v8624_v5 = vcombine.high %v537_v0, %v541_v1  ;;  %v545_v8 = vld [vmem:[#allocation3 + $0x800] sm:$0xff]  ;;  %2738 = vmatprep.subr.bf16.mxu1 %v8496_v4  ;;  %v8623_v13 = vcombine.low %v537_v0, %v541_v1  ;;  %v326_v0 = vld [vmem:[#allocation3 + $0x128] sm:$0xff]  ;;  %v10928_v1 = vpack.c.bf16 %v159_v56, %v152_v55  ;;  %v8401_v4 = vcombine.low %v314_v47, %v318_v48  ;;  %v180_v55 = vld [vmem:[%s12368_s0 + $0x1d8] sm:$0xff] }
  0xbf   :  { %v549_v9 = vld [vmem:[#allocation3 + $0x820] sm:$0xff]  ;;  %2739 = vmatpush1.bf16.msra.mxu1 %v8495_v10  ;;  %v8410_v10 = vcombine.high %v322_v62, %v326_v0  ;;  %v8409_v20 = vcombine.low %v322_v62, %v326_v0  ;;  %v187_v56 = vld [vmem:[%s12368_s0 + $0x210] sm:$0xff]  ;;  %v354_v0 = vld [vmem:[#allocation3 + $0x208] sm:$0xff] }
  0xc0   :  { %v121_v11 = vld [vmem:[%s12368_s0] sm:$0xff]  ;;  %2851 = vmatprep.subr.bf16.mxu0 %v8624_v5  ;;  %v8632_v17 = vcombine.high %v545_v8, %v549_v9  ;;  %v8631_v29 = vcombine.low %v545_v8, %v549_v9  ;;  %3160 = vmatprep.subr.bf16.mxu1 %v8378_v16  ;;  %12449 = vst [vmem:[#allocation22_spill] sm:$0xff] %v10928_v1  ;;  %v151_v8 = vld [vmem:[%s12368_s0 + $0xf0] sm:$0xff]  ;;  %v158_v9 = vld [vmem:[%s12368_s0 + $0x128] sm:$0xff] }
  0xc1   :  { %v553_v18 = vld [vmem:[#allocation3 + $0x840] sm:$0xff]  ;;  %v10873_v21 = vpack.c.bf16 %v128_v12, %v121_v11  ;;  %2852 = vmatpush1.bf16.msra.mxu0 %v8623_v13  ;;  %v330_v13 = vld [vmem:[#allocation3 + $0x148] sm:$0xff]  ;;  %v10953_v19 = vpack.c.bf16 %v158_v9, %v151_v8  ;;  %v184_v8 = vld [vmem:[%s12368_s0 + $0x1f8] sm:$0xff] }
  0xc2   :  { %v557_v22 = vld [vmem:[#allocation3 + $0x860] sm:$0xff]  ;;  %2934 = vmatprep.subr.bf16.mxu0 %v8632_v17  ;;  %v164_v17 = vld [vmem:[%s12368_s0 + $0x158] sm:$0xff] }
  0xc3   :  { %v145_v28 = vld [vmem:[%s12368_s0 + $0xc0] sm:$0xff]  ;;  %v8640_v31 = vcombine.high %v553_v18, %v557_v22  ;;  %2741 = vmatmul.mubr.bf16.vlgmr.msra.gmra.mrb[0].mxu1 %v10873_v21  ;;  %v8639_v41 = vcombine.low %v553_v18, %v557_v22  ;;  %v171_v18 = vld [vmem:[%s12368_s0 + $0x190] sm:$0xff]  ;;  %12450 = vst [vmem:[#allocation23_spill] sm:$0xff] %v10953_v19  ;;  %v166_v22 = vld [vmem:[%s12368_s0 + $0x168] sm:$0xff] }
  0xc4   :  { %v10892_v35 = vpack.c.bf16 %v145_v28, %v138_v27  ;;  %v561_v36 = vld [vmem:[#allocation3 + $0x880] sm:$0xff]  ;;  %2854 = vmatmul.mubr.bf16.vlgmr.msra.gmra.mrb[0].mxu0 %v10881_v25  ;;  %3161 = vmatpush1.bf16.msra.mxu1 %v8377_v26  ;;  %v8418_v26 = vcombine.high %v330_v13, %v334_v14  ;;  %v10961_v28 = vpack.c.bf16 %v171_v18, %v164_v17  ;;  %v366_v17 = vld [vmem:[#allocation3 + $0x268] sm:$0xff] }
  0xc5   :  { %v565_v37 = vld [vmem:[#allocation3 + $0x8a0] sm:$0xff]  ;;  %2935 = vmatpush1.bf16.msra.mxu0 %v8631_v29  ;;  %3162 = vmatprep.subr.bf16.mxu1 %v8386_v30  ;;  %v338_v29 = vld [vmem:[#allocation3 + $0x188] sm:$0xff] }
  0xc6   :  { %12447 = vst [vmem:[#allocation20_spill] sm:$0xff] %v10892_v35  ;;  %v137_v42 = vld [vmem:[%s12368_s0 + $0x80] sm:$0xff]  ;;  %2936 = vmatprep.subr.bf16.mxu0 %v8640_v31  ;;  %2750 = vmatprep.mubr.bf16.mxu1 %v10889_v32  ;;  %v8648_v45 = vcombine.high %v561_v36, %v565_v37  ;;  %v8647_v57 = vcombine.low %v561_v36, %v565_v37  ;;  %v342_v30 = vld [vmem:[#allocation3 + $0x1a8] sm:$0xff]  ;;  %v163_v37 = vld [vmem:[%s12368_s0 + $0x150] sm:$0xff] }
  0xc7   :  { %v569_v46 = vld [vmem:[#allocation3 + $0x8c0] sm:$0xff]  ;;  %2863 = vmatprep.mubr.bf16.mxu0 %v10892_v35  ;;  %v10917_v53 = vpack.c.bf16 %v144_v43, %v137_v42  ;;  %v8417_v36 = vcombine.low %v330_v13, %v334_v14  ;;  %v8426_v42 = vcombine.high %v338_v29, %v342_v30 }
  0xc8   :  { %v573_v50 = vld [vmem:[#allocation3 + $0x8e0] sm:$0xff]  ;;  %3163 = vmatpush1.bf16.msra.mxu1 %v8385_v38  ;;  %v170_v38 = vld [vmem:[%s12368_s0 + $0x188] sm:$0xff] }
  0xc9   :  { %v157_v52 = vld [vmem:[%s12368_s0 + $0x120] sm:$0xff]  ;;  %12448 = vst [vmem:[#allocation21_spill] sm:$0xff] %v10917_v53  ;;  %2937 = vmatpush1.bf16.msra.mxu0 %v8639_v41  ;;  %3164 = vmatprep.subr.bf16.mxu1 %v8394_v44  ;;  %v8656_v60 = vcombine.high %v569_v46, %v573_v50  ;;  %v8655_v7 = vcombine.low %v569_v46, %v573_v50  ;;  %v172_v41 = vld [vmem:[%s12368_s0 + $0x198] sm:$0xff]  ;;  %v350_v46 = vld [vmem:[#allocation3 + $0x1e8] sm:$0xff] }
  0xca   :  { %2938 = vmatprep.subr.bf16.mxu0 %v8648_v45  ;;  %v10925_v61 = vpack.c.bf16 %v157_v52, %v150_v51  ;;  %v577_v2 = vld [vmem:[#allocation3 + $0x900] sm:$0xff]  ;;  %v346_v45 = vld [vmem:[#allocation3 + $0x1c8] sm:$0xff]  ;;  %v10981_v47 = vpack.c.bf16 %v170_v38, %v163_v37  ;;  %v191_v37 = vld [vmem:[%s12368_s0 + $0x230] sm:$0xff] }
  0xcb   :  { %2751 = vmatmul.mubr.bf16.gmra.mrb[4].mxu1 %v10909_v49  ;;  %v581_v3 = vld [vmem:[#allocation3 + $0x920] sm:$0xff]  ;;  %v178_v50 = vld [vmem:[%s12368_s0 + $0x1c8] sm:$0xff] }
  0xcc   :  { %2864 = vmatmul.mubr.bf16.gmra.mrb[4].mxu0 %v10917_v53  ;;  %3165 = vmatpush1.bf16.msra.mxu1 %v8393_v54  ;;  %v149_v5 = vld [vmem:[%s12368_s0 + $0xe0] sm:$0xff]  ;;  %v8664_v11 = vcombine.high %v577_v2, %v581_v3  ;;  %v8663_v24 = vcombine.low %v577_v2, %v581_v3  ;;  %v8425_v54 = vcombine.low %v338_v29, %v342_v30  ;;  %v358_v2 = vld [vmem:[#allocation3 + $0x228] sm:$0xff] }
  0xcd   :  { %2939 = vmatpush1.bf16.msra.mxu0 %v8647_v57  ;;  %3166 = vmatprep.subr.bf16.mxu1 %v8402_v59  ;;  %v585_v12 = vld [vmem:[#allocation3 + $0x940] sm:$0xff]  ;;  %v10945_v15 = vpack.c.bf16 %v156_v6, %v149_v5  ;;  %v8434_v59 = vcombine.high %v346_v45, %v350_v46  ;;  %v11000_v3 = vpack.c.bf16 %v187_v56, %v180_v55  ;;  %v370_v38 = vld [vmem:[#allocation3 + $0x288] sm:$0xff] }
  0xce   :  { %2940 = vmatprep.subr.bf16.mxu0 %v8656_v60  ;;  %2760 = vmatprep.mubr.bf16.mxu1 %v10925_v61  ;;  %v589_v16 = vld [vmem:[#allocation3 + $0x960] sm:$0xff]  ;;  %v8433_v6 = vcombine.low %v346_v45, %v350_v46  ;;  %v200_v46 = vld [vmem:[%s12368_s0 + $0x278] sm:$0xff]  ;;  %v382_v56 = vld [vmem:[#allocation3 + $0x2e8] sm:$0xff] }
  0xcf   :  { %2873 = vmatprep.mubr.bf16.mxu0 %v10928_v1  ;;  %v173_v23 = vld [vmem:[%s12368_s0 + $0x1a0] sm:$0xff]  ;;  %v8672_v27 = vcombine.high %v585_v12, %v589_v16  ;;  %v8671_v39 = vcombine.low %v585_v12, %v589_v16  ;;  %v8442_v12 = vcombine.high %v354_v0, %v358_v2  ;;  %v362_v16 = vld [vmem:[#allocation3 + $0x248] sm:$0xff] }
  0xd0   :  { %3167 = vmatpush1.bf16.msra.mxu1 %v8401_v4  ;;  %v10964_v31 = vpack.c.bf16 %v173_v23, %v166_v22  ;;  %v593_v33 = vld [vmem:[#allocation3 + $0x980] sm:$0xff]  ;;  %v192_v22 = vld [vmem:[%s12368_s0 + $0x238] sm:$0xff]  ;;  %v199_v23 = vld [vmem:[%s12368_s0 + $0x270] sm:$0xff] }
  0xd1   :  { %2941 = vmatpush1.bf16.msra.mxu0 %v8655_v7  ;;  %3168 = vmatprep.subr.bf16.mxu1 %v8410_v10  ;;  %v597_v34 = vld [vmem:[#allocation3 + $0x9a0] sm:$0xff]  ;;  %v179_v10 = vld [vmem:[%s12368_s0 + $0x1d0] sm:$0xff] }
  0xd2   :  { %2942 = vmatprep.subr.bf16.mxu0 %v8664_v11  ;;  %v165_v40 = vld [vmem:[%s12368_s0 + $0x160] sm:$0xff]  ;;  %v8680_v43 = vcombine.high %v593_v33, %v597_v34  ;;  %v8679_v57 = vcombine.low %v593_v33, %v597_v34  ;;  %v186_v11 = vld [vmem:[%s12368_s0 + $0x208] sm:$0xff]  ;;  %v8450_v33 = vcombine.high %v362_v16, %v366_v17 }
  0xd3   :  { %2761 = vmatmul.mubr.bf16.gmra.mrb[8].mxu1 %v10945_v15  ;;  %v601_v44 = vld [vmem:[#allocation3 + $0x9c0] sm:$0xff]  ;;  %v10989_v52 = vpack.c.bf16 %v172_v41, %v165_v40  ;;  %v198_v41 = vld [vmem:[%s12368_s0 + $0x268] sm:$0xff] }
  0xd4   :  { %2874 = vmatmul.mubr.bf16.gmra.mrb[8].mxu0 %v10953_v19  ;;  %3169 = vmatpush1.bf16.msra.mxu1 %v8409_v20  ;;  %v605_v48 = vld [vmem:[#allocation3 + $0x9e0] sm:$0xff] }
  0xd5   :  { %2943 = vmatpush1.bf16.msra.mxu0 %v8663_v24  ;;  %3170 = vmatprep.subr.bf16.mxu1 %v8418_v26  ;;  %v185_v51 = vld [vmem:[%s12368_s0 + $0x200] sm:$0xff]  ;;  %12451 = vst [vmem:[#allocation24_spill] sm:$0xff] %v10989_v52  ;;  %v8688_v60 = vcombine.high %v601_v44, %v605_v48  ;;  %v8687_v9 = vcombine.low %v601_v44, %v605_v48  ;;  %v378_v48 = vld [vmem:[#allocation3 + $0x2c8] sm:$0xff] }
  0xd6   :  { %2944 = vmatprep.subr.bf16.mxu0 %v8672_v27  ;;  %2770 = vmatprep.mubr.bf16.mxu1 %v10961_v28  ;;  %v10997_v62 = vpack.c.bf16 %v185_v51, %v178_v50  ;;  %v609_v4 = vld [vmem:[#allocation3 + $0xa00] sm:$0xff]  ;;  %v11025_v24 = vpack.c.bf16 %v186_v11, %v179_v10  ;;  %v8441_v26 = vcombine.low %v354_v0, %v358_v2  ;;  %v194_v27 = vld [vmem:[%s12368_s0 + $0x248] sm:$0xff]  ;;  %v208_v0 = vld [vmem:[%s12368_s0 + $0x2b8] sm:$0xff] }
  0xd7   :  { %2883 = vmatprep.mubr.bf16.mxu0 %v10964_v31  ;;  %v613_v5 = vld [vmem:[#allocation3 + $0xa20] sm:$0xff]  ;;  %v8449_v44 = vcombine.low %v362_v16, %v366_v17  ;;  %v215_v2 = vld [vmem:[%s12368_s0 + $0x2f0] sm:$0xff]  ;;  %v386_v16 = vld [vmem:[#allocation3 + $0x308] sm:$0xff] }
  0xd8   :  { %3171 = vmatpush1.bf16.msra.mxu1 %v8417_v36  ;;  %v177_v7 = vld [vmem:[%s12368_s0 + $0x1c0] sm:$0xff]  ;;  %v8696_v13 = vcombine.high %v609_v4, %v613_v5  ;;  %12453 = vst [vmem:[#allocation26_spill] sm:$0xff] %v11025_v24  ;;  %v8695_v30 = vcombine.low %v609_v4, %v613_v5  ;;  %v11033_v36 = vpack.c.bf16 %v199_v23, %v192_v22  ;;  %v390_v17 = vld [vmem:[#allocation3 + $0x328] sm:$0xff]  ;;  %v207_v22 = vld [vmem:[%s12368_s0 + $0x2b0] sm:$0xff] }
  0xd9   :  { %2945 = vmatpush1.bf16.msra.mxu0 %v8671_v39  ;;  %3172 = vmatprep.subr.bf16.mxu1 %v8426_v42  ;;  %v617_v14 = vld [vmem:[#allocation3 + $0xa40] sm:$0xff]  ;;  %v11017_v18 = vpack.c.bf16 %v184_v8, %v177_v7  ;;  %v374_v39 = vld [vmem:[#allocation3 + $0x2a8] sm:$0xff]  ;;  %v11065_v4 = vpack.c.bf16 %v198_v41, %v191_v37  ;;  %v8466_v8 = vcombine.high %v378_v48, %v382_v56 }
  0xda   :  { %2946 = vmatprep.subr.bf16.mxu0 %v8680_v43  ;;  %v621_v20 = vld [vmem:[#allocation3 + $0xa60] sm:$0xff]  ;;  %12454 = vst [vmem:[#allocation27_spill] sm:$0xff] %v11033_v36  ;;  %v8458_v51 = vcombine.high %v370_v38, %v374_v39  ;;  %v214_v23 = vld [vmem:[%s12368_s0 + $0x2e8] sm:$0xff] }
  0xdb   :  { %2771 = vmatmul.mubr.bf16.gmra.mrb[12].mxu1 %v10981_v47  ;;  %12452 = vst [vmem:[#allocation25_spill] sm:$0xff] %v11017_v18  ;;  %v201_v29 = vld [vmem:[%s12368_s0 + $0x280] sm:$0xff]  ;;  %v8704_v34 = vcombine.high %v617_v14, %v621_v20  ;;  %v8703_v50 = vcombine.low %v617_v14, %v621_v20  ;;  %12455 = vst [vmem:[#allocation28_spill] sm:$0xff] %v11065_v4  ;;  %v11078_v20 = vpack.c.bf16 %v215_v2, %v208_v0  ;;  %v398_v37 = vld [vmem:[#allocation3 + $0x368] sm:$0xff] }
  0xdc   :  { %2884 = vmatmul.mubr.bf16.gmra.mrb[12].mxu0 %v10989_v52  ;;  %3173 = vmatpush1.bf16.msra.mxu1 %v8425_v54  ;;  %v11039_v40 = vpack.c.bf16 %v201_v29, %v194_v27  ;;  %v625_v42 = vld [vmem:[#allocation3 + $0xa80] sm:$0xff]  ;;  %v394_v27 = vld [vmem:[#allocation3 + $0x348] sm:$0xff] }
  0xdd   :  { %2947 = vmatpush1.bf16.msra.mxu0 %v8679_v57  ;;  %3174 = vmatprep.subr.bf16.mxu1 %v8434_v59  ;;  %v629_v43 = vld [vmem:[#allocation3 + $0xaa0] sm:$0xff]  ;;  %v206_v57 = vld [vmem:[%s12368_s0 + $0x2a8] sm:$0xff] }
  0xde   :  { %2948 = vmatprep.subr.bf16.mxu0 %v8688_v60  ;;  %2780 = vmatprep.mubr.bf16.mxu1 %v10997_v62  ;;  %v193_v45 = vld [vmem:[%s12368_s0 + $0x240] sm:$0xff]  ;;  %v8712_v60 = vcombine.high %v625_v42, %v629_v43  ;;  %v8711_v7 = vcombine.low %v625_v42, %v629_v43  ;;  %v222_v42 = vld [vmem:[%s12368_s0 + $0x328] sm:$0xff] }
  0xdf   :  { %2893 = vmatprep.mubr.bf16.mxu0 %v11000_v3  ;;  %v633_v54 = vld [vmem:[#allocation3 + $0xac0] sm:$0xff]  ;;  %v11067_v5 = vpack.c.bf16 %v200_v46, %v193_v45  ;;  %v11103_v45 = vpack.c.bf16 %v214_v23, %v207_v22  ;;  %v8473_v46 = vcombine.low %v386_v16, %v390_v17  ;;  %v406_v0 = vld [vmem:[#allocation3 + $0x3a8] sm:$0xff] }
  0xe0   :  { %3175 = vmatpush1.bf16.msra.mxu1 %v8433_v6  ;;  %v637_v55 = vld [vmem:[#allocation3 + $0xae0] sm:$0xff]  ;;  %v8457_v6 = vcombine.low %v370_v38, %v374_v39  ;;  %v220_v38 = vld [vmem:[%s12368_s0 + $0x318] sm:$0xff]  ;;  %v227_v39 = vld [vmem:[%s12368_s0 + $0x350] sm:$0xff] }
  0xe1   :  { %2949 = vmatpush1.bf16.msra.mxu0 %v8687_v9  ;;  %3176 = vmatprep.subr.bf16.mxu1 %v8442_v12  ;;  %v213_v59 = vld [vmem:[%s12368_s0 + $0x2e0] sm:$0xff]  ;;  %12456 = vst [vmem:[#allocation29_spill] sm:$0xff] %v11067_v5  ;;  %v8720_v10 = vcombine.high %v633_v54, %v637_v55  ;;  %v8719_v29 = vcombine.low %v633_v54, %v637_v55  ;;  %12459 = vst [vmem:[#allocation32_spill] sm:$0xff] %v11103_v45 }
  0xe2   :  { %2950 = vmatprep.subr.bf16.mxu0 %v8696_v13  ;;  %v641_v9 = vld [vmem:[#allocation3 + $0xb00] sm:$0xff]  ;;  %v11069_v11 = vpack.c.bf16 %v213_v59, %v206_v57  ;;  %v212_v13 = vld [vmem:[%s12368_s0 + $0x2d8] sm:$0xff]  ;;  %v11105_v55 = vpack.c.bf16 %v227_v39, %v220_v38  ;;  %v226_v57 = vld [vmem:[%s12368_s0 + $0x348] sm:$0xff] }
  0xe3   :  { %2781 = vmatmul.mubr.bf16.gmra.mrb[16].mxu1 %v11017_v18  ;;  %v205_v12 = vld [vmem:[%s12368_s0 + $0x2a0] sm:$0xff]  ;;  %v422_v39 = vld [vmem:[#allocation3 + $0x428] sm:$0xff] }
  0xe4   :  { %2894 = vmatmul.mubr.bf16.gmra.mrb[16].mxu0 %v11025_v24  ;;  %3177 = vmatpush1.bf16.msra.mxu1 %v8441_v26  ;;  %12457 = vst [vmem:[#allocation30_spill] sm:$0xff] %v11069_v11  ;;  %v645_v14 = vld [vmem:[#allocation3 + $0xb20] sm:$0xff]  ;;  %v8465_v26 = vcombine.low %v378_v48, %v382_v56  ;;  %12460 = vst [vmem:[#allocation33_spill] sm:$0xff] %v11105_v55  ;;  %v219_v56 = vld [vmem:[%s12368_s0 + $0x310] sm:$0xff] }
  0xe5   :  { %2951 = vmatpush1.bf16.msra.mxu0 %v8695_v30  ;;  %3178 = vmatprep.subr.bf16.mxu1 %v8450_v33  ;;  %v8474_v30 = vcombine.high %v386_v16, %v390_v17  ;;  %v649_v33 = vld [vmem:[#allocation3 + $0xb40] sm:$0xff]  ;;  %v8728_v41 = vcombine.high %v641_v9, %v645_v14  ;;  %v8727_v48 = vcombine.low %v641_v9, %v645_v14  ;;  %v410_v14 = vld [vmem:[#allocation3 + $0x3c8] sm:$0xff] }
  0xe6   :  { %2952 = vmatprep.subr.bf16.mxu0 %v8704_v34  ;;  %2790 = vmatprep.mubr.bf16.mxu1 %v11033_v36  ;;  %v653_v34 = vld [vmem:[#allocation3 + $0xb60] sm:$0xff]  ;;  %v414_v16 = vld [vmem:[#allocation3 + $0x3e8] sm:$0xff] }
  0xe7   :  { %2903 = vmatprep.mubr.bf16.mxu0 %v11039_v40  ;;  %v229_v43 = vld [vmem:[%s12368_s0 + $0x360] sm:$0xff]  ;;  %v8736_v54 = vcombine.high %v649_v33, %v653_v34  ;;  %v8735_v9 = vcombine.low %v649_v33, %v653_v34  ;;  %v126_v17 = vld [vmem:[%s12368_s0 + $0x28] sm:$0xff]  ;;  %v8498_v33 = vcombine.high %v410_v14, %v414_v16 }
  0xe8   :  { %3179 = vmatpush1.bf16.msra.mxu1 %v8449_v44  ;;  %v11101_v44 = vpack.c.bf16 %v212_v13, %v205_v12  ;;  %v661_v59 = vld [vmem:[#allocation3 + $0xba0] sm:$0xff]  ;;  %v11114_v2 = vpack.c.bf16 %v229_v43, %v222_v42  ;;  %v418_v34 = vld [vmem:[#allocation3 + $0x408] sm:$0xff] }
  0xe9   :  { %2953 = vmatpush1.bf16.msra.mxu0 %v8703_v50  ;;  %3180 = vmatprep.subr.bf16.mxu1 %v8458_v51  ;;  %v8482_v50 = vcombine.high %v394_v27, %v398_v37  ;;  %v657_v51 = vld [vmem:[#allocation3 + $0xb80] sm:$0xff] }
  0xea   :  { %2954 = vmatprep.subr.bf16.mxu0 %v8712_v60  ;;  %12458 = vst [vmem:[#allocation31_spill] sm:$0xff] %v11101_v44  ;;  %v402_v60 = vld [vmem:[#allocation3 + $0x388] sm:$0xff]  ;;  %v665_v12 = vld [vmem:[#allocation3 + $0xbc0] sm:$0xff]  ;;  %v8744_v22 = vcombine.high %v657_v51, %v661_v59 }
  0xeb   :  { %2791 = vmatmul.mubr.bf16.gmra.mrb[20].mxu1 %v11065_v4  ;;  %v669_v13 = vld [vmem:[#allocation3 + $0xbe0] sm:$0xff] }
  0xec   :  { %2904 = vmatmul.mubr.bf16.gmra.mrb[20].mxu0 %v11067_v5  ;;  %3181 = vmatpush1.bf16.msra.mxu1 %v8457_v6  ;;  %v221_v6 = vld [vmem:[%s12368_s0 + $0x320] sm:$0xff] }
  0xed   :  { %2955 = vmatpush1.bf16.msra.mxu0 %v8711_v7  ;;  %3182 = vmatprep.subr.bf16.mxu1 %v8466_v8  ;;  %v228_v7 = vld [vmem:[%s12368_s0 + $0x358] sm:$0xff]  ;;  %v8481_v8 = vcombine.low %v394_v27, %v398_v37  ;;  %v133_v23 = vld [vmem:[%s12368_s0 + $0x60] sm:$0xff]  ;;  %v8752_v37 = vcombine.high %v665_v12, %v669_v13 }
  0xee   :  { %2956 = vmatprep.subr.bf16.mxu0 %v8720_v10  ;;  %2800 = vmatprep.mubr.bf16.mxu1 %v11069_v11  ;;  %v8490_v10 = vcombine.high %v402_v60, %v406_v0  ;;  %v11133_v27 = vpack.c.bf16 %v228_v7, %v221_v6  ;;  %v11135_v38 = vpack.c.bf16 %v133_v23, %v126_v17  ;;  %v677_v42 = vld [vmem:[#allocation3 + $0xc20] sm:$0xff]  ;;  %v11154_v6 = vld [vmem:[#allocation3 + $0x30] sm:$0xff]  ;;  %v146_v17 = vld [vmem:[%s12368_s0 + $0xc8] sm:$0xff] }
  0xef   :  { %2913 = vmatprep.mubr.bf16.mxu0 %v11078_v20  ;;  %v125_v43 = vld [vmem:[%s12368_s0 + $0x20] sm:$0xff] }
  0xf0   :  { %3183 = vmatpush1.bf16.msra.mxu1 %v8465_v26  ;;  %v11131_v26 = vpack.c.bf16 %v226_v57, %v219_v56  ;;  %v430_v56 = vld [vmem:[#allocation3 + $0x468] sm:$0xff]  ;;  %v140_v57 = vld [vmem:[%s12368_s0 + $0x98] sm:$0xff] }
  0xf1   :  { %2957 = vmatpush1.bf16.msra.mxu0 %v8719_v29  ;;  %3184 = vmatprep.subr.bf16.mxu1 %v8474_v30  ;;  %v8489_v29 = vcombine.low %v402_v60, %v406_v0  ;;  %v8743_v30 = vcombine.low %v657_v51, %v661_v59  ;;  %v8751_v51 = vcombine.low %v665_v12, %v669_v13  ;;  %v147_v59 = vld [vmem:[%s12368_s0 + $0xd0] sm:$0xff]  ;;  %v434_v12 = vld [vmem:[#allocation3 + $0x488] sm:$0xff] }
  0xf2   :  { %2958 = vmatprep.subr.bf16.mxu0 %v8728_v41  ;;  %12461 = vst [vmem:[#allocation34_spill] sm:$0xff] %v11131_v26  ;;  %v673_v41 = vld [vmem:[#allocation3 + $0xc00] sm:$0xff]  ;;  %v11152_v0 = vld [vmem:[#allocation3 + $0x10] sm:$0xff]  ;;  %v438_v13 = vld [vmem:[#allocation3 + $0x4a8] sm:$0xff] }
  0xf3   :  { %2801 = vmatmul.mubr.bf16.gmra.mrb[24].mxu1 %v11101_v44  ;;  %v8760_v60 = vcombine.high %v673_v41, %v677_v42 }
  0xf4   :  { %2914 = vmatmul.mubr.bf16.gmra.mrb[24].mxu0 %v11103_v45  ;;  %3185 = vmatpush1.bf16.msra.mxu1 %v8473_v46  ;;  %v132_v46 = vld [vmem:[%s12368_s0 + $0x58] sm:$0xff] }
  0xf5   :  { %2959 = vmatpush1.bf16.msra.mxu0 %v8727_v48  ;;  %3186 = vmatprep.subr.bf16.mxu1 %v8482_v50  ;;  %v8497_v48 = vcombine.low %v410_v14, %v414_v16  ;;  %v426_v50 = vld [vmem:[#allocation3 + $0x448] sm:$0xff]  ;;  %v11157_v7 = vpack.c.bf16 %v132_v46, %v125_v43  ;;  %v8759_v14 = vcombine.low %v673_v41, %v677_v42  ;;  %v139_v16 = vld [vmem:[%s12368_s0 + $0x90] sm:$0xff] }
  0xf6   :  { %2960 = vmatprep.subr.bf16.mxu0 %v8736_v54  ;;  %2810 = vmatprep.mubr.bf16.mxu1 %v11105_v55  ;;  %v8506_v54 = vcombine.high %v418_v34, %v422_v39  ;;  %v8513_v23 = vcombine.low %v426_v50, %v430_v56  ;;  %v8521_v41 = vcombine.low %v434_v12, %v438_v13  ;;  %v450_v46 = vld [vmem:[#allocation3 + $0x508] sm:$0xff] }
  0xf7   :  { %2923 = vmatprep.mubr.bf16.mxu0 %v11114_v2 }
  0xf8   :  { %3187 = vmatpush1.bf16.msra.mxu1 %v8481_v8  ;;  %v8505_v8 = vcombine.low %v418_v34, %v422_v39  ;;  %v154_v34 = vld [vmem:[%s12368_s0 + $0x108] sm:$0xff]  ;;  %v11179_v39 = vpack.c.bf16 %v146_v17, %v139_v16 }
  0xf9   :  { %2961 = vmatpush1.bf16.msra.mxu0 %v8735_v9  ;;  %3188 = vmatprep.subr.bf16.mxu1 %v8490_v10  ;;  %v8514_v9 = vcombine.high %v426_v50, %v430_v56  ;;  %v11159_v10 = vpack.c.bf16 %v147_v59, %v140_v57  ;;  %v153_v50 = vld [vmem:[%s12368_s0 + $0x100] sm:$0xff]  ;;  %v458_v56 = vld [vmem:[#allocation3 + $0x548] sm:$0xff] }
  0xfa   :  { %2962 = vmatprep.subr.bf16.mxu0 %v8744_v22  ;;  %v8380_v22 = vcombine.high %v11152_v0, %v11154_v6  ;;  %v462_v57 = vld [vmem:[#allocation3 + $0x568] sm:$0xff] }
  0xfb   :  { %2811 = vmatmul.mubr.bf16.gmra.mrb[28].mxu1 %v11131_v26  ;;  %v466_v16 = vld [vmem:[#allocation3 + $0x588] sm:$0xff] }
  0xfc   :  { %2924 = vmatmul.mubr.bf16.gmra.mrb[28].mxu0 %v11133_v27  ;;  %3189 = vmatpush1.bf16.msra.mxu1 %v8489_v29  ;;  %v442_v29 = vld [vmem:[#allocation3 + $0x4c8] sm:$0xff] }
  0xfd   :  { %2963 = vmatpush1.bf16.msra.mxu0 %v8743_v30  ;;  %3190 = vmatprep.subr.bf16.mxu1 %v8498_v33  ;;  %v446_v30 = vld [vmem:[#allocation3 + $0x4e8] sm:$0xff]  ;;  %v8522_v33 = vcombine.high %v434_v12, %v438_v13  ;;  %v8546_v13 = vcombine.high %v458_v56, %v462_v57 }
  0xfe   :  { %2964 = vmatprep.subr.bf16.mxu0 %v8752_v37  ;;  %2966 = vmatprep.mubr.bf16.mxu0 %v11135_v38  ;;  %v161_v37 = vld [vmem:[%s12368_s0 + $0x140] sm:$0xff]  ;;  %v8530_v42 = vcombine.high %v442_v29, %v446_v30  ;;  %v470_v17 = vld [vmem:[#allocation3 + $0x5a8] sm:$0xff] }
  0xff   :  { %3192 = vmatprep.mubr.bf16.mxu1 %v10849_v58  ;;  %v11181_v43 = vpack.c.bf16 %v161_v37, %v154_v34  ;;  %v478_v34 = vld [vmem:[#allocation3 + $0x5e8] sm:$0xff] }
 0x100   :  { %3191 = vmatpush1.bf16.msra.mxu1 %v8497_v48  ;;  %v454_v48 = vld [vmem:[#allocation3 + $0x528] sm:$0xff] }
 0x101   :  { %2965 = vmatpush1.bf16.msra.mxu0 %v8751_v51  ;;  %3273 = vmatprep.subr.bf16.mxu1 %v8506_v54  ;;  %v160_v51 = vld [vmem:[%s12368_s0 + $0x138] sm:$0xff]  ;;  %v8529_v54 = vcombine.low %v442_v29, %v446_v30  ;;  %v8538_v59 = vcombine.high %v450_v46, %v454_v48  ;;  %v8537_v12 = vcombine.low %v450_v46, %v454_v48  ;;  %v474_v30 = vld [vmem:[#allocation3 + $0x5c8] sm:$0xff] }
 0x102   :  { %3047 = vmatprep.subr.bf16.mxu0 %v8760_v60  ;;  %v168_v60 = vld [vmem:[%s12368_s0 + $0x178] sm:$0xff]  ;;  %v8545_v29 = vcombine.low %v458_v56, %v462_v57  ;;  %v182_v37 = vld [vmem:[%s12368_s0 + $0x1e8] sm:$0xff]  ;;  %v8553_v46 = vcombine.low %v466_v16, %v470_v17  ;;  %v8562_v48 = vcombine.high %v474_v30, %v478_v34  ;;  %v181_v56 = vld [vmem:[%s12368_s0 + $0x1e0] sm:$0xff] }
 0x103   :  { %3193 = vmatmul.mubr.bf16.vlgmr.msra.gmra.mrb[32].mxu1 %v10873_v21  ;;  %v188_v57 = vld [vmem:[%s12368_s0 + $0x218] sm:$0xff] }
 0x104   :  { %2967 = vmatmul.mubr.bf16.vlgmr.msra.gmra.mrb[0].mxu0 %v11157_v7  ;;  %3274 = vmatpush1.bf16.msra.mxu1 %v8505_v8  ;;  %v175_v8 = vld [vmem:[%s12368_s0 + $0x1b0] sm:$0xff] }
 0x105   :  { %3275 = vmatprep.subr.bf16.mxu1 %v8514_v9  ;;  %2976 = vmatprep.mubr.bf16.mxu0 %v11159_v10  ;;  %v11199_v9 = vpack.c.bf16 %v160_v51, %v153_v50  ;;  %v482_v51 = vld [vmem:[#allocation3 + $0x608] sm:$0xff] }
 0x106   :  { %3202 = vmatprep.mubr.bf16.mxu1 %v10889_v32  ;;  %3048 = vmatpush1.bf16.msra.mxu0 %v8759_v14  ;;  %v11201_v14 = vpack.c.bf16 %v175_v8, %v168_v60  ;;  %v490_v60 = vld [vmem:[#allocation3 + $0x648] sm:$0xff] }
 0x107   :  { %3612 = vmatprep.subr.bf16.mxu0 %v8380_v22  ;;  %v167_v22 = vld [vmem:[%s12368_s0 + $0x170] sm:$0xff]  ;;  %v494_v8 = vld [vmem:[#allocation3 + $0x668] sm:$0xff] }
 0x108   :  { %3276 = vmatpush1.bf16.msra.mxu1 %v8513_v23  ;;  %v174_v23 = vld [vmem:[%s12368_s0 + $0x1a8] sm:$0xff] }
 0x109   :  { %3277 = vmatprep.subr.bf16.mxu1 %v8522_v33  ;;  %v8554_v33 = vcombine.high %v466_v16, %v470_v17  ;;  %v203_v16 = vld [vmem:[%s12368_s0 + $0x290] sm:$0xff]  ;;  %v11239_v17 = vpack.c.bf16 %v188_v57, %v181_v56  ;;  %v217_v56 = vld [vmem:[%s12368_s0 + $0x300] sm:$0xff] }
 0x10b   :  { %3203 = vmatmul.mubr.bf16.gmra.mrb[36].mxu1 %v10909_v49  ;;  %12463 = vst [vmem:[#allocation36_spill] sm:$0xff] %v11239_v17 }
 0x10c   :  { %2977 = vmatmul.mubr.bf16.gmra.mrb[4].mxu0 %v11179_v39  ;;  %3278 = vmatpush1.bf16.msra.mxu1 %v8521_v41  ;;  %v189_v41 = vld [vmem:[%s12368_s0 + $0x220] sm:$0xff] }
 0x10d   :  { %3279 = vmatprep.subr.bf16.mxu1 %v8530_v42  ;;  %2986 = vmatprep.mubr.bf16.mxu0 %v11181_v43  ;;  %v11219_v42 = vpack.c.bf16 %v174_v23, %v167_v22  ;;  %v11221_v50 = vpack.c.bf16 %v189_v41, %v182_v37  ;;  %v8578_v23 = vcombine.high %v490_v60, %v494_v8  ;;  %v202_v37 = vld [vmem:[%s12368_s0 + $0x288] sm:$0xff] }
 0x10e   :  { %3212 = vmatprep.mubr.bf16.mxu1 %v10925_v61  ;;  %v8577_v41 = vcombine.low %v490_v60, %v494_v8 }
 0x10f   :  { %12462 = vst [vmem:[#allocation35_spill] sm:$0xff] %v11221_v50 }
 0x110   :  { %3280 = vmatpush1.bf16.msra.mxu1 %v8529_v54  ;;  %v486_v54 = vld [vmem:[#allocation3 + $0x628] sm:$0xff] }
 0x111   :  { %3281 = vmatprep.subr.bf16.mxu1 %v8538_v59  ;;  %v8561_v59 = vcombine.low %v474_v30, %v478_v34  ;;  %v8569_v22 = vcombine.low %v482_v51, %v486_v54  ;;  %v498_v30 = vld [vmem:[#allocation3 + $0x688] sm:$0xff]  ;;  %v195_v34 = vld [vmem:[%s12368_s0 + $0x250] sm:$0xff] }
 0x112   :  { %v11259_v57 = vpack.c.bf16 %v202_v37, %v195_v34  ;;  %v224_v37 = vld [vmem:[%s12368_s0 + $0x338] sm:$0xff] }
 0x113   :  { %3213 = vmatmul.mubr.bf16.gmra.mrb[40].mxu1 %v10945_v15 }
 0x114   :  { %2987 = vmatmul.mubr.bf16.gmra.mrb[8].mxu0 %v11199_v9  ;;  %3282 = vmatpush1.bf16.msra.mxu1 %v8537_v12  ;;  %v8570_v12 = vcombine.high %v482_v51, %v486_v54  ;;  %v210_v54 = vld [vmem:[%s12368_s0 + $0x2c8] sm:$0xff]  ;;  %12465 = vst [vmem:[#allocation38_spill] sm:$0xff] %v11259_v57 }
 0x115   :  { %3283 = vmatprep.subr.bf16.mxu1 %v8546_v13  ;;  %2996 = vmatprep.mubr.bf16.mxu0 %v11201_v14  ;;  %v196_v13 = vld [vmem:[%s12368_s0 + $0x258] sm:$0xff]  ;;  %v11261_v8 = vpack.c.bf16 %v217_v56, %v210_v54  ;;  %v530_v56 = vld [vmem:[#allocation3 + $0x788] sm:$0xff] }
 0x116   :  { %3222 = vmatprep.mubr.bf16.mxu1 %v10961_v28 }
 0x117   :  { %12466 = vst [vmem:[#allocation39_spill] sm:$0xff] %v11261_v8 }
 0x118   :  { %3284 = vmatpush1.bf16.msra.mxu1 %v8545_v29  ;;  %v11241_v29 = vpack.c.bf16 %v203_v16, %v196_v13  ;;  %v518_v13 = vld [vmem:[#allocation3 + $0x728] sm:$0xff]  ;;  %v209_v16 = vld [vmem:[%s12368_s0 + $0x2c0] sm:$0xff] }
 0x119   :  { %3285 = vmatprep.subr.bf16.mxu1 %v8554_v33  ;;  %v502_v33 = vld [vmem:[#allocation3 + $0x6a8] sm:$0xff] }
 0x11a   :  { %12464 = vst [vmem:[#allocation37_spill] sm:$0xff] %v11241_v29  ;;  %v8586_v51 = vcombine.high %v498_v30, %v502_v33 }
 0x11b   :  { %3223 = vmatmul.mubr.bf16.gmra.mrb[44].mxu1 %v10981_v47 }
 0x11c   :  { %2997 = vmatmul.mubr.bf16.gmra.mrb[12].mxu0 %v11219_v42  ;;  %3286 = vmatpush1.bf16.msra.mxu1 %v8553_v46  ;;  %v506_v46 = vld [vmem:[#allocation3 + $0x6c8] sm:$0xff] }
 0x11d   :  { %3287 = vmatprep.subr.bf16.mxu1 %v8562_v48  ;;  %3006 = vmatprep.mubr.bf16.mxu0 %v11221_v50  ;;  %v510_v48 = vld [vmem:[#allocation3 + $0x6e8] sm:$0xff] }
 0x11e   :  { %3232 = vmatprep.mubr.bf16.mxu1 %v10997_v62  ;;  %v8594_v60 = vcombine.high %v506_v46, %v510_v48 }
 0x120   :  { %3288 = vmatpush1.bf16.msra.mxu1 %v8561_v59  ;;  %v8585_v59 = vcombine.low %v498_v30, %v502_v33  ;;  %v522_v30 = vld [vmem:[#allocation3 + $0x748] sm:$0xff] }
 0x121   :  { %3289 = vmatprep.subr.bf16.mxu1 %v8570_v12  ;;  %v514_v12 = vld [vmem:[#allocation3 + $0x708] sm:$0xff] }
 0x122   :  { %v526_v33 = vld [vmem:[#allocation3 + $0x768] sm:$0xff]  ;;  %v8602_v34 = vcombine.high %v514_v12, %v518_v13 }
 0x123   :  { %3233 = vmatmul.mubr.bf16.gmra.mrb[48].mxu1 %v11017_v18 }
 0x124   :  { %3007 = vmatmul.mubr.bf16.gmra.mrb[16].mxu0 %v11239_v17  ;;  %3290 = vmatpush1.bf16.msra.mxu1 %v8569_v22  ;;  %v216_v22 = vld [vmem:[%s12368_s0 + $0x2f8] sm:$0xff] }
 0x125   :  { %3291 = vmatprep.subr.bf16.mxu1 %v8578_v23  ;;  %3016 = vmatprep.mubr.bf16.mxu0 %v11241_v29  ;;  %v8593_v23 = vcombine.low %v506_v46, %v510_v48  ;;  %v8601_v46 = vcombine.low %v514_v12, %v518_v13  ;;  %v8610_v48 = vcombine.high %v522_v30, %v526_v33 }
 0x126   :  { %3242 = vmatprep.mubr.bf16.mxu1 %v11033_v36  ;;  %v8609_v12 = vcombine.low %v522_v30, %v526_v33  ;;  %v127_v30 = vld [vmem:[%s12368_s0 + $0x30] sm:$0xff]  ;;  %v134_v33 = vld [vmem:[%s12368_s0 + $0x68] sm:$0xff] }
 0x128   :  { %3292 = vmatpush1.bf16.msra.mxu1 %v8577_v41  ;;  %v231_v41 = vld [vmem:[%s12368_s0 + $0x370] sm:$0xff] }
 0x129   :  { %3293 = vmatprep.subr.bf16.mxu1 %v8586_v51  ;;  %v11279_v51 = vpack.c.bf16 %v216_v22, %v209_v16  ;;  %v11281_v54 = vpack.c.bf16 %v231_v41, %v224_v37  ;;  %v538_v16 = vld [vmem:[#allocation3 + $0x7c8] sm:$0xff] }
 0x12a   :  { %v542_v22 = vld [vmem:[#allocation3 + $0x7e8] sm:$0xff] }
 0x12b   :  { %3243 = vmatmul.mubr.bf16.gmra.mrb[52].mxu1 %v11065_v4  ;;  %12467 = vst [vmem:[#allocation40_spill] sm:$0xff] %v11279_v51  ;;  %12468 = vst [vmem:[#allocation41_spill] sm:$0xff] %v11281_v54  ;;  %v8626_v37 = vcombine.high %v538_v16, %v542_v22  ;;  %v546_v41 = vld [vmem:[#allocation3 + $0x808] sm:$0xff] }
 0x12c   :  { %3017 = vmatmul.mubr.bf16.gmra.mrb[20].mxu0 %v11259_v57  ;;  %3294 = vmatpush1.bf16.msra.mxu1 %v8585_v59  ;;  %v534_v59 = vld [vmem:[#allocation3 + $0x7a8] sm:$0xff] }
 0x12d   :  { %3295 = vmatprep.subr.bf16.mxu1 %v8594_v60  ;;  %3026 = vmatprep.mubr.bf16.mxu0 %v11261_v8  ;;  %v223_v60 = vld [vmem:[%s12368_s0 + $0x330] sm:$0xff]  ;;  %v8618_v13 = vcombine.high %v530_v56, %v534_v59 }
 0x12e   :  { %3252 = vmatprep.mubr.bf16.mxu1 %v11069_v11  ;;  %v230_v11 = vld [vmem:[%s12368_s0 + $0x368] sm:$0xff] }
 0x130   :  { %3296 = vmatpush1.bf16.msra.mxu1 %v8593_v23  ;;  %v11293_v23 = vpack.c.bf16 %v230_v11, %v223_v60  ;;  %v8625_v11 = vcombine.low %v538_v16, %v542_v22  ;;  %v299_v60 = vld [vmem:[#allocation3 + $0x50] sm:$0xff]  ;;  %v8379_v16 = vcombine.low %v11152_v0, %v11154_v6 }
 0x131   :  { %3297 = vmatprep.subr.bf16.mxu1 %v8602_v34  ;;  %v8617_v34 = vcombine.low %v530_v56, %v534_v59  ;;  %v12388_v56 = vmov 0  }
 0x132   :  { %12469 = vst [vmem:[#allocation42_spill] sm:$0xff] %v11293_v23 }
 0x133   :  { %3253 = vmatmul.mubr.bf16.gmra.mrb[56].mxu1 %v11101_v44  ;;  %v550_v44 = vld [vmem:[#allocation3 + $0x828] sm:$0xff] }
 0x134   :  { %3027 = vmatmul.mubr.bf16.gmra.mrb[24].mxu0 %v11279_v51  ;;  %3298 = vmatpush1.bf16.msra.mxu1 %v8601_v46  ;;  %v554_v46 = vld [vmem:[#allocation3 + $0x848] sm:$0xff]  ;;  %v8634_v59 = vcombine.high %v546_v41, %v550_v44 }
 0x135   :  { %3299 = vmatprep.subr.bf16.mxu1 %v8610_v48  ;;  %3036 = vmatprep.mubr.bf16.mxu0 %v11281_v54  ;;  %v558_v48 = vld [vmem:[#allocation3 + $0x868] sm:$0xff]  ;;  %v319_v54 = vld [vmem:[#allocation3 + $0xf0] sm:$0xff] }
 0x136   :  { %3262 = vmatprep.mubr.bf16.mxu1 %v11105_v55  ;;  %v8642_v22 = vcombine.high %v554_v46, %v558_v48  ;;  %v8641_v0 = vcombine.low %v554_v46, %v558_v48  ;;  %v578_v48 = vld [vmem:[#allocation3 + $0x908] sm:$0xff] }
 0x138   :  { %3300 = vmatpush1.bf16.msra.mxu1 %v8609_v12  ;;  %v303_v12 = vld [vmem:[#allocation3 + $0x70] sm:$0xff] }
 0x139   :  { %3301 = vmatprep.subr.bf16.mxu1 %v8618_v13  ;;  %v11305_v13 = vpack.c.bf16 %v134_v33, %v127_v30  ;;  %v8388_v55 = vcombine.high %v299_v60, %v303_v12  ;;  %v8387_v6 = vcombine.low %v299_v60, %v303_v12  ;;  %v570_v30 = vld [vmem:[#allocation3 + $0x8c8] sm:$0xff]  ;;  %v323_v12 = vld [vmem:[#allocation3 + $0x110] sm:$0xff] }
 0x13a   :  { %v574_v33 = vld [vmem:[#allocation3 + $0x8e8] sm:$0xff] }
 0x13b   :  { %3263 = vmatmul.mubr.bf16.gmra.mrb[60].mxu1 %v11131_v26  ;;  %12470 = vst [vmem:[#allocation43_spill] sm:$0xff] %v11305_v13  ;;  %v8633_v26 = vcombine.low %v546_v41, %v550_v44  ;;  %v148_v44 = vld [vmem:[%s12368_s0 + $0xd8] sm:$0xff]  ;;  %v8658_v46 = vcombine.high %v570_v30, %v574_v33  ;;  %v582_v60 = vld [vmem:[#allocation3 + $0x928] sm:$0xff] }
 0x13c   :  { %3037 = vmatmul.mubr.bf16.gmra.mrb[28].mxu0 %v11293_v23  ;;  %3302 = vmatpush1.bf16.msra.mxu1 %v8617_v34  ;;  %v562_v34 = vld [vmem:[#allocation3 + $0x888] sm:$0xff]  ;;  %v307_v23 = vld [vmem:[#allocation3 + $0x90] sm:$0xff] }
 0x13d   :  { %3303 = vmatprep.subr.bf16.mxu1 %v8626_v37  ;;  %3079 = vmatprep.mubr.bf16.mxu0 %v12388_v56  ;;  %v566_v37 = vld [vmem:[#allocation3 + $0x8a8] sm:$0xff]  ;;  %v311_v56 = vld [vmem:[#allocation3 + $0xb0] sm:$0xff] }
 0x13e   :  { %3305 = vmatprep.mubr.bf16.mxu1 %v10857_v63  ;;  %v8650_v41 = vcombine.high %v562_v34, %v566_v37  ;;  %v8396_v63 = vcombine.high %v307_v23, %v311_v56 }
 0x140   :  { %3304 = vmatpush1.bf16.msra.mxu1 %v8625_v11  ;;  %v141_v11 = vld [vmem:[%s12368_s0 + $0xa0] sm:$0xff] }
 0x141   :  { %3386 = vmatprep.subr.bf16.mxu1 %v8634_v59  ;;  %v315_v59 = vld [vmem:[#allocation3 + $0xd0] sm:$0xff]  ;;  %v11320_v51 = vpack.c.bf16 %v148_v44, %v141_v11  ;;  %v590_v11 = vld [vmem:[#allocation3 + $0x968] sm:$0xff] }
 0x142   :  { %v331_v44 = vld [vmem:[#allocation3 + $0x150] sm:$0xff] }
 0x143   :  { %3306 = vmatmul.mubr.bf16.vlgmr.msra.gmra.mrb[32].mxu1 %v10881_v25  ;;  %v12471_v25 = vmov 0   ;;  %12472 = vst [vmem:[#allocation44_spill] sm:$0xff] %v11320_v51 }
 0x144   :  { %8767 = vmatmul.mubr.msk.bf16.vlgmr.msra.gmra.mrb[0].mxu0 %vm2683_vm0, %v11305_v13  ;;  %3387 = vmatpush1.bf16.msra.mxu1 %v8633_v26  ;;  %v8649_v13 = vcombine.low %v562_v34, %v566_v37  ;;  %v8395_v26 = vcombine.low %v307_v23, %v311_v56  ;;  %v162_v34 = vld [vmem:[%s12368_s0 + $0x148] sm:$0xff]  ;;  %v8657_v23 = vcombine.low %v570_v30, %v574_v33 }
 0x145   :  { %3613 = vmatpush1.bf16.msra.mxu0 %v8379_v16  ;;  %3388 = vmatprep.subr.bf16.mxu1 %v8642_v22  ;;  %v8404_v16 = vcombine.high %v315_v59, %v319_v54  ;;  %v155_v22 = vld [vmem:[%s12368_s0 + $0x110] sm:$0xff]  ;;  %v8666_v56 = vcombine.high %v578_v48, %v582_v60  ;;  %v586_v37 = vld [vmem:[#allocation3 + $0x948] sm:$0xff] }
 0x146   :  { %3614 = vmatprep.subr.bf16.mxu0 %v8388_v55  ;;  %3089 = vmatprep.mubr.bf16.mxu0 %v12471_v25  ;;  %v327_v55 = vld [vmem:[#allocation3 + $0x130] sm:$0xff]  ;;  %v8674_v30 = vcombine.high %v586_v37, %v590_v11  ;;  %v598_v33 = vld [vmem:[#allocation3 + $0x9a8] sm:$0xff] }
 0x147   :  { %3315 = vmatprep.mubr.bf16.mxu1 %v10892_v35 }
 0x148   :  { %3389 = vmatpush1.bf16.msra.mxu1 %v8641_v0  ;;  %v8412_v0 = vcombine.high %v323_v12, %v327_v55 }
 0x149   :  { %3615 = vmatpush1.bf16.msra.mxu0 %v8387_v6  ;;  %3390 = vmatprep.subr.bf16.mxu1 %v8650_v41  ;;  %v335_v6 = vld [vmem:[#allocation3 + $0x170] sm:$0xff]  ;;  %v11333_v41 = vpack.c.bf16 %v162_v34, %v155_v22  ;;  %v602_v22 = vld [vmem:[#allocation3 + $0x9c8] sm:$0xff] }
 0x14a   :  { %3616 = vmatprep.subr.bf16.mxu0 %v8396_v63  ;;  %v8403_v63 = vcombine.low %v315_v59, %v319_v54  ;;  %v594_v54 = vld [vmem:[#allocation3 + $0x988] sm:$0xff]  ;;  %v339_v59 = vld [vmem:[#allocation3 + $0x190] sm:$0xff] }
 0x14b   :  { %3316 = vmatmul.mubr.bf16.gmra.mrb[36].mxu1 %v10917_v53  ;;  %12473 = vst [vmem:[#allocation45_spill] sm:$0xff] %v11333_v41  ;;  %v8665_v53 = vcombine.low %v578_v48, %v582_v60  ;;  %v176_v48 = vld [vmem:[%s12368_s0 + $0x1b8] sm:$0xff]  ;;  %v8673_v60 = vcombine.low %v586_v37, %v590_v11  ;;  %v606_v34 = vld [vmem:[#allocation3 + $0x9e8] sm:$0xff] }
 0x14c   :  { %8768 = vmatmul.mubr.msk.bf16.gmra.mrb[4].mxu0 %vm2683_vm0, %v11320_v51  ;;  %3391 = vmatpush1.bf16.msra.mxu1 %v8649_v13  ;;  %v8411_v13 = vcombine.low %v323_v12, %v327_v55  ;;  %v8419_v12 = vcombine.low %v331_v44, %v335_v6  ;;  %v8682_v55 = vcombine.high %v594_v54, %v598_v33  ;;  %v610_v11 = vld [vmem:[#allocation3 + $0xa08] sm:$0xff] }
 0x14d   :  { %3617 = vmatpush1.bf16.msra.mxu0 %v8395_v26  ;;  %3392 = vmatprep.subr.bf16.mxu1 %v8658_v46  ;;  %v8420_v26 = vcombine.high %v331_v44, %v335_v6  ;;  %v343_v46 = vld [vmem:[#allocation3 + $0x1b0] sm:$0xff]  ;;  %v8690_v37 = vcombine.high %v602_v22, %v606_v34  ;;  %v614_v44 = vld [vmem:[#allocation3 + $0xa28] sm:$0xff] }
 0x14e   :  { %3618 = vmatprep.subr.bf16.mxu0 %v8404_v16  ;;  %3099 = vmatprep.mubr.bf16.mxu0 %v12471_v25  ;;  %v169_v16 = vld [vmem:[%s12368_s0 + $0x180] sm:$0xff]  ;;  %v355_v6 = vld [vmem:[#allocation3 + $0x210] sm:$0xff] }
 0x14f   :  { %3325 = vmatprep.mubr.bf16.mxu1 %v10928_v1 }
 0x150   :  { %3393 = vmatpush1.bf16.msra.mxu1 %v8657_v23  ;;  %v347_v23 = vld [vmem:[#allocation3 + $0x1d0] sm:$0xff] }
 0x151   :  { %3619 = vmatpush1.bf16.msra.mxu0 %v8403_v63  ;;  %3394 = vmatprep.subr.bf16.mxu1 %v8666_v56  ;;  %v8428_v63 = vcombine.high %v339_v59, %v343_v46  ;;  %v351_v56 = vld [vmem:[#allocation3 + $0x1f0] sm:$0xff] }
 0x152   :  { %3620 = vmatprep.subr.bf16.mxu0 %v8412_v0  ;;  %v11346_v0 = vpack.c.bf16 %v176_v48, %v169_v16  ;;  %v618_v16 = vld [vmem:[#allocation3 + $0xa48] sm:$0xff] }
 0x153   :  { %3326 = vmatmul.mubr.bf16.gmra.mrb[40].mxu1 %v10953_v19  ;;  %v8681_v19 = vcombine.low %v594_v54, %v598_v33  ;;  %v190_v54 = vld [vmem:[%s12368_s0 + $0x228] sm:$0xff]  ;;  %v8689_v33 = vcombine.low %v602_v22, %v606_v34 }
 0x154   :  { %8769 = vmatmul.mubr.msk.bf16.gmra.mrb[8].mxu0 %vm2683_vm0, %v11333_v41  ;;  %3395 = vmatpush1.bf16.msra.mxu1 %v8665_v53  ;;  %12474 = vst [vmem:[#allocation46_spill] sm:$0xff] %v11346_v0  ;;  %v8427_v53 = vcombine.low %v339_v59, %v343_v46  ;;  %v8435_v59 = vcombine.low %v347_v23, %v351_v56  ;;  %v622_v48 = vld [vmem:[#allocation3 + $0xa68] sm:$0xff] }
 0x155   :  { %3621 = vmatpush1.bf16.msra.mxu0 %v8411_v13  ;;  %3396 = vmatprep.subr.bf16.mxu1 %v8674_v30  ;;  %v8436_v13 = vcombine.high %v347_v23, %v351_v56  ;;  %v359_v30 = vld [vmem:[#allocation3 + $0x230] sm:$0xff]  ;;  %v8698_v46 = vcombine.high %v610_v11, %v614_v44  ;;  %v8706_v22 = vcombine.high %v618_v16, %v622_v48  ;;  %v626_v34 = vld [vmem:[#allocation3 + $0xa88] sm:$0xff] }
 0x156   :  { %3622 = vmatprep.subr.bf16.mxu0 %v8420_v26  ;;  %3109 = vmatprep.mubr.bf16.mxu0 %v12471_v25  ;;  %v183_v26 = vld [vmem:[%s12368_s0 + $0x1f0] sm:$0xff]  ;;  %v630_v23 = vld [vmem:[#allocation3 + $0xaa8] sm:$0xff] }
 0x157   :  { %3335 = vmatprep.mubr.bf16.mxu1 %v10964_v31  ;;  %v371_v56 = vld [vmem:[#allocation3 + $0x290] sm:$0xff] }
 0x158   :  { %3397 = vmatpush1.bf16.msra.mxu1 %v8673_v60  ;;  %v363_v60 = vld [vmem:[#allocation3 + $0x250] sm:$0xff] }
 0x159   :  { %3623 = vmatpush1.bf16.msra.mxu0 %v8419_v12  ;;  %3398 = vmatprep.subr.bf16.mxu1 %v8682_v55  ;;  %v8444_v12 = vcombine.high %v355_v6, %v359_v30  ;;  %v367_v55 = vld [vmem:[#allocation3 + $0x270] sm:$0xff] }
 0x15a   :  { %3624 = vmatprep.subr.bf16.mxu0 %v8428_v63  ;;  %v11359_v63 = vpack.c.bf16 %v190_v54, %v183_v26  ;;  %v634_v26 = vld [vmem:[#allocation3 + $0xac8] sm:$0xff] }
 0x15b   :  { %3336 = vmatmul.mubr.bf16.gmra.mrb[44].mxu1 %v10989_v52  ;;  %v8697_v52 = vcombine.low %v610_v11, %v614_v44  ;;  %v204_v11 = vld [vmem:[%s12368_s0 + $0x298] sm:$0xff]  ;;  %v8705_v44 = vcombine.low %v618_v16, %v622_v48  ;;  %v638_v54 = vld [vmem:[#allocation3 + $0xae8] sm:$0xff] }
 0x15c   :  { %8770 = vmatmul.mubr.msk.bf16.gmra.mrb[12].mxu0 %vm2683_vm0, %v11346_v0  ;;  %3399 = vmatpush1.bf16.msra.mxu1 %v8681_v19  ;;  %12475 = vst [vmem:[#allocation47_spill] sm:$0xff] %v11359_v63  ;;  %v8443_v19 = vcombine.low %v355_v6, %v359_v30  ;;  %v8451_v6 = vcombine.low %v363_v60, %v367_v55  ;;  %v642_v48 = vld [vmem:[#allocation3 + $0xb08] sm:$0xff] }
 0x15d   :  { %3625 = vmatpush1.bf16.msra.mxu0 %v8427_v53  ;;  %3400 = vmatprep.subr.bf16.mxu1 %v8690_v37  ;;  %v8452_v53 = vcombine.high %v363_v60, %v367_v55  ;;  %v375_v37 = vld [vmem:[#allocation3 + $0x2b0] sm:$0xff]  ;;  %v8714_v30 = vcombine.high %v626_v34, %v630_v23  ;;  %v8722_v16 = vcombine.high %v634_v26, %v638_v54  ;;  %v646_v60 = vld [vmem:[#allocation3 + $0xb28] sm:$0xff] }
 0x15e   :  { %3626 = vmatprep.subr.bf16.mxu0 %v8436_v13  ;;  %3119 = vmatprep.mubr.bf16.mxu0 %v12471_v25  ;;  %v197_v13 = vld [vmem:[%s12368_s0 + $0x260] sm:$0xff]  ;;  %v387_v55 = vld [vmem:[#allocation3 + $0x310] sm:$0xff] }
 0x15f   :  { %3345 = vmatprep.mubr.bf16.mxu1 %v11000_v3 }
 0x160   :  { %3401 = vmatpush1.bf16.msra.mxu1 %v8689_v33  ;;  %v379_v33 = vld [vmem:[#allocation3 + $0x2d0] sm:$0xff] }
 0x161   :  { %3627 = vmatpush1.bf16.msra.mxu0 %v8435_v59  ;;  %3402 = vmatprep.subr.bf16.mxu1 %v8698_v46  ;;  %v8460_v59 = vcombine.high %v371_v56, %v375_v37  ;;  %v383_v46 = vld [vmem:[#allocation3 + $0x2f0] sm:$0xff] }
 0x162   :  { %3628 = vmatprep.subr.bf16.mxu0 %v8444_v12  ;;  %v11372_v12 = vpack.c.bf16 %v204_v11, %v197_v13  ;;  %v650_v13 = vld [vmem:[#allocation3 + $0xb48] sm:$0xff] }
 0x163   :  { %3346 = vmatmul.mubr.bf16.gmra.mrb[48].mxu1 %v11025_v24  ;;  %v8713_v24 = vcombine.low %v626_v34, %v630_v23  ;;  %v218_v34 = vld [vmem:[%s12368_s0 + $0x308] sm:$0xff]  ;;  %v8721_v23 = vcombine.low %v634_v26, %v638_v54 }
 0x164   :  { %8771 = vmatmul.mubr.msk.bf16.gmra.mrb[16].mxu0 %vm2683_vm0, %v11359_v63  ;;  %3403 = vmatpush1.bf16.msra.mxu1 %v8697_v52  ;;  %12476 = vst [vmem:[#allocation48_spill] sm:$0xff] %v11372_v12  ;;  %v8459_v52 = vcombine.low %v371_v56, %v375_v37  ;;  %v8467_v56 = vcombine.low %v379_v33, %v383_v46  ;;  %v654_v11 = vld [vmem:[#allocation3 + $0xb68] sm:$0xff] }
 0x165   :  { %3629 = vmatpush1.bf16.msra.mxu0 %v8443_v19  ;;  %3404 = vmatprep.subr.bf16.mxu1 %v8706_v22  ;;  %v8468_v19 = vcombine.high %v379_v33, %v383_v46  ;;  %v391_v22 = vld [vmem:[#allocation3 + $0x330] sm:$0xff]  ;;  %v8730_v37 = vcombine.high %v642_v48, %v646_v60  ;;  %v8738_v26 = vcombine.high %v650_v13, %v654_v11  ;;  %v658_v54 = vld [vmem:[#allocation3 + $0xb88] sm:$0xff] }
 0x166   :  { %3630 = vmatprep.subr.bf16.mxu0 %v8452_v53  ;;  %3129 = vmatprep.mubr.bf16.mxu0 %v12471_v25  ;;  %v211_v53 = vld [vmem:[%s12368_s0 + $0x2d0] sm:$0xff]  ;;  %v662_v33 = vld [vmem:[#allocation3 + $0xba8] sm:$0xff] }
 0x167   :  { %3355 = vmatprep.mubr.bf16.mxu1 %v11039_v40  ;;  %v403_v46 = vld [vmem:[#allocation3 + $0x390] sm:$0xff] }
 0x168   :  { %3405 = vmatpush1.bf16.msra.mxu1 %v8705_v44  ;;  %v395_v44 = vld [vmem:[#allocation3 + $0x350] sm:$0xff] }
 0x169   :  { %3631 = vmatpush1.bf16.msra.mxu0 %v8451_v6  ;;  %3406 = vmatprep.subr.bf16.mxu1 %v8714_v30  ;;  %v8476_v6 = vcombine.high %v387_v55, %v391_v22  ;;  %v399_v30 = vld [vmem:[#allocation3 + $0x370] sm:$0xff] }
 0x16a   :  { %3632 = vmatprep.subr.bf16.mxu0 %v8460_v59  ;;  %v11385_v59 = vpack.c.bf16 %v218_v34, %v211_v53  ;;  %v666_v53 = vld [vmem:[#allocation3 + $0xbc8] sm:$0xff] }
 0x16b   :  { %3356 = vmatmul.mubr.bf16.gmra.mrb[52].mxu1 %v11067_v5  ;;  %v8729_v5 = vcombine.low %v642_v48, %v646_v60  ;;  %v232_v48 = vld [vmem:[%s12368_s0 + $0x378] sm:$0xff]  ;;  %v8737_v60 = vcombine.low %v650_v13, %v654_v11  ;;  %v670_v34 = vld [vmem:[#allocation3 + $0xbe8] sm:$0xff] }
 0x16c   :  { %8772 = vmatmul.mubr.msk.bf16.gmra.mrb[20].mxu0 %vm2683_vm0, %v11372_v12  ;;  %3407 = vmatpush1.bf16.msra.mxu1 %v8713_v24  ;;  %12477 = vst [vmem:[#allocation49_spill] sm:$0xff] %v11385_v59  ;;  %v8475_v24 = vcombine.low %v387_v55, %v391_v22  ;;  %v8483_v55 = vcombine.low %v395_v44, %v399_v30  ;;  %v674_v11 = vld [vmem:[#allocation3 + $0xc08] sm:$0xff] }
 0x16d   :  { %3633 = vmatpush1.bf16.msra.mxu0 %v8459_v52  ;;  %3408 = vmatprep.subr.bf16.mxu1 %v8722_v16  ;;  %v8484_v52 = vcombine.high %v395_v44, %v399_v30  ;;  %v407_v16 = vld [vmem:[#allocation3 + $0x3b0] sm:$0xff]  ;;  %v8746_v22 = vcombine.high %v658_v54, %v662_v33  ;;  %v8754_v13 = vcombine.high %v666_v53, %v670_v34  ;;  %v678_v30 = vld [vmem:[#allocation3 + $0xc28] sm:$0xff] }
 0x16e   :  { %3634 = vmatprep.subr.bf16.mxu0 %v8468_v19  ;;  %3139 = vmatprep.mubr.bf16.mxu0 %v12471_v25  ;;  %v225_v19 = vld [vmem:[%s12368_s0 + $0x340] sm:$0xff] }
 0x16f   :  { %3365 = vmatprep.mubr.bf16.mxu1 %v11078_v20 }
 0x170   :  { %3409 = vmatpush1.bf16.msra.mxu1 %v8721_v23  ;;  %v411_v23 = vld [vmem:[#allocation3 + $0x3d0] sm:$0xff] }
 0x171   :  { %3635 = vmatpush1.bf16.msra.mxu0 %v8467_v56  ;;  %3410 = vmatprep.subr.bf16.mxu1 %v8730_v37  ;;  %v8492_v56 = vcombine.high %v403_v46, %v407_v16  ;;  %v415_v37 = vld [vmem:[#allocation3 + $0x3f0] sm:$0xff] }
 0x172   :  { %3636 = vmatprep.subr.bf16.mxu0 %v8476_v6  ;;  %v11398_v6 = vpack.c.bf16 %v232_v48, %v225_v19  ;;  %v8500_v44 = vcombine.high %v411_v23, %v415_v37  ;;  %v431_v19 = vld [vmem:[#allocation3 + $0x470] sm:$0xff]  ;;  %v8761_v48 = vcombine.low %v674_v11, %v678_v30 }
 0x173   :  { %3366 = vmatmul.mubr.bf16.gmra.mrb[56].mxu1 %v11103_v45  ;;  %v8745_v45 = vcombine.low %v658_v54, %v662_v33  ;;  %v8499_v54 = vcombine.low %v411_v23, %v415_v37  ;;  %v8762_v33 = vcombine.high %v674_v11, %v678_v30  ;;  %v451_v30 = vld [vmem:[#allocation3 + $0x510] sm:$0xff] }
 0x174   :  { %8773 = vmatmul.mubr.msk.bf16.gmra.mrb[24].mxu0 %vm2683_vm0, %v11385_v59  ;;  %3411 = vmatpush1.bf16.msra.mxu1 %v8729_v5  ;;  %v8491_v5 = vcombine.low %v403_v46, %v407_v16  ;;  %v427_v16 = vld [vmem:[#allocation3 + $0x450] sm:$0xff] }
 0x175   :  { %3637 = vmatpush1.bf16.msra.mxu0 %v8475_v24  ;;  %3412 = vmatprep.subr.bf16.mxu1 %v8738_v26  ;;  %v419_v24 = vld [vmem:[#allocation3 + $0x410] sm:$0xff] }
 0x176   :  { %3638 = vmatprep.subr.bf16.mxu0 %v8484_v52  ;;  %3149 = vmatprep.mubr.bf16.mxu0 %v12471_v25  ;;  %v423_v26 = vld [vmem:[#allocation3 + $0x430] sm:$0xff]  ;;  %v8753_v52 = vcombine.low %v666_v53, %v670_v34 }
 0x177   :  { %3375 = vmatprep.mubr.bf16.mxu1 %v11114_v2  ;;  %v8508_v46 = vcombine.high %v419_v24, %v423_v26  ;;  %v435_v53 = vld [vmem:[#allocation3 + $0x490] sm:$0xff] }
 0x178   :  { %3413 = vmatpush1.bf16.msra.mxu1 %v8737_v60  ;;  %v11405_v60 = vld [vmem:[#allocation3 + $0x18] sm:$0xff]  ;;  %v439_v34 = vld [vmem:[#allocation3 + $0x4b0] sm:$0xff] }
 0x179   :  { %3639 = vmatpush1.bf16.msra.mxu0 %v8483_v55  ;;  %3414 = vmatprep.subr.bf16.mxu1 %v8746_v22  ;;  %v11407_v55 = vld [vmem:[#allocation3 + $0x38] sm:$0xff]  ;;  %v8516_v22 = vcombine.high %v427_v16, %v431_v19  ;;  %v8524_v37 = vcombine.high %v435_v53, %v439_v34  ;;  %v8523_v11 = vcombine.low %v435_v53, %v439_v34 }
 0x17a   :  { %3640 = vmatprep.subr.bf16.mxu0 %v8492_v56  ;;  %v8382_v23 = vcombine.high %v11405_v60, %v11407_v55  ;;  %v8515_v56 = vcombine.low %v427_v16, %v431_v19  ;;  %v467_v19 = vld [vmem:[#allocation3 + $0x590] sm:$0xff] }
 0x17b   :  { %3376 = vmatmul.mubr.bf16.gmra.mrb[60].mxu1 %v11133_v27 }
 0x17c   :  { %8774 = vmatmul.mubr.msk.bf16.gmra.mrb[28].mxu0 %vm2683_vm0, %v11398_v6  ;;  %3415 = vmatpush1.bf16.msra.mxu1 %v8745_v45  ;;  %v8507_v45 = vcombine.low %v419_v24, %v423_v26  ;;  %v455_v24 = vld [vmem:[#allocation3 + $0x530] sm:$0xff] }
 0x17d   :  { %3641 = vmatpush1.bf16.msra.mxu0 %v8491_v5  ;;  %3416 = vmatprep.subr.bf16.mxu1 %v8754_v13  ;;  %v443_v5 = vld [vmem:[#allocation3 + $0x4d0] sm:$0xff] }
 0x17e   :  { %3642 = vmatprep.subr.bf16.mxu0 %v8500_v44  ;;  %3418 = vmatprep.mubr.bf16.mxu1 %v11135_v38  ;;  %v447_v13 = vld [vmem:[#allocation3 + $0x4f0] sm:$0xff] }
 0x17f   :  { %3644 = vmatprep.mubr.bf16.mxu0 %v10849_v58  ;;  %v8532_v44 = vcombine.high %v443_v5, %v447_v13  ;;  %v8531_v26 = vcombine.low %v443_v5, %v447_v13 }
 0x180   :  { %3417 = vmatpush1.bf16.msra.mxu1 %v8753_v52  ;;  %v8540_v52 = vcombine.high %v451_v30, %v455_v24 }
 0x181   :  { %3643 = vmatpush1.bf16.msra.mxu0 %v8499_v54  ;;  %3499 = vmatprep.subr.bf16.mxu1 %v8762_v33  ;;  %v459_v54 = vld [vmem:[#allocation3 + $0x550] sm:$0xff] }
 0x182   :  { %3725 = vmatprep.subr.bf16.mxu0 %v8508_v46  ;;  %v463_v33 = vld [vmem:[#allocation3 + $0x570] sm:$0xff]  ;;  %v8539_v46 = vcombine.low %v451_v30, %v455_v24 }
 0x183   :  { %3419 = vmatmul.mubr.bf16.vlgmr.msra.gmra.mrb[32].mxu1 %v11157_v7  ;;  %v8548_v16 = vcombine.high %v459_v54, %v463_v33  ;;  %v487_v30 = vld [vmem:[#allocation3 + $0x630] sm:$0xff] }
 0x184   :  { %3645 = vmatmul.mubr.bf16.vlgmr.msra.gmra.mrb[32].mxu0 %v10873_v21  ;;  %3500 = vmatpush1.bf16.msra.mxu1 %v8761_v48  ;;  %v471_v48 = vld [vmem:[#allocation3 + $0x5b0] sm:$0xff] }
 0x185   :  { %3726 = vmatpush1.bf16.msra.mxu0 %v8507_v45  ;;  %3428 = vmatprep.mubr.bf16.mxu1 %v11159_v10  ;;  %v8547_v45 = vcombine.low %v459_v54, %v463_v33  ;;  %v8556_v53 = vcombine.high %v467_v19, %v471_v48  ;;  %v8555_v13 = vcombine.low %v467_v19, %v471_v48  ;;  %v491_v33 = vld [vmem:[#allocation3 + $0x650] sm:$0xff] }
 0x186   :  { %3727 = vmatprep.subr.bf16.mxu0 %v8516_v22  ;;  %3654 = vmatprep.mubr.bf16.mxu0 %v10889_v32 }
 0x187   :  { %4064 = vmatprep.subr.bf16.mxu1 %v8382_v23  ;;  %v475_v23 = vld [vmem:[#allocation3 + $0x5d0] sm:$0xff] }
 0x189   :  { %3728 = vmatpush1.bf16.msra.mxu0 %v8515_v56  ;;  %v479_v56 = vld [vmem:[#allocation3 + $0x5f0] sm:$0xff] }
 0x18a   :  { %3729 = vmatprep.subr.bf16.mxu0 %v8524_v37  ;;  %v8563_v24 = vcombine.low %v475_v23, %v479_v56 }
 0x18b   :  { %3429 = vmatmul.mubr.bf16.gmra.mrb[36].mxu1 %v11179_v39 }
 0x18c   :  { %3655 = vmatmul.mubr.bf16.gmra.mrb[36].mxu0 %v10909_v49  ;;  %3438 = vmatprep.mubr.bf16.mxu1 %v11181_v43 }
 0x18d   :  { %3730 = vmatpush1.bf16.msra.mxu0 %v8523_v11  ;;  %3664 = vmatprep.mubr.bf16.mxu0 %v10925_v61  ;;  %v8564_v11 = vcombine.high %v475_v23, %v479_v56  ;;  %v503_v23 = vld [vmem:[#allocation3 + $0x6b0] sm:$0xff] }
 0x18e   :  { %3731 = vmatprep.subr.bf16.mxu0 %v8532_v44  ;;  %v483_v44 = vld [vmem:[#allocation3 + $0x610] sm:$0xff] }
 0x18f   :  { %v8571_v48 = vcombine.low %v483_v44, %v487_v30 }
 0x191   :  { %3732 = vmatpush1.bf16.msra.mxu0 %v8531_v26 }
 0x192   :  { %3733 = vmatprep.subr.bf16.mxu0 %v8540_v52  ;;  %v8572_v52 = vcombine.high %v483_v44, %v487_v30  ;;  %v507_v44 = vld [vmem:[#allocation3 + $0x6d0] sm:$0xff] }
 0x193   :  { %3439 = vmatmul.mubr.bf16.gmra.mrb[40].mxu1 %v11199_v9  ;;  %v511_v30 = vld [vmem:[#allocation3 + $0x6f0] sm:$0xff] }
 0x194   :  { %3665 = vmatmul.mubr.bf16.gmra.mrb[40].mxu0 %v10945_v15  ;;  %3448 = vmatprep.mubr.bf16.mxu1 %v11201_v14 }
 0x195   :  { %3734 = vmatpush1.bf16.msra.mxu0 %v8539_v46  ;;  %3674 = vmatprep.mubr.bf16.mxu0 %v10961_v28  ;;  %v495_v46 = vld [vmem:[#allocation3 + $0x670] sm:$0xff] }
 0x196   :  { %v11423_v22 = vpop.f32.mrb[0].mxu1  ;;  %3735 = vmatprep.subr.bf16.mxu0 %v8548_v16  ;;  %v8579_v56 = vcombine.low %v491_v33, %v495_v46 }
 0x197   :  { %v11425_v34 = vpop.f32.mrb[1].mxu1 }
 0x198   :  { %v11427_v37 = vpop.f32.mrb[2].mxu1 }
 0x199   :  { %3736 = vmatpush1.bf16.msra.mxu0 %v8547_v45  ;;  %v11429_v5 = vpop.f32.mrb[3].mxu1  ;;  %v8580_v45 = vcombine.high %v491_v33, %v495_v46  ;;  %v515_v33 = vld [vmem:[#allocation3 + $0x710] sm:$0xff] }
 0x19a   :  { %3737 = vmatprep.subr.bf16.mxu0 %v8556_v53  ;;  %v499_v53 = vld [vmem:[#allocation3 + $0x690] sm:$0xff] }
 0x19b   :  { %3449 = vmatmul.mubr.bf16.gmra.mrb[44].mxu1 %v11219_v42  ;;  %v519_v46 = vld [vmem:[#allocation3 + $0x730] sm:$0xff] }
 0x19c   :  { %3675 = vmatmul.mubr.bf16.gmra.mrb[44].mxu0 %v10981_v47  ;;  %3458 = vmatprep.mubr.bf16.mxu1 %v11221_v50 }
 0x19d   :  { %3738 = vmatpush1.bf16.msra.mxu0 %v8555_v13  ;;  %3684 = vmatprep.mubr.bf16.mxu0 %v10997_v62 }
 0x19e   :  { %v11435_v26 = vpop.f32.mrb[4].mxu1  ;;  %3739 = vmatprep.subr.bf16.mxu0 %v8564_v11  ;;  %v8588_v11 = vcombine.high %v499_v53, %v503_v23 }
 0x19f   :  { %v11437_v54 = vpop.f32.mrb[5].mxu1 }
 0x1a0   :  { %v11439_v16 = vpop.f32.mrb[6].mxu1 }
 0x1a1   :  { %3740 = vmatpush1.bf16.msra.mxu0 %v8563_v24  ;;  %v11441_v19 = vpop.f32.mrb[7].mxu1 }
 0x1a2   :  { %3741 = vmatprep.subr.bf16.mxu0 %v8572_v52 }
 0x1a3   :  { %3459 = vmatmul.mubr.bf16.gmra.mrb[48].mxu1 %v11239_v17 }
 0x1a4   :  { %3685 = vmatmul.mubr.bf16.gmra.mrb[48].mxu0 %v11017_v18  ;;  %3468 = vmatprep.mubr.bf16.mxu1 %v11241_v29  ;;  %v8587_v18 = vcombine.low %v499_v53, %v503_v23  ;;  %v8596_v29 = vcombine.high %v507_v44, %v511_v30  ;;  %v523_v53 = vld [vmem:[#allocation3 + $0x750] sm:$0xff] }
 0x1a5   :  { %3742 = vmatpush1.bf16.msra.mxu0 %v8571_v48  ;;  %3694 = vmatprep.mubr.bf16.mxu0 %v11033_v36  ;;  %v8595_v48 = vcombine.low %v507_v44, %v511_v30  ;;  %v527_v23 = vld [vmem:[#allocation3 + $0x770] sm:$0xff] }
 0x1a6   :  { %v11447_v13 = vpop.f32.mrb[8].mxu1  ;;  %3743 = vmatprep.subr.bf16.mxu0 %v8580_v45  ;;  %v12482_v45 = vld [vmem:[#allocation30_spill] sm:$0xff] }
 0x1a7   :  { %12478 = vst [vmem:[#allocation50_spill] sm:$0xff] %v11447_v13  ;;  %v11449_v24 = vpop.f32.mrb[9].mxu1  ;;  %v531_v44 = vld [vmem:[#allocation3 + $0x790] sm:$0xff]  ;;  %v12503_v13 = vld [vmem:[#allocation19_spill] sm:$0xff] }
 0x1a8   :  { %12479 = vst [vmem:[#allocation51_spill] sm:$0xff] %v11449_v24  ;;  %v11451_v52 = vpop.f32.mrb[10].mxu1  ;;  %v535_v30 = vld [vmem:[#allocation3 + $0x7b0] sm:$0xff] }
 0x1a9   :  { %12480 = vst [vmem:[#allocation52_spill] sm:$0xff] %v11451_v52  ;;  %3744 = vmatpush1.bf16.msra.mxu0 %v8579_v56  ;;  %v11453_v17 = vpop.f32.mrb[11].mxu1  ;;  %v8604_v56 = vcombine.high %v515_v33, %v519_v46  ;;  %v567_v36 = vld [vmem:[#allocation3 + $0x8b0] sm:$0xff] }
 0x1aa   :  { %12481 = vst [vmem:[#allocation53_spill] sm:$0xff] %v11453_v17  ;;  %3745 = vmatprep.subr.bf16.mxu0 %v8588_v11 }
 0x1ab   :  { %3469 = vmatmul.mubr.bf16.gmra.mrb[52].mxu1 %v11259_v57 }
 0x1ac   :  { %3695 = vmatmul.mubr.bf16.gmra.mrb[52].mxu0 %v11065_v4  ;;  %3478 = vmatprep.mubr.bf16.mxu1 %v11261_v8  ;;  %v8603_v4 = vcombine.low %v515_v33, %v519_v46  ;;  %v8612_v8 = vcombine.high %v523_v53, %v527_v23  ;;  %v539_v33 = vld [vmem:[#allocation3 + $0x7d0] sm:$0xff] }
 0x1ad   :  { %3746 = vmatpush1.bf16.msra.mxu0 %v8587_v18  ;;  %3704 = vmatprep.mubr.bf16.mxu0 %v12482_v45  ;;  %v12487_v18 = vld [vmem:[#allocation40_spill] sm:$0xff]  ;;  %v12488_v45 = vld [vmem:[#allocation31_spill] sm:$0xff]  ;;  %v543_v46 = vld [vmem:[#allocation3 + $0x7f0] sm:$0xff] }
 0x1ae   :  { %v11459_v24 = vpop.f32.mrb[12].mxu1  ;;  %3747 = vmatprep.subr.bf16.mxu0 %v8596_v29  ;;  %v12489_v29 = vld [vmem:[#allocation41_spill] sm:$0xff] }
 0x1af   :  { %12483 = vst [vmem:[#allocation54_spill] sm:$0xff] %v11459_v24  ;;  %v11461_v17 = vpop.f32.mrb[13].mxu1  ;;  %v12490_v24 = vld [vmem:[#allocation33_spill] sm:$0xff] }
 0x1b0   :  { %12484 = vst [vmem:[#allocation55_spill] sm:$0xff] %v11461_v17  ;;  %v11463_v11 = vpop.f32.mrb[14].mxu1  ;;  %v8611_v17 = vcombine.low %v523_v53, %v527_v23  ;;  %v547_v53 = vld [vmem:[#allocation3 + $0x810] sm:$0xff] }
 0x1b1   :  { %12485 = vst [vmem:[#allocation56_spill] sm:$0xff] %v11463_v11  ;;  %3748 = vmatpush1.bf16.msra.mxu0 %v8595_v48  ;;  %v11465_v57 = vpop.f32.mrb[15].mxu1  ;;  %v8620_v48 = vcombine.high %v531_v44, %v535_v30  ;;  %v551_v23 = vld [vmem:[#allocation3 + $0x830] sm:$0xff]  ;;  %v12502_v11 = vld [vmem:[#allocation43_spill] sm:$0xff] }
 0x1b2   :  { %12486 = vst [vmem:[#allocation57_spill] sm:$0xff] %v11465_v57  ;;  %3749 = vmatprep.subr.bf16.mxu0 %v8604_v56 }
 0x1b3   :  { %3479 = vmatmul.mubr.bf16.gmra.mrb[56].mxu1 %v12487_v18 }
 0x1b4   :  { %3705 = vmatmul.mubr.bf16.gmra.mrb[56].mxu0 %v12488_v45  ;;  %3488 = vmatprep.mubr.bf16.mxu1 %v12489_v29  ;;  %v8619_v45 = vcombine.low %v531_v44, %v535_v30  ;;  %v8628_v29 = vcombine.high %v539_v33, %v543_v46  ;;  %v304_v44 = vld [vmem:[#allocation3 + $0x78] sm:$0xff] }
 0x1b5   :  { %3750 = vmatpush1.bf16.msra.mxu0 %v8603_v4  ;;  %3714 = vmatprep.mubr.bf16.mxu0 %v12490_v24  ;;  %v12495_v4 = vld [vmem:[#allocation42_spill] sm:$0xff] }
 0x1b6   :  { %v11471_v52 = vpop.f32.mrb[16].mxu1  ;;  %3751 = vmatprep.subr.bf16.mxu0 %v8612_v8  ;;  %v12496_v24 = vld [vmem:[#allocation34_spill] sm:$0xff]  ;;  %v8627_v8 = vcombine.low %v539_v33, %v543_v46  ;;  %v8635_v33 = vcombine.low %v547_v53, %v551_v23 }
 0x1b7   :  { %12491 = vst [vmem:[#allocation58_spill] sm:$0xff] %v11471_v52  ;;  %v11473_v57 = vpop.f32.mrb[17].mxu1 }
 0x1b8   :  { %12492 = vst [vmem:[#allocation59_spill] sm:$0xff] %v11473_v57  ;;  %v11475_v56 = vpop.f32.mrb[18].mxu1  ;;  %v12497_v57 = vld [vmem:[#allocation18_spill] sm:$0xff] }
 0x1b9   :  { %12493 = vst [vmem:[#allocation60_spill] sm:$0xff] %v11475_v56  ;;  %3752 = vmatpush1.bf16.msra.mxu0 %v8611_v17  ;;  %v11477_v18 = vpop.f32.mrb[19].mxu1  ;;  %v8636_v17 = vcombine.high %v547_v53, %v551_v23  ;;  %v316_v23 = vld [vmem:[#allocation3 + $0xd8] sm:$0xff] }
 0x1ba   :  { %12494 = vst [vmem:[#allocation61_spill] sm:$0xff] %v11477_v18  ;;  %3753 = vmatprep.subr.bf16.mxu0 %v8620_v48  ;;  %v300_v18 = vld [vmem:[#allocation3 + $0x58] sm:$0xff]  ;;  %v555_v48 = vld [vmem:[#allocation3 + $0x850] sm:$0xff] }
 0x1bb   :  { %3489 = vmatmul.mubr.bf16.gmra.mrb[60].mxu1 %v12495_v4  ;;  %v559_v4 = vld [vmem:[#allocation3 + $0x870] sm:$0xff]  ;;  %v8390_v46 = vcombine.high %v300_v18, %v304_v44 }
 0x1bc   :  { %3715 = vmatmul.mubr.bf16.gmra.mrb[60].mxu0 %v12496_v24  ;;  %3531 = vmatprep.mubr.bf16.mxu1 %v12471_v25  ;;  %v8381_v24 = vcombine.low %v11405_v60, %v11407_v55  ;;  %v8643_v60 = vcombine.low %v555_v48, %v559_v4 }
 0x1bd   :  { %3754 = vmatpush1.bf16.msra.mxu0 %v8619_v45  ;;  %3757 = vmatprep.mubr.bf16.mxu0 %v12497_v57  ;;  %v8644_v57 = vcombine.high %v555_v48, %v559_v4 }
 0x1be   :  { %v11483_v52 = vpop.f32.mrb[20].mxu1  ;;  %3755 = vmatprep.subr.bf16.mxu0 %v8628_v29  ;;  %v308_v29 = vld [vmem:[#allocation3 + $0x98] sm:$0xff] }
 0x1bf   :  { %12498 = vst [vmem:[#allocation62_spill] sm:$0xff] %v11483_v52  ;;  %v11485_v30 = vpop.f32.mrb[21].mxu1  ;;  %v312_v52 = vld [vmem:[#allocation3 + $0xb8] sm:$0xff] }
 0x1c0   :  { %12499 = vst [vmem:[#allocation63_spill] sm:$0xff] %v11485_v30  ;;  %v11487_v56 = vpop.f32.mrb[22].mxu1  ;;  %v563_v30 = vld [vmem:[#allocation3 + $0x890] sm:$0xff]  ;;  %v8398_v55 = vcombine.high %v308_v29, %v312_v52 }
 0x1c1   :  { %12500 = vst [vmem:[#allocation64_spill] sm:$0xff] %v11487_v56  ;;  %3756 = vmatpush1.bf16.msra.mxu0 %v8627_v8  ;;  %v11491_v45 = vpop.f32.mrb[23].mxu1  ;;  %v8389_v56 = vcombine.low %v300_v18, %v304_v44  ;;  %v8652_v53 = vcombine.high %v563_v30, %v567_v36  ;;  %v8397_v18 = vcombine.low %v308_v29, %v312_v52 }
 0x1c2   :  { %12501 = vst [vmem:[#allocation65_spill] sm:$0xff] %v11491_v45  ;;  %3838 = vmatprep.subr.bf16.mxu0 %v8636_v17  ;;  %v320_v17 = vld [vmem:[#allocation3 + $0xf8] sm:$0xff]  ;;  %v8651_v44 = vcombine.low %v563_v30, %v567_v36 }
 0x1c3   :  { %8775 = vmatmul.mubr.msk.bf16.vlgmr.msra.gmra.mrb[32].mxu1 %vm2683_vm0, %v12502_v11  ;;  %v571_v11 = vld [vmem:[#allocation3 + $0x8d0] sm:$0xff] }
 0x1c4   :  { %3758 = vmatmul.mubr.bf16.vlgmr.msra.gmra.mrb[32].mxu0 %v12503_v13  ;;  %4065 = vmatpush1.bf16.msra.mxu1 %v8381_v24  ;;  %v575_v13 = vld [vmem:[#allocation3 + $0x8f0] sm:$0xff] }
 0x1c5   :  { %3839 = vmatpush1.bf16.msra.mxu0 %v8635_v33  ;;  %4066 = vmatprep.subr.bf16.mxu1 %v8390_v46  ;;  %v8660_v48 = vcombine.high %v571_v11, %v575_v13  ;;  %v324_v33 = vld [vmem:[#allocation3 + $0x118] sm:$0xff]  ;;  %v8659_v52 = vcombine.low %v571_v11, %v575_v13 }
 0x1c6   :  { %v11496_v8 = vpop.f32.mrb[24].mxu1  ;;  %3840 = vmatprep.subr.bf16.mxu0 %v8644_v57  ;;  %3541 = vmatprep.mubr.bf16.mxu1 %v12471_v25  ;;  %v8406_v57 = vcombine.high %v316_v23, %v320_v17  ;;  %v328_v46 = vld [vmem:[#allocation3 + $0x138] sm:$0xff] }
 0x1c7   :  { %12504 = vst [vmem:[#allocation66_spill] sm:$0xff] %v11496_v8  ;;  %v11499_v45 = vpop.f32.mrb[25].mxu1  ;;  %3767 = vmatprep.mubr.bf16.mxu0 %v10892_v35  ;;  %v579_v35 = vld [vmem:[#allocation3 + $0x910] sm:$0xff]  ;;  %v12506_v8 = vld [vmem:[#allocation21_spill] sm:$0xff]  ;;  %v8414_v29 = vcombine.high %v324_v33, %v328_v46  ;;  %v8413_v13 = vcombine.low %v324_v33, %v328_v46 }
 0x1c8   :  { %12505 = vst [vmem:[#allocation67_spill] sm:$0xff] %v11499_v45  ;;  %v11502_v24 = vpop.f32.mrb[26].mxu1  ;;  %4067 = vmatpush1.bf16.msra.mxu1 %v8389_v56  ;;  %v583_v45 = vld [vmem:[#allocation3 + $0x930] sm:$0xff]  ;;  %v8405_v56 = vcombine.low %v316_v23, %v320_v17 }
 0x1c9   :  { %3841 = vmatpush1.bf16.msra.mxu0 %v8643_v60  ;;  %v11504_v4 = vpop.f32.mrb[27].mxu1  ;;  %4068 = vmatprep.subr.bf16.mxu1 %v8398_v55  ;;  %v8668_v30 = vcombine.high %v579_v35, %v583_v45  ;;  %v332_v60 = vld [vmem:[#allocation3 + $0x158] sm:$0xff]  ;;  %v8667_v23 = vcombine.low %v579_v35, %v583_v45 }
 0x1ca   :  { %3842 = vmatprep.subr.bf16.mxu0 %v8652_v53  ;;  %v336_v55 = vld [vmem:[#allocation3 + $0x178] sm:$0xff] }
 0x1cb   :  { %8776 = vmatmul.mubr.msk.bf16.gmra.mrb[36].mxu1 %vm2683_vm0, %v11320_v51  ;;  %v587_v51 = vld [vmem:[#allocation3 + $0x950] sm:$0xff]  ;;  %v8422_v17 = vcombine.high %v332_v60, %v336_v55  ;;  %v348_v45 = vld [vmem:[#allocation3 + $0x1d8] sm:$0xff] }
 0x1cc   :  { %3768 = vmatmul.mubr.bf16.gmra.mrb[36].mxu0 %v12506_v8  ;;  %4069 = vmatpush1.bf16.msra.mxu1 %v8397_v18  ;;  %v591_v8 = vld [vmem:[#allocation3 + $0x970] sm:$0xff] }
 0x1cd   :  { %3843 = vmatpush1.bf16.msra.mxu0 %v8651_v44  ;;  %4070 = vmatprep.subr.bf16.mxu1 %v8406_v57  ;;  %v8676_v44 = vcombine.high %v587_v51, %v591_v8  ;;  %v340_v57 = vld [vmem:[#allocation3 + $0x198] sm:$0xff]  ;;  %v8675_v33 = vcombine.low %v587_v51, %v591_v8 }
 0x1ce   :  { %v11509_v36 = vpop.f32.mrb[28].mxu1  ;;  %3844 = vmatprep.subr.bf16.mxu0 %v8660_v48  ;;  %3551 = vmatprep.mubr.bf16.mxu1 %v12471_v25  ;;  %v344_v48 = vld [vmem:[#allocation3 + $0x1b8] sm:$0xff] }
 0x1cf   :  { %12507 = vst [vmem:[#allocation68_spill] sm:$0xff] %v11509_v36  ;;  %v11512_v53 = vpop.f32.mrb[29].mxu1  ;;  %3777 = vmatprep.mubr.bf16.mxu0 %v10928_v1  ;;  %v595_v1 = vld [vmem:[#allocation3 + $0x990] sm:$0xff]  ;;  %v12509_v36 = vld [vmem:[#allocation23_spill] sm:$0xff]  ;;  %v8430_v46 = vcombine.high %v340_v57, %v344_v48 }
 0x1d0   :  { %12508 = vst [vmem:[#allocation69_spill] sm:$0xff] %v11512_v53  ;;  %v11515_v18 = vpop.f32.mrb[30].mxu1  ;;  %4071 = vmatpush1.bf16.msra.mxu1 %v8405_v56  ;;  %v599_v53 = vld [vmem:[#allocation3 + $0x9b0] sm:$0xff]  ;;  %v8421_v56 = vcombine.low %v332_v60, %v336_v55  ;;  %v356_v8 = vld [vmem:[#allocation3 + $0x218] sm:$0xff] }
 0x1d1   :  { %3845 = vmatpush1.bf16.msra.mxu0 %v8659_v52  ;;  %v11517_v11 = vpop.f32.mrb[31].mxu1  ;;  %4072 = vmatprep.subr.bf16.mxu1 %v8414_v29  ;;  %v8684_v35 = vcombine.high %v595_v1, %v599_v53  ;;  %v352_v52 = vld [vmem:[#allocation3 + $0x1f8] sm:$0xff]  ;;  %v603_v29 = vld [vmem:[#allocation3 + $0x9d0] sm:$0xff] }
 0x1d2   :  { %3846 = vmatprep.subr.bf16.mxu0 %v8668_v30  ;;  %v607_v30 = vld [vmem:[#allocation3 + $0x9f0] sm:$0xff]  ;;  %v8438_v60 = vcombine.high %v348_v45, %v352_v52  ;;  %v360_v55 = vld [vmem:[#allocation3 + $0x238] sm:$0xff] }
 0x1d3   :  { %8777 = vmatmul.mubr.msk.bf16.gmra.mrb[40].mxu1 %vm2683_vm0, %v11333_v41  ;;  %v8429_v41 = vcombine.low %v340_v57, %v344_v48  ;;  %v8692_v51 = vcombine.high %v603_v29, %v607_v30  ;;  %v8446_v57 = vcombine.high %v356_v8, %v360_v55  ;;  %v368_v48 = vld [vmem:[#allocation3 + $0x278] sm:$0xff] }
 0x1d4   :  { %3778 = vmatmul.mubr.bf16.gmra.mrb[40].mxu0 %v12509_v36  ;;  %4073 = vmatpush1.bf16.msra.mxu1 %v8413_v13  ;;  %v8683_v36 = vcombine.low %v595_v1, %v599_v53  ;;  %v611_v13 = vld [vmem:[#allocation3 + $0xa10] sm:$0xff]  ;;  %v364_v53 = vld [vmem:[#allocation3 + $0x258] sm:$0xff] }
 0x1d5   :  { %3847 = vmatpush1.bf16.msra.mxu0 %v8667_v23  ;;  %4074 = vmatprep.subr.bf16.mxu1 %v8422_v17  ;;  %v615_v23 = vld [vmem:[#allocation3 + $0xa30] sm:$0xff]  ;;  %v12510_v17 = vld [vmem:[#allocation24_spill] sm:$0xff] }
 0x1d6   :  { %3848 = vmatprep.subr.bf16.mxu0 %v8676_v44  ;;  %3561 = vmatprep.mubr.bf16.mxu1 %v12471_v25  ;;  %v8437_v44 = vcombine.low %v348_v45, %v352_v52  ;;  %v8700_v1 = vcombine.high %v611_v13, %v615_v23  ;;  %v372_v45 = vld [vmem:[#allocation3 + $0x298] sm:$0xff] }
 0x1d7   :  { %3787 = vmatprep.mubr.bf16.mxu0 %v10964_v31  ;;  %v376_v52 = vld [vmem:[#allocation3 + $0x2b8] sm:$0xff] }
 0x1d8   :  { %4075 = vmatpush1.bf16.msra.mxu1 %v8421_v56  ;;  %v8691_v56 = vcombine.low %v603_v29, %v607_v30  ;;  %v627_v29 = vld [vmem:[#allocation3 + $0xa90] sm:$0xff] }
 0x1d9   :  { %3849 = vmatpush1.bf16.msra.mxu0 %v8675_v33  ;;  %4076 = vmatprep.subr.bf16.mxu1 %v8430_v46  ;;  %v619_v33 = vld [vmem:[#allocation3 + $0xa50] sm:$0xff] }
 0x1da   :  { %3850 = vmatprep.subr.bf16.mxu0 %v8684_v35  ;;  %v623_v46 = vld [vmem:[#allocation3 + $0xa70] sm:$0xff]  ;;  %v8445_v35 = vcombine.low %v356_v8, %v360_v55  ;;  %v8462_v8 = vcombine.high %v372_v45, %v376_v52 }
 0x1db   :  { %8778 = vmatmul.mubr.msk.bf16.gmra.mrb[44].mxu1 %vm2683_vm0, %v11346_v0  ;;  %v8699_v0 = vcombine.low %v611_v13, %v615_v23  ;;  %v631_v30 = vld [vmem:[#allocation3 + $0xab0] sm:$0xff]  ;;  %v380_v13 = vld [vmem:[#allocation3 + $0x2d8] sm:$0xff] }
 0x1dc   :  { %3788 = vmatmul.mubr.bf16.gmra.mrb[44].mxu0 %v12510_v17  ;;  %4077 = vmatpush1.bf16.msra.mxu1 %v8429_v41  ;;  %v8454_v41 = vcombine.high %v364_v53, %v368_v48  ;;  %v8716_v55 = vcombine.high %v627_v29, %v631_v30  ;;  %v384_v23 = vld [vmem:[#allocation3 + $0x2f8] sm:$0xff] }
 0x1dd   :  { %3851 = vmatpush1.bf16.msra.mxu0 %v8683_v36  ;;  %4078 = vmatprep.subr.bf16.mxu1 %v8438_v60  ;;  %v8708_v36 = vcombine.high %v619_v33, %v623_v46  ;;  %v12511_v60 = vld [vmem:[#allocation26_spill] sm:$0xff] }
 0x1de   :  { %3852 = vmatprep.subr.bf16.mxu0 %v8692_v51  ;;  %3571 = vmatprep.mubr.bf16.mxu1 %v12471_v25  ;;  %v8453_v51 = vcombine.low %v364_v53, %v368_v48  ;;  %v8470_v53 = vcombine.high %v380_v13, %v384_v23  ;;  %v388_v48 = vld [vmem:[#allocation3 + $0x318] sm:$0xff] }
 0x1df   :  { %3797 = vmatprep.mubr.bf16.mxu0 %v11000_v3 }
 0x1e0   :  { %4079 = vmatpush1.bf16.msra.mxu1 %v8437_v44  ;;  %v8707_v44 = vcombine.low %v619_v33, %v623_v46  ;;  %v392_v33 = vld [vmem:[#allocation3 + $0x338] sm:$0xff]  ;;  %v643_v46 = vld [vmem:[#allocation3 + $0xb10] sm:$0xff] }
 0x1e1   :  { %3853 = vmatpush1.bf16.msra.mxu0 %v8691_v56  ;;  %4080 = vmatprep.subr.bf16.mxu1 %v8446_v57  ;;  %v635_v56 = vld [vmem:[#allocation3 + $0xad0] sm:$0xff] }
 0x1e2   :  { %3854 = vmatprep.subr.bf16.mxu0 %v8700_v1  ;;  %v639_v57 = vld [vmem:[#allocation3 + $0xaf0] sm:$0xff]  ;;  %v8461_v1 = vcombine.low %v372_v45, %v376_v52  ;;  %v8478_v45 = vcombine.high %v388_v48, %v392_v33 }
 0x1e3   :  { %8779 = vmatmul.mubr.msk.bf16.gmra.mrb[48].mxu1 %vm2683_vm0, %v11359_v63  ;;  %v8715_v63 = vcombine.low %v627_v29, %v631_v30  ;;  %v396_v29 = vld [vmem:[#allocation3 + $0x358] sm:$0xff] }
 0x1e4   :  { %3798 = vmatmul.mubr.bf16.gmra.mrb[48].mxu0 %v12511_v60  ;;  %4081 = vmatpush1.bf16.msra.mxu1 %v8445_v35  ;;  %v647_v35 = vld [vmem:[#allocation3 + $0xb30] sm:$0xff]  ;;  %v400_v30 = vld [vmem:[#allocation3 + $0x378] sm:$0xff] }
 0x1e5   :  { %3855 = vmatpush1.bf16.msra.mxu0 %v8699_v0  ;;  %4082 = vmatprep.subr.bf16.mxu1 %v8454_v41  ;;  %v8724_v0 = vcombine.high %v635_v56, %v639_v57  ;;  %v12512_v41 = vld [vmem:[#allocation29_spill] sm:$0xff]  ;;  %v8732_v52 = vcombine.high %v643_v46, %v647_v35 }
 0x1e6   :  { %3856 = vmatprep.subr.bf16.mxu0 %v8708_v36  ;;  %3581 = vmatprep.mubr.bf16.mxu1 %v12471_v25  ;;  %v8469_v36 = vcombine.low %v380_v13, %v384_v23  ;;  %v8486_v13 = vcombine.high %v396_v29, %v400_v30  ;;  %v404_v23 = vld [vmem:[#allocation3 + $0x398] sm:$0xff] }
 0x1e7   :  { %3807 = vmatprep.mubr.bf16.mxu0 %v11039_v40 }
 0x1e8   :  { %4083 = vmatpush1.bf16.msra.mxu1 %v8453_v51  ;;  %v8723_v51 = vcombine.low %v635_v56, %v639_v57  ;;  %v408_v56 = vld [vmem:[#allocation3 + $0x3b8] sm:$0xff]  ;;  %v659_v57 = vld [vmem:[#allocation3 + $0xb90] sm:$0xff] }
 0x1e9   :  { %3857 = vmatpush1.bf16.msra.mxu0 %v8707_v44  ;;  %4084 = vmatprep.subr.bf16.mxu1 %v8462_v8  ;;  %v651_v44 = vld [vmem:[#allocation3 + $0xb50] sm:$0xff] }
 0x1ea   :  { %3858 = vmatprep.subr.bf16.mxu0 %v8716_v55  ;;  %v655_v8 = vld [vmem:[#allocation3 + $0xb70] sm:$0xff]  ;;  %v8477_v55 = vcombine.low %v388_v48, %v392_v33  ;;  %v8494_v48 = vcombine.high %v404_v23, %v408_v56 }
 0x1eb   :  { %8780 = vmatmul.mubr.msk.bf16.gmra.mrb[52].mxu1 %vm2683_vm0, %v11372_v12  ;;  %v8731_v12 = vcombine.low %v643_v46, %v647_v35  ;;  %v412_v46 = vld [vmem:[#allocation3 + $0x3d8] sm:$0xff] }
 0x1ec   :  { %3808 = vmatmul.mubr.bf16.gmra.mrb[52].mxu0 %v12512_v41  ;;  %4085 = vmatpush1.bf16.msra.mxu1 %v8461_v1  ;;  %v663_v1 = vld [vmem:[#allocation3 + $0xbb0] sm:$0xff]  ;;  %v416_v35 = vld [vmem:[#allocation3 + $0x3f8] sm:$0xff] }
 0x1ed   :  { %3859 = vmatpush1.bf16.msra.mxu0 %v8715_v63  ;;  %4086 = vmatprep.subr.bf16.mxu1 %v8470_v53  ;;  %v8740_v63 = vcombine.high %v651_v44, %v655_v8  ;;  %v12513_v53 = vld [vmem:[#allocation32_spill] sm:$0xff]  ;;  %v8748_v33 = vcombine.high %v659_v57, %v663_v1 }
 0x1ee   :  { %3860 = vmatprep.subr.bf16.mxu0 %v8724_v0  ;;  %3591 = vmatprep.mubr.bf16.mxu1 %v12471_v25  ;;  %v8485_v0 = vcombine.low %v396_v29, %v400_v30  ;;  %v8502_v29 = vcombine.high %v412_v46, %v416_v35  ;;  %v420_v30 = vld [vmem:[#allocation3 + $0x418] sm:$0xff] }
 0x1ef   :  { %3817 = vmatprep.mubr.bf16.mxu0 %v11078_v20 }
 0x1f0   :  { %4087 = vmatpush1.bf16.msra.mxu1 %v8469_v36  ;;  %v8739_v36 = vcombine.low %v651_v44, %v655_v8  ;;  %v424_v44 = vld [vmem:[#allocation3 + $0x438] sm:$0xff]  ;;  %v675_v8 = vld [vmem:[#allocation3 + $0xc10] sm:$0xff] }
 0x1f1   :  { %3861 = vmatpush1.bf16.msra.mxu0 %v8723_v51  ;;  %4088 = vmatprep.subr.bf16.mxu1 %v8478_v45  ;;  %v667_v51 = vld [vmem:[#allocation3 + $0xbd0] sm:$0xff] }
 0x1f2   :  { %3862 = vmatprep.subr.bf16.mxu0 %v8732_v52  ;;  %v671_v45 = vld [vmem:[#allocation3 + $0xbf0] sm:$0xff]  ;;  %v8493_v52 = vcombine.low %v404_v23, %v408_v56  ;;  %v8510_v23 = vcombine.high %v420_v30, %v424_v44  ;;  %v428_v56 = vld [vmem:[#allocation3 + $0x458] sm:$0xff] }
 0x1f3   :  { %8781 = vmatmul.mubr.msk.bf16.gmra.mrb[56].mxu1 %vm2683_vm0, %v11385_v59  ;;  %v8747_v59 = vcombine.low %v659_v57, %v663_v1  ;;  %v432_v57 = vld [vmem:[#allocation3 + $0x478] sm:$0xff] }
 0x1f4   :  { %3818 = vmatmul.mubr.bf16.gmra.mrb[56].mxu0 %v12513_v53  ;;  %4089 = vmatpush1.bf16.msra.mxu1 %v8477_v55  ;;  %v679_v55 = vld [vmem:[#allocation3 + $0xc30] sm:$0xff] }
 0x1f5   :  { %3863 = vmatpush1.bf16.msra.mxu0 %v8731_v12  ;;  %4090 = vmatprep.subr.bf16.mxu1 %v8486_v13  ;;  %v8756_v12 = vcombine.high %v667_v51, %v671_v45  ;;  %v8501_v13 = vcombine.low %v412_v46, %v416_v35  ;;  %v8764_v1 = vcombine.high %v675_v8, %v679_v55 }
 0x1f6   :  { %3864 = vmatprep.subr.bf16.mxu0 %v8740_v63  ;;  %3601 = vmatprep.mubr.bf16.mxu1 %v12471_v25  ;;  %v8755_v63 = vcombine.low %v667_v51, %v671_v45  ;;  %v8763_v46 = vcombine.low %v675_v8, %v679_v55  ;;  %v8517_v35 = vcombine.low %v428_v56, %v432_v57  ;;  %v683_v51 = vlaneseq  ;;  %v444_v45 = vld [vmem:[#allocation3 + $0x4d8] sm:$0xff] }
 0x1f7   :  { %3827 = vmatprep.mubr.bf16.mxu0 %v11114_v2 }
 0x1f8   :  { %4091 = vmatpush1.bf16.msra.mxu1 %v8485_v0  ;;  %v8509_v0 = vcombine.low %v420_v30, %v424_v44  ;;  %v452_v30 = vld [vmem:[#allocation3 + $0x518] sm:$0xff] }
 0x1f9   :  { %3865 = vmatpush1.bf16.msra.mxu0 %v8739_v36  ;;  %4092 = vmatprep.subr.bf16.mxu1 %v8494_v48  ;;  %v8518_v36 = vcombine.high %v428_v56, %v432_v57  ;;  %v436_v48 = vld [vmem:[#allocation3 + $0x498] sm:$0xff] }
 0x1fa   :  { %3866 = vmatprep.subr.bf16.mxu0 %v8748_v33  ;;  %v440_v33 = vld [vmem:[#allocation3 + $0x4b8] sm:$0xff] }
 0x1fb   :  { %8782 = vmatmul.mubr.msk.bf16.gmra.mrb[60].mxu1 %vm2683_vm0, %v11398_v6  ;;  %v456_v44 = vld [vmem:[#allocation3 + $0x538] sm:$0xff] }
 0x1fc   :  { %3828 = vmatmul.mubr.bf16.gmra.mrb[60].mxu0 %v11133_v27  ;;  %4093 = vmatpush1.bf16.msra.mxu1 %v8493_v52  ;;  %v448_v52 = vld [vmem:[#allocation3 + $0x4f8] sm:$0xff] }
 0x1fd   :  { %3867 = vmatpush1.bf16.msra.mxu0 %v8747_v59  ;;  %4094 = vmatprep.subr.bf16.mxu1 %v8502_v29  ;;  %v9983_v59 = vld [vmem:[#allocation7 + $0x4] ss:$16 sps:$4 sm:$0xff]   ;;  %v8525_v29 = vcombine.low %v436_v48, %v440_v33  ;;  %v8533_v8 = vcombine.low %v444_v45, %v448_v52 }
 0x1fe   :  { %3868 = vmatprep.subr.bf16.mxu0 %v8756_v12  ;;  %3870 = vmatprep.mubr.bf16.mxu0 %v11135_v38  ;;  %v11553_v12 = vshrl.u32 %v683_v51, 7 }
 0x1ff   :  { %4096 = vmatprep.mubr.bf16.mxu1 %v10849_v58  ;;  %v8526_v58 = vcombine.high %v436_v48, %v440_v33 }
 0x200   :  { %4095 = vmatpush1.bf16.msra.mxu1 %v8501_v13  ;;  %v11559_v55 = vsub.s32 0, %v11553_v12  ;;  %v460_v13 = vld [vmem:[#allocation3 + $0x558] sm:$0xff]  ;;  %v11565_v56 = vsub.s32 1, %v11553_v12 }
 0x201   :  { %3869 = vmatpush1.bf16.msra.mxu0 %v8755_v63  ;;  %4177 = vmatprep.subr.bf16.mxu1 %v8510_v23  ;;  %v464_v63 = vld [vmem:[#allocation3 + $0x578] sm:$0xff]  ;;  %v11562_v23 = vld [vmem:[#allocation5] sm:$0xff] }
 0x202   :  { %3951 = vmatprep.subr.bf16.mxu0 %v8764_v1  ;;  %12514 = vst [vmem:[#allocation24_spill] sm:$0xff] %v11559_v55  ;;  %12515 = vst [vmem:[#allocation26_spill] sm:$0xff] %v11565_v56  ;;  %v8550_v57 = vcombine.high %v460_v13, %v464_v63  ;;  %v11569_v1 = vrot.slane %v11562_v23, %v11559_v55  ;;  %v8549_v48 = vcombine.low %v460_v13, %v464_v63  ;;  %v484_v13 = vld [vmem:[#allocation3 + $0x618] sm:$0xff] }
 0x203   :  { %4097 = vmatmul.mubr.bf16.vlgmr.msra.gmra.mrb[64].mxu1 %v10873_v21  ;;  %v8534_v21 = vcombine.high %v444_v45, %v448_v52 }
 0x204   :  { %3871 = vmatmul.mubr.bf16.vlgmr.msra.gmra.mrb[32].mxu0 %v11157_v7  ;;  %4178 = vmatpush1.bf16.msra.mxu1 %v8509_v0  ;;  %v468_v0 = vld [vmem:[#allocation3 + $0x598] sm:$0xff] }
 0x205   :  { %4179 = vmatprep.subr.bf16.mxu1 %v8518_v36  ;;  %3880 = vmatprep.mubr.bf16.mxu0 %v11159_v10  ;;  %v472_v36 = vld [vmem:[#allocation3 + $0x5b8] sm:$0xff] }
 0x206   :  { %4106 = vmatprep.mubr.bf16.mxu1 %v10889_v32  ;;  %3952 = vmatpush1.bf16.msra.mxu0 %v8763_v46  ;;  %v8542_v32 = vcombine.high %v452_v30, %v456_v44  ;;  %v8558_v33 = vcombine.high %v468_v0, %v472_v36  ;;  %v2743_v46 = vadd.f32 %v11423_v22, %v11569_v1 }
 0x207   :  { %6394 = vmatprep.subr.bf16.mxu0 %v9983_v59  ;;  %v476_v59 = vld [vmem:[#allocation3 + $0x5d8] sm:$0xff] }
 0x208   :  { %4180 = vmatpush1.bf16.msra.mxu1 %v8517_v35  ;;  %v480_v35 = vld [vmem:[#allocation3 + $0x5f8] sm:$0xff] }
 0x209   :  { %4181 = vmatprep.subr.bf16.mxu1 %v8526_v58 }
 0x20b   :  { %4107 = vmatmul.mubr.bf16.gmra.mrb[68].mxu1 %v10909_v49  ;;  %v8541_v49 = vcombine.low %v452_v30, %v456_v44 }
 0x20c   :  { %3881 = vmatmul.mubr.bf16.gmra.mrb[36].mxu0 %v11179_v39  ;;  %4182 = vmatpush1.bf16.msra.mxu1 %v8525_v29  ;;  %v8557_v29 = vcombine.low %v468_v0, %v472_v36  ;;  %v2753_v36 = vadd.f32 %v11435_v26, %v11569_v1 }
 0x20d   :  { %4183 = vmatprep.subr.bf16.mxu1 %v8534_v21  ;;  %3890 = vmatprep.mubr.bf16.mxu0 %v11181_v43 }
 0x20e   :  { %4116 = vmatprep.mubr.bf16.mxu1 %v10925_v61  ;;  %v11573_v61 = vrot.slane %v11562_v23, %v11565_v56 }
 0x210   :  { %4184 = vmatpush1.bf16.msra.mxu1 %v8533_v8  ;;  %v2745_v58 = vadd.f32 %v11425_v34, %v11573_v61  ;;  %v2749_v21 = vadd.f32 %v11429_v5, %v11573_v61  ;;  %v488_v34 = vld [vmem:[#allocation3 + $0x638] sm:$0xff] }
 0x211   :  { %4185 = vmatprep.subr.bf16.mxu1 %v8542_v32  ;;  %v8574_v5 = vcombine.high %v484_v13, %v488_v34  ;;  %v8573_v26 = vcombine.low %v484_v13, %v488_v34  ;;  %v12517_v13 = vld [vmem:[#allocation36_spill] sm:$0xff] }
 0x213   :  { %4117 = vmatmul.mubr.bf16.gmra.mrb[72].mxu1 %v10945_v15  ;;  %v2747_v15 = vadd.f32 %v11427_v37, %v11569_v1 }
 0x214   :  { %3891 = vmatmul.mubr.bf16.gmra.mrb[40].mxu0 %v11199_v9  ;;  %4186 = vmatpush1.bf16.msra.mxu1 %v8541_v49 }
 0x215   :  { %4187 = vmatprep.subr.bf16.mxu1 %v8550_v57  ;;  %3900 = vmatprep.mubr.bf16.mxu0 %v11201_v14  ;;  %v8565_v57 = vcombine.low %v476_v59, %v480_v35 }
 0x216   :  { %4126 = vmatprep.mubr.bf16.mxu1 %v10961_v28  ;;  %v8566_v28 = vcombine.high %v476_v59, %v480_v35  ;;  %v2757_v35 = vadd.f32 %v11439_v16, %v11569_v1  ;;  %v504_v16 = vld [vmem:[#allocation3 + $0x6b8] sm:$0xff] }
 0x217   :  { %v3081_v51 = vpop.f32.mrb[0].mxu0 }
 0x218   :  { %v9136_v45 = vadd.f32 %v3081_v51, %v2743_v46  ;;  %v3083_v52 = vpop.f32.mrb[1].mxu0  ;;  %4188 = vmatpush1.bf16.msra.mxu1 %v8549_v48  ;;  %v492_v46 = vld [vmem:[#allocation3 + $0x658] sm:$0xff] }
 0x219   :  { %v9138_v30 = vadd.f32 %v3083_v52, %v2745_v58  ;;  %v3085_v22 = vpop.f32.mrb[2].mxu0  ;;  %4189 = vmatprep.subr.bf16.mxu1 %v8558_v33  ;;  %v496_v58 = vld [vmem:[#allocation3 + $0x678] sm:$0xff] }
 0x21a   :  { %v4516_v44 = vmul.f32 0.2, %v9136_v45  ;;  %v9140_v8 = vadd.f32 %v3085_v22, %v2747_v15  ;;  %v3087_v32 = vpop.f32.mrb[3].mxu0 }
 0x21b   :  { %v4517_v63 = vmul.f32 0.2, %v9138_v30  ;;  %v9142_v49 = vadd.f32 %v3087_v32, %v2749_v21  ;;  %4127 = vmatmul.mubr.bf16.gmra.mrb[76].mxu1 %v10981_v47  ;;  %v2755_v47 = vadd.f32 %v11437_v54, %v11573_v61  ;;  %v500_v32 = vld [vmem:[#allocation3 + $0x698] sm:$0xff] }
 0x21c   :  { %v4524_v37 = vmul.f32 0.2, %v9140_v8  ;;  %3901 = vmatmul.mubr.bf16.gmra.mrb[44].mxu0 %v11219_v42  ;;  %4190 = vmatpush1.bf16.msra.mxu1 %v8557_v29  ;;  %v4644_v48 = vmax.f32 %v9136_v45, %v4516_v44 }
 0x21d   :  { %v4525_v0 = vmul.f32 0.2, %v9142_v49  ;;  %4191 = vmatprep.subr.bf16.mxu1 %v8566_v28  ;;  %3910 = vmatprep.mubr.bf16.mxu0 %v11221_v50  ;;  %v4645_v51 = vmax.f32 %v9138_v30, %v4517_v63  ;;  %v8582_v28 = vcombine.high %v492_v46, %v496_v58 }
 0x21e   :  { %v4652_v33 = vmax.f32 %v9140_v8, %v4524_v37  ;;  %4136 = vmatprep.mubr.bf16.mxu1 %v10997_v62  ;;  %v2759_v62 = vadd.f32 %v11441_v19, %v11573_v61  ;;  %v12516_v37 = vld [vmem:[#allocation25_spill] sm:$0xff]  ;;  %v8581_v19 = vcombine.low %v492_v46, %v496_v58  ;;  %v12522_v58 = vld [vmem:[#allocation52_spill] sm:$0xff] }
 0x21f   :  { %v4653_v15 = vmax.f32 %v9142_v49, %v4525_v0  ;;  %v3091_v59 = vpop.f32.mrb[4].mxu0  ;;  %v12518_v0 = vld [vmem:[#allocation37_spill] sm:$0xff] }
 0x220   :  { %v11597_v52 = vpack.c.bf16 %v4652_v33, %v4644_v48  ;;  %v9144_v29 = vadd.f32 %v3091_v59, %v2753_v36  ;;  %v3093_v21 = vpop.f32.mrb[5].mxu0  ;;  %4192 = vmatpush1.bf16.msra.mxu1 %v8565_v57  ;;  %v12519_v36 = vld [vmem:[#allocation50_spill] sm:$0xff]  ;;  %v512_v59 = vld [vmem:[#allocation3 + $0x6f8] sm:$0xff] }
 0x221   :  { %v9146_v45 = vadd.f32 %v3093_v21, %v2755_v47  ;;  %v3095_v22 = vpop.f32.mrb[6].mxu0  ;;  %4193 = vmatprep.subr.bf16.mxu1 %v8574_v5  ;;  %v11601_v54 = vpack.c.bf16 %v4653_v15, %v4645_v51  ;;  %v8590_v5 = vcombine.high %v500_v32, %v504_v16  ;;  %v2763_v48 = vadd.f32 %v12519_v36, %v11569_v1  ;;  %v12520_v51 = vld [vmem:[#allocation27_spill] sm:$0xff] }
 0x222   :  { %v4532_v30 = vmul.f32 0.2, %v9144_v29  ;;  %v9148_v44 = vadd.f32 %v3095_v22, %v2757_v35  ;;  %v3097_v8 = vpop.f32.mrb[7].mxu0  ;;  %v508_v15 = vld [vmem:[#allocation3 + $0x6d8] sm:$0xff]  ;;  %v2767_v22 = vadd.f32 %v12522_v58, %v11569_v1 }
 0x223   :  { %v4533_v63 = vmul.f32 0.2, %v9146_v45  ;;  %v9150_v49 = vadd.f32 %v3097_v8, %v2759_v62  ;;  %4137 = vmatmul.mubr.bf16.gmra.mrb[80].mxu1 %v12516_v37  ;;  %v12521_v35 = vld [vmem:[#allocation51_spill] sm:$0xff]  ;;  %v8589_v37 = vcombine.low %v500_v32, %v504_v16  ;;  %v12525_v16 = vld [vmem:[#allocation38_spill] sm:$0xff] }
 0x224   :  { %v4540_v57 = vmul.f32 0.2, %v9148_v44  ;;  %3911 = vmatmul.mubr.bf16.gmra.mrb[48].mxu0 %v12517_v13  ;;  %4194 = vmatpush1.bf16.msra.mxu1 %v8573_v26  ;;  %v4660_v33 = vmax.f32 %v9144_v29, %v4532_v30  ;;  %v2765_v21 = vadd.f32 %v12521_v35, %v11573_v61  ;;  %v12523_v29 = vld [vmem:[#allocation53_spill] sm:$0xff]  ;;  %v520_v58 = vld [vmem:[#allocation3 + $0x738] sm:$0xff] }
 0x225   :  { %v4541_v34 = vmul.f32 0.2, %v9150_v49  ;;  %4195 = vmatprep.subr.bf16.mxu1 %v8582_v28  ;;  %3920 = vmatprep.mubr.bf16.mxu0 %v12518_v0  ;;  %v4661_v62 = vmax.f32 %v9146_v45, %v4533_v63  ;;  %v2769_v30 = vadd.f32 %v12523_v29, %v11573_v61  ;;  %v12528_v29 = vld [vmem:[#allocation30_spill] sm:$0xff] }
 0x226   :  { %v4668_v47 = vmax.f32 %v9148_v44, %v4540_v57  ;;  %4146 = vmatprep.mubr.bf16.mxu1 %v12520_v51  ;;  %v8598_v51 = vcombine.high %v508_v15, %v512_v59 }
 0x227   :  { %v4669_v26 = vmax.f32 %v9150_v49, %v4541_v34  ;;  %v3101_v46 = vpop.f32.mrb[8].mxu0  ;;  %v516_v34 = vld [vmem:[#allocation3 + $0x718] sm:$0xff] }
 0x228   :  { %v9152_v28 = vadd.f32 %v3101_v46, %v2763_v48  ;;  %v3103_v8 = vpop.f32.mrb[9].mxu0  ;;  %4196 = vmatpush1.bf16.msra.mxu1 %v8581_v19  ;;  %v11613_v36 = vpack.c.bf16 %v4668_v47, %v4660_v33  ;;  %v12524_v19 = vld [vmem:[#allocation28_spill] sm:$0xff]  ;;  %v8597_v33 = vcombine.low %v508_v15, %v512_v59 }
 0x229   :  { %v9154_v44 = vadd.f32 %v3103_v8, %v2765_v21  ;;  %v3105_v57 = vpop.f32.mrb[10].mxu0  ;;  %4197 = vmatprep.subr.bf16.mxu1 %v8590_v5  ;;  %v11617_v35 = vpack.c.bf16 %v4669_v26, %v4661_v62  ;;  %v12526_v5 = vld [vmem:[#allocation39_spill] sm:$0xff]  ;;  %v8606_v21 = vcombine.high %v516_v34, %v520_v58  ;;  %v12527_v62 = vld [vmem:[#allocation54_spill] sm:$0xff]  ;;  %v12530_v59 = vld [vmem:[#allocation56_spill] sm:$0xff] }
 0x22a   :  { %v4548_v45 = vmul.f32 0.2, %v9152_v28  ;;  %v9156_v63 = vadd.f32 %v3105_v57, %v2767_v22  ;;  %v3107_v49 = vpop.f32.mrb[11].mxu0  ;;  %v2773_v26 = vadd.f32 %v12527_v62, %v11569_v1  ;;  %v528_v57 = vld [vmem:[#allocation3 + $0x778] sm:$0xff] }
 0x22b   :  { %v4549_v48 = vmul.f32 0.2, %v9154_v44  ;;  %v9158_v46 = vadd.f32 %v3107_v49, %v2769_v30  ;;  %4147 = vmatmul.mubr.bf16.gmra.mrb[84].mxu1 %v12524_v19  ;;  %v524_v30 = vld [vmem:[#allocation3 + $0x758] sm:$0xff] }
 0x22c   :  { %v4556_v32 = vmul.f32 0.2, %v9156_v63  ;;  %3921 = vmatmul.mubr.bf16.gmra.mrb[52].mxu0 %v12525_v16  ;;  %4198 = vmatpush1.bf16.msra.mxu1 %v8589_v37  ;;  %v4676_v22 = vmax.f32 %v9152_v28, %v4548_v45  ;;  %v12529_v49 = vld [vmem:[#allocation55_spill] sm:$0xff]  ;;  %v8605_v16 = vcombine.low %v516_v34, %v520_v58  ;;  %v12531_v28 = vld [vmem:[#allocation57_spill] sm:$0xff]  ;;  %v12533_v58 = vld [vmem:[#allocation40_spill] sm:$0xff] }
 0x22d   :  { %v4557_v47 = vmul.f32 0.2, %v9158_v46  ;;  %4199 = vmatprep.subr.bf16.mxu1 %v8598_v51  ;;  %3930 = vmatprep.mubr.bf16.mxu0 %v12526_v5  ;;  %v2775_v19 = vadd.f32 %v12529_v49, %v11573_v61  ;;  %v4677_v56 = vmax.f32 %v9154_v44, %v4549_v48  ;;  %v2777_v51 = vadd.f32 %v12530_v59, %v11569_v1  ;;  %v536_v59 = vld [vmem:[#allocation3 + $0x7b8] sm:$0xff] }
 0x22e   :  { %v4684_v8 = vmax.f32 %v9156_v63, %v4556_v32  ;;  %4156 = vmatprep.mubr.bf16.mxu1 %v12528_v29  ;;  %v2779_v45 = vadd.f32 %v12531_v28, %v11573_v61  ;;  %v8614_v29 = vcombine.high %v524_v30, %v528_v57  ;;  %v12536_v28 = vld [vmem:[#allocation33_spill] sm:$0xff] }
 0x22f   :  { %v4685_v37 = vmax.f32 %v9158_v46, %v4557_v47  ;;  %v3111_v15 = vpop.f32.mrb[12].mxu0  ;;  %v532_v47 = vld [vmem:[#allocation3 + $0x798] sm:$0xff] }
 0x230   :  { %v9160_v55 = vadd.f32 %v3111_v15, %v2773_v26  ;;  %v3113_v5 = vpop.f32.mrb[13].mxu0  ;;  %4200 = vmatpush1.bf16.msra.mxu1 %v8597_v33  ;;  %v11629_v62 = vpack.c.bf16 %v4684_v8, %v4676_v22  ;;  %v12532_v33 = vld [vmem:[#allocation31_spill] sm:$0xff]  ;;  %v8613_v22 = vcombine.low %v524_v30, %v528_v57  ;;  %v12535_v8 = vld [vmem:[#allocation58_spill] sm:$0xff]  ;;  %v12538_v57 = vld [vmem:[#allocation60_spill] sm:$0xff]  ;;  %v8621_v13 = vcombine.low %v532_v47, %v536_v59 }
 0x231   :  { %v9162_v63 = vadd.f32 %v3113_v5, %v2775_v19  ;;  %v3115_v32 = vpop.f32.mrb[14].mxu0  ;;  %4201 = vmatprep.subr.bf16.mxu1 %v8606_v21  ;;  %v11633_v49 = vpack.c.bf16 %v4685_v37, %v4677_v56  ;;  %v12534_v21 = vld [vmem:[#allocation41_spill] sm:$0xff]  ;;  %v8622_v56 = vcombine.high %v532_v47, %v536_v59  ;;  %v2783_v19 = vadd.f32 %v12535_v8, %v11569_v1  ;;  %v12542_v59 = vld [vmem:[#allocation42_spill] sm:$0xff] }
 0x232   :  { %v4564_v44 = vmul.f32 0.2, %v9160_v55  ;;  %v9164_v48 = vadd.f32 %v3115_v32, %v2777_v51  ;;  %v3117_v46 = vpop.f32.mrb[15].mxu0  ;;  %v544_v32 = vld [vmem:[#allocation3 + $0x7f8] sm:$0xff] }
 0x233   :  { %v4565_v26 = vmul.f32 0.2, %v9162_v63  ;;  %v9166_v15 = vadd.f32 %v3117_v46, %v2779_v45  ;;  %4157 = vmatmul.mubr.bf16.gmra.mrb[88].mxu1 %v12532_v33  ;;  %v540_v45 = vld [vmem:[#allocation3 + $0x7d8] sm:$0xff] }
 0x234   :  { %v4572_v34 = vmul.f32 0.2, %v9164_v48  ;;  %3931 = vmatmul.mubr.bf16.gmra.mrb[56].mxu0 %v12533_v58  ;;  %4202 = vmatpush1.bf16.msra.mxu1 %v8605_v16  ;;  %v4692_v37 = vmax.f32 %v9160_v55, %v4564_v44  ;;  %v12537_v46 = vld [vmem:[#allocation59_spill] sm:$0xff]  ;;  %v12540_v55 = vld [vmem:[#allocation61_spill] sm:$0xff] }
 0x235   :  { %v4573_v5 = vmul.f32 0.2, %v9166_v15  ;;  %4203 = vmatprep.subr.bf16.mxu1 %v8614_v29  ;;  %3940 = vmatprep.mubr.bf16.mxu0 %v12534_v21  ;;  %v2785_v33 = vadd.f32 %v12537_v46, %v11573_v61  ;;  %v4693_v58 = vmax.f32 %v9162_v63, %v4565_v26  ;;  %v2787_v29 = vadd.f32 %v12538_v57, %v11569_v1  ;;  %v552_v57 = vld [vmem:[#allocation3 + $0x838] sm:$0xff] }
 0x236   :  { %v4700_v51 = vmax.f32 %v9164_v48, %v4572_v34  ;;  %4166 = vmatprep.mubr.bf16.mxu1 %v12536_v28  ;;  %v2789_v44 = vadd.f32 %v12540_v55, %v11573_v61  ;;  %v8630_v28 = vcombine.high %v540_v45, %v544_v32  ;;  %v556_v55 = vld [vmem:[#allocation3 + $0x858] sm:$0xff] }
 0x237   :  { %v4701_v16 = vmax.f32 %v9166_v15, %v4573_v5  ;;  %v3121_v30 = vpop.f32.mrb[16].mxu0  ;;  %v548_v5 = vld [vmem:[#allocation3 + $0x818] sm:$0xff] }
 0x238   :  { %v9168_v21 = vadd.f32 %v3121_v30, %v2783_v19  ;;  %v3123_v0 = vpop.f32.mrb[17].mxu0  ;;  %4204 = vmatpush1.bf16.msra.mxu1 %v8613_v22  ;;  %v11645_v8 = vpack.c.bf16 %v4700_v51, %v4692_v37  ;;  %v12541_v22 = vld [vmem:[#allocation34_spill] sm:$0xff]  ;;  %v8629_v37 = vcombine.low %v540_v45, %v544_v32  ;;  %v12546_v32 = vld [vmem:[#allocation64_spill] sm:$0xff] }
 0x239   :  { %v9170_v48 = vadd.f32 %v3123_v0, %v2785_v33  ;;  %v3125_v34 = vpop.f32.mrb[18].mxu0  ;;  %4205 = vmatprep.subr.bf16.mxu1 %v8622_v56  ;;  %v11649_v46 = vpack.c.bf16 %v4701_v16, %v4693_v58  ;;  %v8638_v58 = vcombine.high %v548_v5, %v552_v57  ;;  %v12543_v56 = vld [vmem:[#allocation62_spill] sm:$0xff] }
 0x23a   :  { %12539 = vst [vmem:[#allocation29_spill] sm:$0xff] %v11645_v8  ;;  %v4580_v63 = vmul.f32 0.2, %v9168_v21  ;;  %v9172_v26 = vadd.f32 %v3125_v34, %v2787_v29  ;;  %v3127_v15 = vpop.f32.mrb[19].mxu0  ;;  %v2793_v51 = vadd.f32 %v12543_v56, %v11569_v1  ;;  %v12544_v29 = vld [vmem:[#allocation18_spill] sm:$0xff]  ;;  %v12545_v34 = vld [vmem:[#allocation63_spill] sm:$0xff]  ;;  %v8637_v8 = vcombine.low %v548_v5, %v552_v57 }
 0x23b   :  { %v4581_v19 = vmul.f32 0.2, %v9170_v48  ;;  %v9174_v30 = vadd.f32 %v3127_v15, %v2789_v44  ;;  %4167 = vmatmul.mubr.bf16.gmra.mrb[92].mxu1 %v12541_v22  ;;  %v560_v44 = vld [vmem:[#allocation3 + $0x878] sm:$0xff]  ;;  %v2795_v15 = vadd.f32 %v12545_v34, %v11573_v61 }
 0x23c   :  { %v4588_v47 = vmul.f32 0.2, %v9172_v26  ;;  %3941 = vmatmul.mubr.bf16.gmra.mrb[60].mxu0 %v12542_v59  ;;  %4206 = vmatpush1.bf16.msra.mxu1 %v8621_v13  ;;  %v4708_v33 = vmax.f32 %v9168_v21, %v4580_v63  ;;  %v12548_v21 = vld [vmem:[#allocation65_spill] sm:$0xff]  ;;  %v8646_v34 = vcombine.high %v556_v55, %v560_v44  ;;  %v12550_v57 = vld [vmem:[#allocation19_spill] sm:$0xff] }
 0x23d   :  { %v4589_v0 = vmul.f32 0.2, %v9174_v30  ;;  %4207 = vmatprep.subr.bf16.mxu1 %v8630_v28  ;;  %3983 = vmatprep.mubr.bf16.mxu0 %v12471_v25  ;;  %v4709_v22 = vmax.f32 %v9170_v48, %v4581_v19  ;;  %v2797_v28 = vadd.f32 %v12546_v32, %v11569_v1  ;;  %v2799_v63 = vadd.f32 %v12548_v21, %v11573_v61  ;;  %v9986_v48 = vld [vmem:[#allocation7 + $0x24] ss:$16 sps:$4 sm:$0xff]  }
 0x23e   :  { %v4716_v16 = vmax.f32 %v9172_v26, %v4588_v47  ;;  %4209 = vmatprep.mubr.bf16.mxu1 %v12544_v29  ;;  %v9981_v29 = vld [vmem:[#allocation7] ss:$16 sps:$4 sm:$0xff]  }
 0x23f   :  { %v4717_v13 = vmax.f32 %v9174_v30, %v4589_v0  ;;  %v3131_v45 = vpop.f32.mrb[20].mxu0 }
 0x240   :  { %v9176_v59 = vadd.f32 %v3131_v45, %v2793_v51  ;;  %v3133_v50 = vpop.f32.mrb[21].mxu0  ;;  %4208 = vmatpush1.bf16.msra.mxu1 %v8629_v37  ;;  %v11661_v56 = vpack.c.bf16 %v4716_v16, %v4708_v33  ;;  %v564_v51 = vld [vmem:[#allocation3 + $0x898] sm:$0xff] }
 0x241   :  { %v9178_v26 = vadd.f32 %v3133_v50, %v2795_v15  ;;  %v3135_v47 = vpop.f32.mrb[22].mxu0  ;;  %4290 = vmatprep.subr.bf16.mxu1 %v8638_v58  ;;  %v11665_v19 = vpack.c.bf16 %v4717_v13, %v4709_v22  ;;  %v568_v45 = vld [vmem:[#allocation3 + $0x8b8] sm:$0xff]  ;;  %v8645_v50 = vcombine.low %v556_v55, %v560_v44  ;;  %v12552_v13 = vld [vmem:[#allocation66_spill] sm:$0xff]  ;;  %v2807_v55 = vadd.f32 %v11502_v24, %v11569_v1 }
 0x242   :  { %12547 = vst [vmem:[#allocation32_spill] sm:$0xff] %v11661_v56  ;;  %v4596_v30 = vmul.f32 0.2, %v9176_v59  ;;  %v9180_v0 = vadd.f32 %v3135_v47, %v2797_v28  ;;  %v3137_v32 = vpop.f32.mrb[23].mxu0  ;;  %v12551_v16 = vld [vmem:[#allocation43_spill] sm:$0xff]  ;;  %v8654_v22 = vcombine.high %v564_v51, %v568_v45  ;;  %v2803_v28 = vadd.f32 %v12552_v13, %v11569_v1  ;;  %v12554_v56 = vld [vmem:[#allocation20_spill] sm:$0xff] }
 0x243   :  { %12549 = vst [vmem:[#allocation25_spill] sm:$0xff] %v11665_v19  ;;  %v4597_v37 = vmul.f32 0.2, %v9178_v26  ;;  %v9182_v5 = vadd.f32 %v3137_v32, %v2799_v63  ;;  %4210 = vmatmul.mubr.bf16.vlgmr.msra.gmra.mrb[64].mxu1 %v12550_v57  ;;  %v9984_v15 = vld [vmem:[#allocation7 + $0x20] ss:$16 sps:$4 sm:$0xff]  }
 0x244   :  { %v4604_v33 = vmul.f32 0.2, %v9180_v0  ;;  %8783 = vmatmul.mubr.msk.bf16.vlgmr.msra.gmra.mrb[32].mxu0 %vm2683_vm0, %v12551_v16  ;;  %4291 = vmatpush1.bf16.msra.mxu1 %v8637_v8  ;;  %v4724_v21 = vmax.f32 %v9176_v59, %v4596_v30  ;;  %v9989_v63 = vld [vmem:[#allocation7 + $0x44] ss:$16 sps:$4 sm:$0xff]   ;;  %v2809_v59 = vadd.f32 %v11504_v4, %v11573_v61 }
 0x245   :  { %v4605_v58 = vmul.f32 0.2, %v9182_v5  ;;  %6395 = vmatpush1.bf16.msra.mxu0 %v9981_v29  ;;  %4292 = vmatprep.subr.bf16.mxu1 %v8646_v34  ;;  %v572_v32 = vld [vmem:[#allocation3 + $0x8d8] sm:$0xff]  ;;  %v4725_v44 = vmax.f32 %v9178_v26, %v4597_v37 }
 0x246   :  { %v4732_v47 = vmax.f32 %v9180_v0, %v4604_v33  ;;  %6396 = vmatprep.subr.bf16.mxu0 %v9986_v48  ;;  %3993 = vmatprep.mubr.bf16.mxu0 %v12471_v25  ;;  %v576_v57 = vld [vmem:[#allocation3 + $0x8f8] sm:$0xff]  ;;  %v8653_v0 = vcombine.low %v564_v51, %v568_v45  ;;  %v12555_v51 = vld [vmem:[#allocation21_spill] sm:$0xff] }
 0x247   :  { %v12553_v16 = vld [vmem:[#allocation67_spill] sm:$0xff]  ;;  %v4733_v29 = vmax.f32 %v9182_v5, %v4605_v58  ;;  %v3141_v34 = vpop.f32.mrb[24].mxu0  ;;  %4219 = vmatprep.mubr.bf16.mxu1 %v12554_v56  ;;  %v8662_v24 = vcombine.high %v572_v32, %v576_v57 }
 0x248   :  { %v2805_v8 = vadd.f32 %v12553_v16, %v11573_v61  ;;  %v9184_v48 = vadd.f32 %v3141_v34, %v2803_v28  ;;  %v3143_v30 = vpop.f32.mrb[25].mxu0  ;;  %4293 = vmatpush1.bf16.msra.mxu1 %v8645_v50  ;;  %v11680_v33 = vpack.c.bf16 %v4732_v47, %v4724_v21  ;;  %v9987_v16 = vld [vmem:[#allocation7 + $0x40] ss:$16 sps:$4 sm:$0xff]   ;;  %v9992_v26 = vld [vmem:[#allocation7 + $0x64] ss:$16 sps:$4 sm:$0xff]   ;;  %v12556_v21 = vld [vmem:[#allocation44_spill] sm:$0xff] }
 0x249   :  { %v3145_v19 = vpop.f32.mrb[26].mxu0  ;;  %6397 = vmatpush1.bf16.msra.mxu0 %v9984_v15  ;;  %4294 = vmatprep.subr.bf16.mxu1 %v8654_v22  ;;  %v11682_v37 = vpack.c.bf16 %v4733_v29, %v4725_v44  ;;  %v580_v4 = vld [vmem:[#allocation3 + $0x918] sm:$0xff]  ;;  %v8661_v15 = vcombine.low %v572_v32, %v576_v57  ;;  %v2817_v32 = vadd.f32 %v11515_v18, %v11569_v1 }
 0x24a   :  { %v9186_v13 = vadd.f32 %v3143_v30, %v2805_v8  ;;  %v4612_v5 = vmul.f32 0.2, %v9184_v48  ;;  %v9188_v56 = vadd.f32 %v3145_v19, %v2807_v55  ;;  %v3147_v58 = vpop.f32.mrb[27].mxu0  ;;  %6398 = vmatprep.subr.bf16.mxu0 %v9989_v63  ;;  %v584_v28 = vld [vmem:[#allocation3 + $0x938] sm:$0xff]  ;;  %v12557_v19 = vld [vmem:[#allocation68_spill] sm:$0xff] }
 0x24b   :  { %v9190_v50 = vadd.f32 %v3147_v58, %v2809_v59  ;;  %4220 = vmatmul.mubr.bf16.gmra.mrb[68].mxu1 %v12555_v51  ;;  %v9990_v47 = vld [vmem:[#allocation7 + $0x60] ss:$16 sps:$4 sm:$0xff]   ;;  %v8670_v8 = vcombine.high %v580_v4, %v584_v28  ;;  %v2813_v63 = vadd.f32 %v12557_v19, %v11569_v1  ;;  %v9995_v29 = vld [vmem:[#allocation7 + $0x84] ss:$16 sps:$4 sm:$0xff]   ;;  %v12559_v51 = vld [vmem:[#allocation22_spill] sm:$0xff] }
 0x24c   :  { %v4613_v34 = vmul.f32 0.2, %v9186_v13  ;;  %v4620_v45 = vmul.f32 0.2, %v9188_v56  ;;  %8784 = vmatmul.mubr.msk.bf16.gmra.mrb[36].mxu0 %vm2683_vm0, %v12556_v21  ;;  %4295 = vmatpush1.bf16.msra.mxu1 %v8653_v0  ;;  %v4740_v55 = vmax.f32 %v9184_v48, %v4612_v5  ;;  %v588_v59 = vld [vmem:[#allocation3 + $0x958] sm:$0xff]  ;;  %v12558_v58 = vld [vmem:[#allocation69_spill] sm:$0xff]  ;;  %v2819_v48 = vadd.f32 %v11517_v11, %v11573_v61 }
 0x24d   :  { %v4621_v22 = vmul.f32 0.2, %v9190_v50  ;;  %6399 = vmatpush1.bf16.msra.mxu0 %v9987_v16  ;;  %4296 = vmatprep.subr.bf16.mxu1 %v8662_v24  ;;  %v592_v30 = vld [vmem:[#allocation3 + $0x978] sm:$0xff]  ;;  %v2815_v0 = vadd.f32 %v12558_v58, %v11573_v61 }
 0x24e   :  { %v4748_v44 = vmax.f32 %v9188_v56, %v4620_v45  ;;  %6400 = vmatprep.subr.bf16.mxu0 %v9992_v26  ;;  %4003 = vmatprep.mubr.bf16.mxu0 %v12471_v25  ;;  %v4741_v57 = vmax.f32 %v9186_v13, %v4613_v34  ;;  %v8669_v56 = vcombine.low %v580_v4, %v584_v28  ;;  %v9993_v58 = vld [vmem:[#allocation7 + $0x80] ss:$16 sps:$4 sm:$0xff]   ;;  %v9998_v1 = vld [vmem:[#allocation7 + $0xa4] ss:$16 sps:$4 sm:$0xff]  }
 0x24f   :  { %v4749_v16 = vmax.f32 %v9190_v50, %v4621_v22  ;;  %v3151_v24 = vpop.f32.mrb[28].mxu0  ;;  %4229 = vmatprep.mubr.bf16.mxu1 %v12559_v51  ;;  %v8678_v18 = vcombine.high %v588_v59, %v592_v30  ;;  %v596_v11 = vld [vmem:[#allocation3 + $0x998] sm:$0xff] }
 0x250   :  { %v9192_v26 = vadd.f32 %v3151_v24, %v2813_v63  ;;  %v3153_v5 = vpop.f32.mrb[29].mxu0  ;;  %4297 = vmatpush1.bf16.msra.mxu1 %v8661_v15  ;;  %v11697_v45 = vpack.c.bf16 %v4748_v44, %v4740_v55  ;;  %v600_v61 = vld [vmem:[#allocation3 + $0x9b8] sm:$0xff]  ;;  %v12561_v55 = vld [vmem:[#allocation45_spill] sm:$0xff] }
 0x251   :  { %v9194_v19 = vadd.f32 %v3153_v5, %v2815_v0  ;;  %v3155_v21 = vpop.f32.mrb[30].mxu0  ;;  %6401 = vmatpush1.bf16.msra.mxu0 %v9990_v47  ;;  %4298 = vmatprep.subr.bf16.mxu1 %v8670_v8  ;;  %v11699_v13 = vpack.c.bf16 %v4749_v16, %v4741_v57  ;;  %v12560_v4 = vld [vmem:[#allocation23_spill] sm:$0xff]  ;;  %v8677_v47 = vcombine.low %v588_v59, %v592_v30 }
 0x252   :  { %v4628_v34 = vmul.f32 0.2, %v9192_v26  ;;  %v9196_v50 = vadd.f32 %v3155_v21, %v2817_v32  ;;  %v3157_v22 = vpop.f32.mrb[31].mxu0  ;;  %6402 = vmatprep.subr.bf16.mxu0 %v9995_v29  ;;  %v9996_v44 = vld [vmem:[#allocation7 + $0xa0] ss:$16 sps:$4 sm:$0xff]   ;;  %v8686_v0 = vcombine.high %v596_v11, %v600_v61 }
 0x253   :  { %v4629_v63 = vmul.f32 0.2, %v9194_v19  ;;  %v9198_v15 = vadd.f32 %v3157_v22, %v2819_v48  ;;  %4230 = vmatmul.mubr.bf16.gmra.mrb[72].mxu1 %v12560_v4  ;;  %v10001_v29 = vld [vmem:[#allocation7 + $0xc4] ss:$16 sps:$4 sm:$0xff]   ;;  %v8685_v48 = vcombine.low %v596_v11, %v600_v61  ;;  %v9999_v30 = vld [vmem:[#allocation7 + $0xc0] ss:$16 sps:$4 sm:$0xff]  }
 0x254   :  { %v4636_v28 = vmul.f32 0.2, %v9196_v50  ;;  %8785 = vmatmul.mubr.msk.bf16.gmra.mrb[40].mxu0 %vm2683_vm0, %v12561_v55  ;;  %4299 = vmatpush1.bf16.msra.mxu1 %v8669_v56  ;;  %v4756_v21 = vmax.f32 %v9192_v26, %v4628_v34  ;;  %v604_v57 = vld [vmem:[#allocation3 + $0x9d8] sm:$0xff] }
 0x255   :  { %v4637_v8 = vmul.f32 0.2, %v9198_v15  ;;  %6403 = vmatpush1.bf16.msra.mxu0 %v9993_v58  ;;  %4300 = vmatprep.subr.bf16.mxu1 %v8678_v18  ;;  %v608_v16 = vld [vmem:[#allocation3 + $0x9f8] sm:$0xff]  ;;  %v4757_v24 = vmax.f32 %v9194_v19, %v4629_v63  ;;  %v12562_v19 = vld [vmem:[#allocation46_spill] sm:$0xff] }
 0x256   :  { %v4764_v32 = vmax.f32 %v9196_v50, %v4636_v28  ;;  %6404 = vmatprep.subr.bf16.mxu0 %v9998_v1  ;;  %4013 = vmatprep.mubr.bf16.mxu0 %v12471_v25  ;;  %v8694_v5 = vcombine.high %v604_v57, %v608_v16  ;;  %v10004_v56 = vld [vmem:[#allocation7 + $0xe4] ss:$16 sps:$4 sm:$0xff]   ;;  %v10002_v1 = vld [vmem:[#allocation7 + $0xe0] ss:$16 sps:$4 sm:$0xff]  }
 0x257   :  { %v4765_v51 = vmax.f32 %v9198_v15, %v4637_v8  ;;  %4239 = vmatprep.mubr.bf16.mxu1 %v10964_v31  ;;  %v612_v58 = vld [vmem:[#allocation3 + $0xa18] sm:$0xff]  ;;  %v8693_v31 = vcombine.low %v604_v57, %v608_v16 }
 0x258   :  { %4301 = vmatpush1.bf16.msra.mxu1 %v8677_v47  ;;  %v11706_v59 = vpack.c.bf16 %v4764_v32, %v4756_v21  ;;  %v616_v18 = vld [vmem:[#allocation3 + $0xa38] sm:$0xff] }
 0x259   :  { %6405 = vmatpush1.bf16.msra.mxu0 %v9996_v44  ;;  %4302 = vmatprep.subr.bf16.mxu1 %v8686_v0  ;;  %v11708_v26 = vpack.c.bf16 %v4765_v51, %v4757_v24  ;;  %v8702_v34 = vcombine.high %v612_v58, %v616_v18  ;;  %v10007_v50 = vld [vmem:[#allocation7 + $0x104] ss:$16 sps:$4 sm:$0xff]   ;;  %v8701_v61 = vcombine.low %v612_v58, %v616_v18 }
 0x25a   :  { %6406 = vmatprep.subr.bf16.mxu0 %v10001_v29  ;;  %v620_v22 = vld [vmem:[#allocation3 + $0xa58] sm:$0xff] }
 0x25b   :  { %4240 = vmatmul.mubr.bf16.gmra.mrb[76].mxu1 %v12510_v17  ;;  %v624_v11 = vld [vmem:[#allocation3 + $0xa78] sm:$0xff] }
 0x25c   :  { %8786 = vmatmul.mubr.msk.bf16.gmra.mrb[44].mxu0 %vm2683_vm0, %v12562_v19  ;;  %4303 = vmatpush1.bf16.msra.mxu1 %v8685_v48  ;;  %v10005_v17 = vld [vmem:[#allocation7 + $0x100] ss:$16 sps:$4 sm:$0xff]   ;;  %v8710_v63 = vcombine.high %v620_v22, %v624_v11  ;;  %v10010_v15 = vld [vmem:[#allocation7 + $0x124] ss:$16 sps:$4 sm:$0xff]   ;;  %v8709_v8 = vcombine.low %v620_v22, %v624_v11  ;;  %v12564_v48 = vld [vmem:[#allocation48_spill] sm:$0xff] }
 0x25d   :  { %6407 = vmatpush1.bf16.msra.mxu0 %v9999_v30  ;;  %4304 = vmatprep.subr.bf16.mxu1 %v8694_v5  ;;  %v628_v4 = vld [vmem:[#allocation3 + $0xa98] sm:$0xff]  ;;  %v12565_v11 = vld [vmem:[#allocation49_spill] sm:$0xff] }
 0x25e   :  { %6408 = vmatprep.subr.bf16.mxu0 %v10004_v56  ;;  %4023 = vmatprep.mubr.bf16.mxu0 %v12471_v25  ;;  %v632_v28 = vld [vmem:[#allocation3 + $0xab8] sm:$0xff] }
 0x25f   :  { %4249 = vmatprep.mubr.bf16.mxu1 %v11000_v3  ;;  %v12563_v47 = vld [vmem:[#allocation47_spill] sm:$0xff]  ;;  %v8718_v44 = vcombine.high %v628_v4, %v632_v28  ;;  %v8717_v29 = vcombine.low %v628_v4, %v632_v28 }
 0x260   :  { %4305 = vmatpush1.bf16.msra.mxu1 %v8693_v31  ;;  %v10008_v3 = vld [vmem:[#allocation7 + $0x120] ss:$16 sps:$4 sm:$0xff]   ;;  %v10013_v0 = vld [vmem:[#allocation7 + $0x144] ss:$16 sps:$4 sm:$0xff]  }
 0x261   :  { %6409 = vmatpush1.bf16.msra.mxu0 %v10002_v1  ;;  %4306 = vmatprep.subr.bf16.mxu1 %v8702_v34  ;;  %v636_v21 = vld [vmem:[#allocation3 + $0xad8] sm:$0xff] }
 0x262   :  { %6410 = vmatprep.subr.bf16.mxu0 %v10007_v50  ;;  %v640_v32 = vld [vmem:[#allocation3 + $0xaf8] sm:$0xff] }
 0x263   :  { %4250 = vmatmul.mubr.bf16.gmra.mrb[80].mxu1 %v12511_v60  ;;  %v10011_v60 = vld [vmem:[#allocation7 + $0x140] ss:$16 sps:$4 sm:$0xff]   ;;  %v8726_v57 = vcombine.high %v636_v21, %v640_v32  ;;  %v10016_v16 = vld [vmem:[#allocation7 + $0x164] ss:$16 sps:$4 sm:$0xff]   ;;  %v8725_v30 = vcombine.low %v636_v21, %v640_v32 }
 0x264   :  { %8787 = vmatmul.mubr.msk.bf16.gmra.mrb[48].mxu0 %vm2683_vm0, %v12563_v47  ;;  %4307 = vmatpush1.bf16.msra.mxu1 %v8701_v61  ;;  %v644_v24 = vld [vmem:[#allocation3 + $0xb18] sm:$0xff] }
 0x265   :  { %6411 = vmatpush1.bf16.msra.mxu0 %v10005_v17  ;;  %4308 = vmatprep.subr.bf16.mxu1 %v8710_v63  ;;  %v648_v51 = vld [vmem:[#allocation3 + $0xb38] sm:$0xff] }
 0x266   :  { %6412 = vmatprep.subr.bf16.mxu0 %v10010_v15  ;;  %4033 = vmatprep.mubr.bf16.mxu0 %v12471_v25  ;;  %v8734_v5 = vcombine.high %v644_v24, %v648_v51  ;;  %v10019_v56 = vld [vmem:[#allocation7 + $0x184] ss:$16 sps:$4 sm:$0xff]   ;;  %v8733_v31 = vcombine.low %v644_v24, %v648_v51  ;;  %v10032_v24 = vld [vmem:[#allocation7 + $0x220] ss:$16 sps:$4 sm:$0xff]  }
 0x267   :  { %4259 = vmatprep.mubr.bf16.mxu1 %v11039_v40  ;;  %v10014_v40 = vld [vmem:[#allocation7 + $0x160] ss:$16 sps:$4 sm:$0xff]   ;;  %v10022_v34 = vld [vmem:[#allocation7 + $0x1a4] ss:$16 sps:$4 sm:$0xff]  }
 0x268   :  { %4309 = vmatpush1.bf16.msra.mxu1 %v8709_v8  ;;  %v652_v58 = vld [vmem:[#allocation3 + $0xb58] sm:$0xff] }
 0x269   :  { %6413 = vmatpush1.bf16.msra.mxu0 %v10008_v3  ;;  %4310 = vmatprep.subr.bf16.mxu1 %v8718_v44  ;;  %v656_v18 = vld [vmem:[#allocation3 + $0xb78] sm:$0xff] }
 0x26a   :  { %6414 = vmatprep.subr.bf16.mxu0 %v10013_v0  ;;  %v8742_v1 = vcombine.high %v652_v58, %v656_v18  ;;  %v660_v50 = vld [vmem:[#allocation3 + $0xb98] sm:$0xff]  ;;  %v8741_v61 = vcombine.low %v652_v58, %v656_v18 }
 0x26b   :  { %4260 = vmatmul.mubr.bf16.gmra.mrb[84].mxu1 %v12512_v41  ;;  %v10017_v41 = vld [vmem:[#allocation7 + $0x180] ss:$16 sps:$4 sm:$0xff]   ;;  %v10025_v63 = vld [vmem:[#allocation7 + $0x1c4] ss:$16 sps:$4 sm:$0xff]  }
 0x26c   :  { %8788 = vmatmul.mubr.msk.bf16.gmra.mrb[52].mxu0 %vm2683_vm0, %v12564_v48  ;;  %4311 = vmatpush1.bf16.msra.mxu1 %v8717_v29  ;;  %v664_v22 = vld [vmem:[#allocation3 + $0xbb8] sm:$0xff] }
 0x26d   :  { %6415 = vmatpush1.bf16.msra.mxu0 %v10011_v60  ;;  %4312 = vmatprep.subr.bf16.mxu1 %v8726_v57  ;;  %v8750_v17 = vcombine.high %v660_v50, %v664_v22  ;;  %v668_v15 = vld [vmem:[#allocation3 + $0xbd8] sm:$0xff]  ;;  %v8749_v28 = vcombine.low %v660_v50, %v664_v22 }
 0x26e   :  { %6416 = vmatprep.subr.bf16.mxu0 %v10016_v16  ;;  %4043 = vmatprep.mubr.bf16.mxu0 %v12471_v25  ;;  %v672_v4 = vld [vmem:[#allocation3 + $0xbf8] sm:$0xff]  ;;  %v10079_v16 = vld [vmem:[#allocation7 + $0xc] ss:$16 sps:$4 sm:$0xff]  }
 0x26f   :  { %4269 = vmatprep.mubr.bf16.mxu1 %v11078_v20  ;;  %v10020_v20 = vld [vmem:[#allocation7 + $0x1a0] ss:$16 sps:$4 sm:$0xff]   ;;  %v8758_v8 = vcombine.high %v668_v15, %v672_v4  ;;  %v10028_v3 = vld [vmem:[#allocation7 + $0x1e4] ss:$16 sps:$4 sm:$0xff]   ;;  %v8757_v21 = vcombine.low %v668_v15, %v672_v4 }
 0x270   :  { %4313 = vmatpush1.bf16.msra.mxu1 %v8725_v30  ;;  %v676_v44 = vld [vmem:[#allocation3 + $0xc18] sm:$0xff] }
 0x271   :  { %6417 = vmatpush1.bf16.msra.mxu0 %v10014_v40  ;;  %4314 = vmatprep.subr.bf16.mxu1 %v8734_v5  ;;  %v680_v0 = vld [vmem:[#allocation3 + $0xc38] sm:$0xff]  ;;  %v697_v5 = vsub.s32 3, %v11553_v12 }
 0x272   :  { %6418 = vmatprep.subr.bf16.mxu0 %v10019_v56  ;;  %v8766_v32 = vcombine.high %v676_v44, %v680_v0  ;;  %v10031_v29 = vld [vmem:[#allocation7 + $0x204] ss:$16 sps:$4 sm:$0xff]   ;;  %v8765_v60 = vcombine.low %v676_v44, %v680_v0  ;;  %v10035_v51 = vld [vmem:[#allocation7 + $0x240] ss:$16 sps:$4 sm:$0xff]  }
 0x273   :  { %4270 = vmatmul.mubr.bf16.gmra.mrb[88].mxu1 %v12513_v53  ;;  %v10023_v53 = vld [vmem:[#allocation7 + $0x1c0] ss:$16 sps:$4 sm:$0xff]   ;;  %v10034_v57 = vld [vmem:[#allocation7 + $0x224] ss:$16 sps:$4 sm:$0xff]  }
 0x274   :  { %8789 = vmatmul.mubr.msk.bf16.gmra.mrb[56].mxu0 %vm2683_vm0, %v12565_v11  ;;  %4315 = vmatpush1.bf16.msra.mxu1 %v8733_v31  ;;  %v10040_v30 = vld [vmem:[#allocation7 + $0x264] ss:$16 sps:$4 sm:$0xff]   ;;  %v10041_v56 = vld [vmem:[#allocation7 + $0x280] ss:$16 sps:$4 sm:$0xff]  }
 0x275   :  { %6419 = vmatpush1.bf16.msra.mxu0 %v10017_v41  ;;  %4316 = vmatprep.subr.bf16.mxu1 %v8742_v1  ;;  %v10043_v40 = vld [vmem:[#allocation7 + $0x284] ss:$16 sps:$4 sm:$0xff]   ;;  %v10044_v18 = vld [vmem:[#allocation7 + $0x2a0] ss:$16 sps:$4 sm:$0xff]  }
 0x276   :  { %6420 = vmatprep.subr.bf16.mxu0 %v10022_v34  ;;  %4053 = vmatprep.mubr.bf16.mxu0 %v12471_v25  ;;  %v10046_v58 = vld [vmem:[#allocation7 + $0x2a4] ss:$16 sps:$4 sm:$0xff]   ;;  %v10050_v0 = vld [vmem:[#allocation7 + $0x2e0] ss:$16 sps:$4 sm:$0xff]  }
 0x277   :  { %4279 = vmatprep.mubr.bf16.mxu1 %v11114_v2  ;;  %v10026_v2 = vld [vmem:[#allocation7 + $0x1e0] ss:$16 sps:$4 sm:$0xff]  }
 0x278   :  { %4317 = vmatpush1.bf16.msra.mxu1 %v8741_v61  ;;  %v12568_v44 = vld [vmem:[#allocation25_spill] sm:$0xff] }
 0x279   :  { %6421 = vmatpush1.bf16.msra.mxu0 %v10020_v20  ;;  %4318 = vmatprep.subr.bf16.mxu1 %v8750_v17  ;;  %v10047_v20 = vld [vmem:[#allocation7 + $0x2c0] ss:$16 sps:$4 sm:$0xff]  }
 0x27a   :  { %6422 = vmatprep.subr.bf16.mxu0 %v10025_v63  ;;  %v10052_v63 = vld [vmem:[#allocation7 + $0x2e4] ss:$16 sps:$4 sm:$0xff]  }
 0x27b   :  { %4280 = vmatmul.mubr.bf16.gmra.mrb[92].mxu1 %v11133_v27  ;;  %v10029_v27 = vld [vmem:[#allocation7 + $0x200] ss:$16 sps:$4 sm:$0xff]  }
 0x27c   :  { %8790 = vmatmul.mubr.msk.bf16.gmra.mrb[60].mxu0 %vm2683_vm0, %v11398_v6  ;;  %4319 = vmatpush1.bf16.msra.mxu1 %v8749_v28  ;;  %v12566_v28 = vld [vmem:[#allocation29_spill] sm:$0xff] }
 0x27d   :  { %6423 = vmatpush1.bf16.msra.mxu0 %v10023_v53  ;;  %6426 = vmatprep.mubr.bf16.mxu0 %v11601_v54  ;;  %v12567_v53 = vld [vmem:[#allocation35_spill] sm:$0xff] }
 0x27e   :  { %4320 = vmatprep.subr.bf16.mxu1 %v8758_v8  ;;  %6424 = vmatprep.subr.bf16.mxu0 %v10028_v3 }
 0x27f   :  { %4322 = vmatprep.mubr.bf16.mxu1 %v11135_v38  ;;  %v10037_v38 = vld [vmem:[#allocation7 + $0x244] ss:$16 sps:$4 sm:$0xff]  }
 0x280   :  { %4321 = vmatpush1.bf16.msra.mxu1 %v8757_v21 }
 0x281   :  { %6425 = vmatpush1.bf16.msra.mxu0 %v10026_v2  ;;  %4403 = vmatprep.subr.bf16.mxu1 %v8766_v32 }
 0x282   :  { %6507 = vmatprep.subr.bf16.mxu0 %v10031_v29  ;;  %v10055_v29 = vld [vmem:[#allocation7 + $0x304] ss:$16 sps:$4 sm:$0xff]  }
 0x283   :  { %4323 = vmatmul.mubr.bf16.vlgmr.msra.gmra.mrb[64].mxu1 %v11157_v7  ;;  %v10038_v7 = vld [vmem:[#allocation7 + $0x260] ss:$16 sps:$4 sm:$0xff]  }
 0x284   :  { %6427 = vmatmul.mubr.bf16.vlgmr.msra.gmra.mrb[64].mxu0 %v11597_v52  ;;  %4404 = vmatpush1.bf16.msra.mxu1 %v8765_v60 }
 0x285   :  { %6436 = vmatprep.mubr.bf16.mxu0 %v11617_v35  ;;  %6508 = vmatpush1.bf16.msra.mxu0 %v10029_v27 }
 0x286   :  { %6509 = vmatprep.subr.bf16.mxu0 %v10034_v57  ;;  %4332 = vmatprep.mubr.bf16.mxu1 %v11159_v10  ;;  %v693_v10 = vsub.s32 2, %v11553_v12 }
 0x287   :  { %6846 = vmatprep.subr.bf16.mxu1 %v10079_v16 }
 0x289   :  { %6510 = vmatpush1.bf16.msra.mxu0 %v10032_v24 }
 0x28a   :  { %6511 = vmatprep.subr.bf16.mxu0 %v10037_v38 }
 0x28b   :  { %4333 = vmatmul.mubr.bf16.gmra.mrb[68].mxu1 %v11179_v39  ;;  %v11749_v39 = vrot.slane %v11562_v23, %v693_v10 }
 0x28c   :  { %6437 = vmatmul.mubr.bf16.gmra.mrb[68].mxu0 %v11613_v36  ;;  %4342 = vmatprep.mubr.bf16.mxu1 %v11181_v43  ;;  %v11755_v43 = vrot.slane %v11562_v23, %v697_v5 }
 0x28d   :  { %6446 = vmatprep.mubr.bf16.mxu0 %v11633_v49  ;;  %6512 = vmatpush1.bf16.msra.mxu0 %v10035_v51 }
 0x28e   :  { %6513 = vmatprep.subr.bf16.mxu0 %v10040_v30 }
 0x291   :  { %6514 = vmatpush1.bf16.msra.mxu0 %v10038_v7  ;;  %v10053_v7 = vld [vmem:[#allocation7 + $0x300] ss:$16 sps:$4 sm:$0xff]  }
 0x292   :  { %6515 = vmatprep.subr.bf16.mxu0 %v10043_v40 }
 0x293   :  { %4343 = vmatmul.mubr.bf16.gmra.mrb[72].mxu1 %v11199_v9  ;;  %v10049_v9 = vld [vmem:[#allocation7 + $0x2c4] ss:$16 sps:$4 sm:$0xff]  }
 0x294   :  { %6447 = vmatmul.mubr.bf16.gmra.mrb[72].mxu0 %v11629_v62  ;;  %4352 = vmatprep.mubr.bf16.mxu1 %v11201_v14 }
 0x295   :  { %6456 = vmatprep.mubr.bf16.mxu0 %v11649_v46  ;;  %6516 = vmatpush1.bf16.msra.mxu0 %v10041_v56 }
 0x296   :  { %v3533_v31 = vpop.f32.mrb[32].mxu1  ;;  %6517 = vmatprep.subr.bf16.mxu0 %v10046_v58  ;;  %v10058_v58 = vld [vmem:[#allocation7 + $0x324] ss:$16 sps:$4 sm:$0xff]  }
 0x297   :  { %v9199_v41 = vadd.f32 %v3533_v31, %v11749_v39  ;;  %v3535_v1 = vpop.f32.mrb[33].mxu1  ;;  %v12569_v31 = vld [vmem:[#allocation36_spill] sm:$0xff] }
 0x298   :  { %v9200_v34 = vadd.f32 %v3535_v1, %v11755_v43  ;;  %v3537_v50 = vpop.f32.mrb[34].mxu1  ;;  %v12571_v1 = vld [vmem:[#allocation37_spill] sm:$0xff] }
 0x299   :  { %v4518_v22 = vmul.f32 0.2, %v9199_v41  ;;  %v9201_v61 = vadd.f32 %v3537_v50, %v11749_v39  ;;  %6518 = vmatpush1.bf16.msra.mxu0 %v10044_v18  ;;  %v3539_v23 = vpop.f32.mrb[35].mxu1 }
 0x29a   :  { %v4519_v14 = vmul.f32 0.2, %v9200_v34  ;;  %v9202_v17 = vadd.f32 %v3539_v23, %v11755_v43  ;;  %6519 = vmatprep.subr.bf16.mxu0 %v10049_v9 }
 0x29b   :  { %v4526_v15 = vmul.f32 0.2, %v9201_v61  ;;  %4353 = vmatmul.mubr.bf16.gmra.mrb[76].mxu1 %v11219_v42  ;;  %v4646_v8 = vmax.f32 %v9199_v41, %v4518_v22  ;;  %v12570_v41 = vld [vmem:[#allocation32_spill] sm:$0xff]  ;;  %v10056_v22 = vld [vmem:[#allocation7 + $0x320] ss:$16 sps:$4 sm:$0xff]  }
 0x29c   :  { %v4527_v4 = vmul.f32 0.2, %v9202_v17  ;;  %6457 = vmatmul.mubr.bf16.gmra.mrb[76].mxu0 %v12566_v28  ;;  %4362 = vmatprep.mubr.bf16.mxu1 %v12567_v53  ;;  %v4647_v21 = vmax.f32 %v9200_v34, %v4519_v14  ;;  %v10061_v14 = vld [vmem:[#allocation7 + $0x344] ss:$16 sps:$4 sm:$0xff]  }
 0x29d   :  { %v4654_v3 = vmax.f32 %v9201_v61, %v4526_v15  ;;  %6466 = vmatprep.mubr.bf16.mxu0 %v12568_v44  ;;  %6520 = vmatpush1.bf16.msra.mxu0 %v10047_v20 }
 0x29e   :  { %v4655_v2 = vmax.f32 %v9202_v17, %v4527_v4  ;;  %v3543_v32 = vpop.f32.mrb[36].mxu1  ;;  %6521 = vmatprep.subr.bf16.mxu0 %v10052_v63 }
 0x29f   :  { %v11767_v60 = vpack.c.bf16 %v4654_v3, %v4646_v8  ;;  %v9203_v42 = vadd.f32 %v3543_v32, %v11749_v39  ;;  %v3545_v27 = vpop.f32.mrb[37].mxu1 }
 0x2a0   :  { %v9204_v57 = vadd.f32 %v3545_v27, %v11755_v43  ;;  %v3547_v16 = vpop.f32.mrb[38].mxu1  ;;  %v11771_v24 = vpack.c.bf16 %v4655_v2, %v4647_v21  ;;  %v10059_v2 = vld [vmem:[#allocation7 + $0x340] ss:$16 sps:$4 sm:$0xff]  }
 0x2a1   :  { %v4534_v38 = vmul.f32 0.2, %v9203_v42  ;;  %v9205_v51 = vadd.f32 %v3547_v16, %v11749_v39  ;;  %6522 = vmatpush1.bf16.msra.mxu0 %v10050_v0  ;;  %v3549_v30 = vpop.f32.mrb[39].mxu1 }
 0x2a2   :  { %v4535_v40 = vmul.f32 0.2, %v9204_v57  ;;  %v9206_v56 = vadd.f32 %v3549_v30, %v11755_v43  ;;  %6523 = vmatprep.subr.bf16.mxu0 %v10055_v29 }
 0x2a3   :  { %v4542_v18 = vmul.f32 0.2, %v9205_v51  ;;  %4363 = vmatmul.mubr.bf16.gmra.mrb[80].mxu1 %v12569_v31  ;;  %v4662_v34 = vmax.f32 %v9203_v42, %v4534_v38  ;;  %v10064_v42 = vld [vmem:[#allocation7 + $0x364] ss:$16 sps:$4 sm:$0xff]  }
 0x2a4   :  { %v4543_v9 = vmul.f32 0.2, %v9206_v56  ;;  %6467 = vmatmul.mubr.bf16.gmra.mrb[80].mxu0 %v12570_v41  ;;  %4372 = vmatprep.mubr.bf16.mxu1 %v12571_v1  ;;  %v4663_v61 = vmax.f32 %v9204_v57, %v4535_v40  ;;  %v12572_v57 = vld [vmem:[#allocation38_spill] sm:$0xff]  ;;  %v12573_v38 = vld [vmem:[#allocation39_spill] sm:$0xff] }
 0x2a5   :  { %v4670_v50 = vmax.f32 %v9205_v51, %v4542_v18  ;;  %6476 = vmatprep.mubr.bf16.mxu0 %v11682_v37  ;;  %6524 = vmatpush1.bf16.msra.mxu0 %v10053_v7  ;;  %v10062_v7 = vld [vmem:[#allocation7 + $0x360] ss:$16 sps:$4 sm:$0xff]   ;;  %v10067_v18 = vld [vmem:[#allocation7 + $0x384] ss:$16 sps:$4 sm:$0xff]  }
 0x2a6   :  { %v4671_v23 = vmax.f32 %v9206_v56, %v4543_v9  ;;  %v3553_v20 = vpop.f32.mrb[40].mxu1  ;;  %6525 = vmatprep.subr.bf16.mxu0 %v10058_v58 }
 0x2a7   :  { %v9207_v17 = vadd.f32 %v3553_v20, %v11749_v39  ;;  %v3555_v63 = vpop.f32.mrb[41].mxu1  ;;  %v11780_v15 = vpack.c.bf16 %v4670_v50, %v4662_v34 }
 0x2a8   :  { %v9208_v4 = vadd.f32 %v3555_v63, %v11755_v43  ;;  %v3557_v53 = vpop.f32.mrb[42].mxu1  ;;  %v11783_v8 = vpack.c.bf16 %v4671_v23, %v4663_v61 }
 0x2a9   :  { %v4550_v3 = vmul.f32 0.2, %v9207_v17  ;;  %v9209_v0 = vadd.f32 %v3557_v53, %v11749_v39  ;;  %6526 = vmatpush1.bf16.msra.mxu0 %v10056_v22  ;;  %v3559_v21 = vpop.f32.mrb[43].mxu1 }
 0x2aa   :  { %v4551_v32 = vmul.f32 0.2, %v9208_v4  ;;  %v9210_v29 = vadd.f32 %v3559_v21, %v11755_v43  ;;  %6527 = vmatprep.subr.bf16.mxu0 %v10061_v14  ;;  %v10065_v14 = vld [vmem:[#allocation7 + $0x380] ss:$16 sps:$4 sm:$0xff]  }
 0x2ab   :  { %v4558_v27 = vmul.f32 0.2, %v9209_v0  ;;  %4373 = vmatmul.mubr.bf16.gmra.mrb[84].mxu1 %v12572_v57  ;;  %v4678_v51 = vmax.f32 %v9207_v17, %v4550_v3  ;;  %v12574_v3 = vld [vmem:[#allocation40_spill] sm:$0xff]  ;;  %v12575_v21 = vld [vmem:[#allocation41_spill] sm:$0xff] }
 0x2ac   :  { %v4559_v16 = vmul.f32 0.2, %v9210_v29  ;;  %6477 = vmatmul.mubr.bf16.gmra.mrb[84].mxu0 %v11680_v33  ;;  %4382 = vmatprep.mubr.bf16.mxu1 %v12573_v38  ;;  %v4679_v40 = vmax.f32 %v9208_v4, %v4551_v32  ;;  %v10070_v4 = vld [vmem:[#allocation7 + $0x3a4] ss:$16 sps:$4 sm:$0xff]  }
 0x2ad   :  { %v4686_v30 = vmax.f32 %v9209_v0, %v4558_v27  ;;  %6486 = vmatprep.mubr.bf16.mxu0 %v11699_v13  ;;  %6528 = vmatpush1.bf16.msra.mxu0 %v10059_v2 }
 0x2ae   :  { %v4687_v56 = vmax.f32 %v9210_v29, %v4559_v16  ;;  %v3563_v58 = vpop.f32.mrb[44].mxu1  ;;  %6529 = vmatprep.subr.bf16.mxu0 %v10064_v42  ;;  %v10068_v29 = vld [vmem:[#allocation7 + $0x3a0] ss:$16 sps:$4 sm:$0xff]   ;;  %v10073_v16 = vld [vmem:[#allocation7 + $0x3c4] ss:$16 sps:$4 sm:$0xff]  }
 0x2af   :  { %v9211_v31 = vadd.f32 %v3563_v58, %v11749_v39  ;;  %v3565_v9 = vpop.f32.mrb[45].mxu1  ;;  %v11792_v1 = vpack.c.bf16 %v4686_v30, %v4678_v51 }
 0x2b0   :  { %v9212_v34 = vadd.f32 %v3565_v9, %v11755_v43  ;;  %v3567_v50 = vpop.f32.mrb[46].mxu1  ;;  %v11795_v22 = vpack.c.bf16 %v4687_v56, %v4679_v40  ;;  %v10071_v9 = vld [vmem:[#allocation7 + $0x3c0] ss:$16 sps:$4 sm:$0xff]  }
 0x2b1   :  { %v4566_v61 = vmul.f32 0.2, %v9211_v31  ;;  %v9213_v23 = vadd.f32 %v3567_v50, %v11749_v39  ;;  %6530 = vmatpush1.bf16.msra.mxu0 %v10062_v7  ;;  %v3569_v20 = vpop.f32.mrb[47].mxu1 }
 0x2b2   :  { %v4567_v17 = vmul.f32 0.2, %v9212_v34  ;;  %v9214_v63 = vadd.f32 %v3569_v20, %v11755_v43  ;;  %6531 = vmatprep.subr.bf16.mxu0 %v10067_v18  ;;  %v12576_v20 = vld [vmem:[#allocation42_spill] sm:$0xff] }
 0x2b3   :  { %v4574_v53 = vmul.f32 0.2, %v9213_v23  ;;  %4383 = vmatmul.mubr.bf16.gmra.mrb[88].mxu1 %v12574_v3  ;;  %v4694_v2 = vmax.f32 %v9211_v31, %v4566_v61  ;;  %v10076_v61 = vld [vmem:[#allocation7 + $0x3e4] ss:$16 sps:$4 sm:$0xff]  }
 0x2b4   :  { %v4575_v0 = vmul.f32 0.2, %v9214_v63  ;;  %6487 = vmatmul.mubr.bf16.gmra.mrb[88].mxu0 %v11697_v45  ;;  %4392 = vmatprep.mubr.bf16.mxu1 %v12575_v21  ;;  %v4695_v42 = vmax.f32 %v9212_v34, %v4567_v17  ;;  %v10103_v21 = vld [vmem:[#allocation7 + $0x404] ss:$16 sps:$4 sm:$0xff]  }
 0x2b5   :  { %v4702_v32 = vmax.f32 %v9213_v23, %v4574_v53  ;;  %6496 = vmatprep.mubr.bf16.mxu0 %v11708_v26  ;;  %6532 = vmatpush1.bf16.msra.mxu0 %v10065_v14 }
 0x2b6   :  { %v4703_v27 = vmax.f32 %v9214_v63, %v4575_v0  ;;  %v3573_v57 = vpop.f32.mrb[48].mxu1  ;;  %6533 = vmatprep.subr.bf16.mxu0 %v10070_v4  ;;  %v10074_v4 = vld [vmem:[#allocation7 + $0x3e0] ss:$16 sps:$4 sm:$0xff]  }
 0x2b7   :  { %v9215_v38 = vadd.f32 %v3573_v57, %v11749_v39  ;;  %v3575_v51 = vpop.f32.mrb[49].mxu1  ;;  %v11804_v30 = vpack.c.bf16 %v4702_v32, %v4694_v2  ;;  %v10077_v57 = vld [vmem:[#allocation7 + $0x8] ss:$16 sps:$4 sm:$0xff]  }
 0x2b8   :  { %v9216_v7 = vadd.f32 %v3575_v51, %v11755_v43  ;;  %v3577_v40 = vpop.f32.mrb[50].mxu1  ;;  %v11807_v56 = vpack.c.bf16 %v4703_v27, %v4695_v42 }
 0x2b9   :  { %v4582_v58 = vmul.f32 0.2, %v9215_v38  ;;  %v9217_v18 = vadd.f32 %v3577_v40, %v11749_v39  ;;  %6534 = vmatpush1.bf16.msra.mxu0 %v10068_v29  ;;  %v3579_v31 = vpop.f32.mrb[51].mxu1  ;;  %v10082_v40 = vld [vmem:[#allocation7 + $0x2c] ss:$16 sps:$4 sm:$0xff]  }
 0x2ba   :  { %v4583_v34 = vmul.f32 0.2, %v9216_v7  ;;  %v9218_v50 = vadd.f32 %v3579_v31, %v11755_v43  ;;  %6535 = vmatprep.subr.bf16.mxu0 %v10073_v16  ;;  %v10101_v31 = vld [vmem:[#allocation7 + $0x400] ss:$16 sps:$4 sm:$0xff]  }
 0x2bb   :  { %v4590_v23 = vmul.f32 0.2, %v9217_v18  ;;  %4393 = vmatmul.mubr.bf16.gmra.mrb[92].mxu1 %v12576_v20  ;;  %v4710_v17 = vmax.f32 %v9215_v38, %v4582_v58 }
 0x2bc   :  { %v4591_v14 = vmul.f32 0.2, %v9218_v50  ;;  %6497 = vmatmul.mubr.bf16.gmra.mrb[92].mxu0 %v11706_v59  ;;  %4435 = vmatprep.mubr.bf16.mxu1 %v12471_v25  ;;  %v4711_v53 = vmax.f32 %v9216_v7, %v4583_v34  ;;  %v12577_v34 = vld [vmem:[#allocation43_spill] sm:$0xff] }
 0x2bd   :  { %v4718_v63 = vmax.f32 %v9217_v18, %v4590_v23  ;;  %6536 = vmatpush1.bf16.msra.mxu0 %v10071_v9  ;;  %6539 = vmatprep.mubr.bf16.mxu0 %v11771_v24  ;;  %v10080_v23 = vld [vmem:[#allocation7 + $0x28] ss:$16 sps:$4 sm:$0xff]  }
 0x2be   :  { %v4719_v3 = vmax.f32 %v9218_v50, %v4591_v14  ;;  %v3583_v0 = vpop.f32.mrb[52].mxu1  ;;  %6537 = vmatprep.subr.bf16.mxu0 %v10076_v61  ;;  %v10109_v50 = vld [vmem:[#allocation7 + $0x424] ss:$16 sps:$4 sm:$0xff]  }
 0x2bf   :  { %v9219_v2 = vadd.f32 %v3583_v0, %v11749_v39  ;;  %v3585_v32 = vpop.f32.mrb[53].mxu1  ;;  %v11816_v29 = vpack.c.bf16 %v4718_v63, %v4710_v17  ;;  %v10085_v17 = vld [vmem:[#allocation7 + $0x4c] ss:$16 sps:$4 sm:$0xff]  }
 0x2c0   :  { %v9220_v42 = vadd.f32 %v3585_v32, %v11755_v43  ;;  %v3587_v27 = vpop.f32.mrb[54].mxu1  ;;  %v11819_v16 = vpack.c.bf16 %v4719_v3, %v4711_v53  ;;  %v10107_v3 = vld [vmem:[#allocation7 + $0x420] ss:$16 sps:$4 sm:$0xff]  }
 0x2c1   :  { %v4598_v38 = vmul.f32 0.2, %v9219_v2  ;;  %v9221_v51 = vadd.f32 %v3587_v27, %v11749_v39  ;;  %6538 = vmatpush1.bf16.msra.mxu0 %v10074_v4  ;;  %v3589_v7 = vpop.f32.mrb[55].mxu1  ;;  %v10115_v27 = vld [vmem:[#allocation7 + $0x444] ss:$16 sps:$4 sm:$0xff]  }
 0x2c2   :  { %v4599_v58 = vmul.f32 0.2, %v9220_v42  ;;  %v9222_v18 = vadd.f32 %v3589_v7, %v11755_v43  ;;  %6620 = vmatprep.subr.bf16.mxu0 %v10103_v21 }
 0x2c3   :  { %v4606_v9 = vmul.f32 0.2, %v9221_v51  ;;  %8791 = vmatmul.mubr.msk.bf16.vlgmr.msra.gmra.mrb[64].mxu1 %vm2683_vm0, %v12577_v34  ;;  %v4726_v20 = vmax.f32 %v9219_v2, %v4598_v38  ;;  %v10083_v38 = vld [vmem:[#allocation7 + $0x48] ss:$16 sps:$4 sm:$0xff]  }
 0x2c4   :  { %v4607_v61 = vmul.f32 0.2, %v9222_v18  ;;  %6540 = vmatmul.mubr.bf16.vlgmr.msra.gmra.mrb[64].mxu0 %v11767_v60  ;;  %6847 = vmatpush1.bf16.msra.mxu1 %v10077_v57  ;;  %v4727_v63 = vmax.f32 %v9220_v42, %v4599_v58  ;;  %v10088_v58 = vld [vmem:[#allocation7 + $0x6c] ss:$16 sps:$4 sm:$0xff]  }
 0x2c5   :  { %v4734_v14 = vmax.f32 %v9221_v51, %v4606_v9  ;;  %6549 = vmatprep.mubr.bf16.mxu0 %v11783_v8  ;;  %6848 = vmatprep.subr.bf16.mxu1 %v10082_v40  ;;  %v10113_v9 = vld [vmem:[#allocation7 + $0x440] ss:$16 sps:$4 sm:$0xff]  }
 0x2c6   :  { %v4735_v4 = vmax.f32 %v9222_v18, %v4607_v61  ;;  %v3593_v53 = vpop.f32.mrb[56].mxu1  ;;  %4445 = vmatprep.mubr.bf16.mxu1 %v12471_v25  ;;  %6621 = vmatpush1.bf16.msra.mxu0 %v10101_v31  ;;  %v10121_v61 = vld [vmem:[#allocation7 + $0x464] ss:$16 sps:$4 sm:$0xff]  }
 0x2c7   :  { %v9223_v0 = vadd.f32 %v3593_v53, %v11749_v39  ;;  %v3595_v21 = vpop.f32.mrb[57].mxu1  ;;  %6622 = vmatprep.subr.bf16.mxu0 %v10109_v50  ;;  %v11829_v32 = vpack.c.bf16 %v4734_v14, %v4726_v20  ;;  %v12578_v50 = vld [vmem:[#allocation44_spill] sm:$0xff] }
 0x2c8   :  { %v9224_v2 = vadd.f32 %v3595_v21, %v11755_v43  ;;  %v3597_v57 = vpop.f32.mrb[58].mxu1  ;;  %6849 = vmatpush1.bf16.msra.mxu1 %v10080_v23  ;;  %v11832_v51 = vpack.c.bf16 %v4735_v4, %v4727_v63  ;;  %v10086_v20 = vld [vmem:[#allocation7 + $0x68] ss:$16 sps:$4 sm:$0xff]   ;;  %v10119_v21 = vld [vmem:[#allocation7 + $0x460] ss:$16 sps:$4 sm:$0xff]  }
 0x2c9   :  { %v4614_v42 = vmul.f32 0.2, %v9223_v0  ;;  %v9225_v7 = vadd.f32 %v3597_v57, %v11749_v39  ;;  %v3599_v40 = vpop.f32.mrb[59].mxu1  ;;  %6850 = vmatprep.subr.bf16.mxu1 %v10085_v17  ;;  %v10091_v17 = vld [vmem:[#allocation7 + $0x8c] ss:$16 sps:$4 sm:$0xff]  }
 0x2ca   :  { %v4615_v18 = vmul.f32 0.2, %v9224_v2  ;;  %v9226_v31 = vadd.f32 %v3599_v40, %v11755_v43  ;;  %6623 = vmatpush1.bf16.msra.mxu0 %v10107_v3 }
 0x2cb   :  { %v4622_v34 = vmul.f32 0.2, %v9225_v7  ;;  %8792 = vmatmul.mubr.msk.bf16.gmra.mrb[68].mxu1 %vm2683_vm0, %v12578_v50  ;;  %6624 = vmatprep.subr.bf16.mxu0 %v10115_v27  ;;  %v4742_v14 = vmax.f32 %v9223_v0, %v4614_v42 }
 0x2cc   :  { %v4623_v23 = vmul.f32 0.2, %v9226_v31  ;;  %6550 = vmatmul.mubr.bf16.gmra.mrb[68].mxu0 %v11780_v15  ;;  %6851 = vmatpush1.bf16.msra.mxu1 %v10083_v38  ;;  %v4743_v4 = vmax.f32 %v9224_v2, %v4615_v18  ;;  %v10127_v38 = vld [vmem:[#allocation7 + $0x484] ss:$16 sps:$4 sm:$0xff]  }
 0x2cd   :  { %v4750_v63 = vmax.f32 %v9225_v7, %v4622_v34  ;;  %6559 = vmatprep.mubr.bf16.mxu0 %v11795_v22  ;;  %6852 = vmatprep.subr.bf16.mxu1 %v10088_v58  ;;  %v10089_v7 = vld [vmem:[#allocation7 + $0x88] ss:$16 sps:$4 sm:$0xff]  }
 0x2ce   :  { %v4751_v53 = vmax.f32 %v9226_v31, %v4623_v23  ;;  %v3603_v3 = vpop.f32.mrb[60].mxu1  ;;  %4455 = vmatprep.mubr.bf16.mxu1 %v12471_v25  ;;  %6625 = vmatpush1.bf16.msra.mxu0 %v10113_v9  ;;  %v10094_v9 = vld [vmem:[#allocation7 + $0xac] ss:$16 sps:$4 sm:$0xff]  }
 0x2cf   :  { %v9227_v27 = vadd.f32 %v3603_v3, %v11749_v39  ;;  %v3605_v57 = vpop.f32.mrb[61].mxu1  ;;  %6626 = vmatprep.subr.bf16.mxu0 %v10121_v61  ;;  %v11842_v40 = vpack.c.bf16 %v4750_v63, %v4742_v14  ;;  %v10125_v61 = vld [vmem:[#allocation7 + $0x480] ss:$16 sps:$4 sm:$0xff]   ;;  %v10092_v63 = vld [vmem:[#allocation7 + $0xa8] ss:$16 sps:$4 sm:$0xff]  }
 0x2d0   :  { %v9228_v0 = vadd.f32 %v3605_v57, %v11755_v43  ;;  %v3607_v42 = vpop.f32.mrb[62].mxu1  ;;  %6853 = vmatpush1.bf16.msra.mxu1 %v10086_v20  ;;  %v11845_v58 = vpack.c.bf16 %v4751_v53, %v4743_v4  ;;  %v10133_v20 = vld [vmem:[#allocation7 + $0x4a4] ss:$16 sps:$4 sm:$0xff]   ;;  %v10131_v3 = vld [vmem:[#allocation7 + $0x4a0] ss:$16 sps:$4 sm:$0xff]  }
 0x2d1   :  { %v4630_v2 = vmul.f32 0.2, %v9227_v27  ;;  %v9229_v18 = vadd.f32 %v3607_v42, %v11749_v39  ;;  %v3609_v31 = vpop.f32.mrb[63].mxu1  ;;  %6854 = vmatprep.subr.bf16.mxu1 %v10091_v17  ;;  %v10097_v17 = vld [vmem:[#allocation7 + $0xcc] ss:$16 sps:$4 sm:$0xff]  }
 0x2d2   :  { %v4631_v34 = vmul.f32 0.2, %v9228_v0  ;;  %v9230_v50 = vadd.f32 %v3609_v31, %v11755_v43  ;;  %6627 = vmatpush1.bf16.msra.mxu0 %v10119_v21  ;;  %v10139_v21 = vld [vmem:[#allocation7 + $0x4c4] ss:$16 sps:$4 sm:$0xff]   ;;  %v10095_v57 = vld [vmem:[#allocation7 + $0xc8] ss:$16 sps:$4 sm:$0xff]  }
 0x2d3   :  { %v4638_v23 = vmul.f32 0.2, %v9229_v18  ;;  %8793 = vmatmul.mubr.msk.bf16.gmra.mrb[72].mxu1 %vm2683_vm0, %v12561_v55  ;;  %6628 = vmatprep.subr.bf16.mxu0 %v10127_v38  ;;  %v4758_v39 = vmax.f32 %v9227_v27, %v4630_v2  ;;  %v10100_v27 = vld [vmem:[#allocation7 + $0xec] ss:$16 sps:$4 sm:$0xff]   ;;  %v10137_v42 = vld [vmem:[#allocation7 + $0x4c0] ss:$16 sps:$4 sm:$0xff]  }
 0x2d4   :  { %v4639_v14 = vmul.f32 0.2, %v9230_v50  ;;  %6560 = vmatmul.mubr.bf16.gmra.mrb[72].mxu0 %v11792_v1  ;;  %6855 = vmatpush1.bf16.msra.mxu1 %v10089_v7  ;;  %v4759_v43 = vmax.f32 %v9228_v0, %v4631_v34  ;;  %v10145_v0 = vld [vmem:[#allocation7 + $0x4e4] ss:$16 sps:$4 sm:$0xff]   ;;  %v10098_v7 = vld [vmem:[#allocation7 + $0xe8] ss:$16 sps:$4 sm:$0xff]  }
 0x2d5   :  { %v4766_v4 = vmax.f32 %v9229_v18, %v4638_v23  ;;  %6569 = vmatprep.mubr.bf16.mxu0 %v11807_v56  ;;  %6856 = vmatprep.subr.bf16.mxu1 %v10094_v9  ;;  %v10106_v2 = vld [vmem:[#allocation7 + $0x10c] ss:$16 sps:$4 sm:$0xff]   ;;  %v10143_v18 = vld [vmem:[#allocation7 + $0x4e0] ss:$16 sps:$4 sm:$0xff]   ;;  %v10151_v31 = vld [vmem:[#allocation7 + $0x504] ss:$16 sps:$4 sm:$0xff]  }
 0x2d6   :  { %v4767_v53 = vmax.f32 %v9230_v50, %v4639_v14  ;;  %4465 = vmatprep.mubr.bf16.mxu1 %v12471_v25  ;;  %6629 = vmatpush1.bf16.msra.mxu0 %v10125_v61  ;;  %v10104_v9 = vld [vmem:[#allocation7 + $0x108] ss:$16 sps:$4 sm:$0xff]   ;;  %v10149_v34 = vld [vmem:[#allocation7 + $0x500] ss:$16 sps:$4 sm:$0xff]   ;;  %v10157_v50 = vld [vmem:[#allocation7 + $0x524] ss:$16 sps:$4 sm:$0xff]  }
 0x2d7   :  { %6630 = vmatprep.subr.bf16.mxu0 %v10133_v20  ;;  %v11854_v55 = vpack.c.bf16 %v4766_v4, %v4758_v39  ;;  %v10110_v61 = vld [vmem:[#allocation7 + $0x128] ss:$16 sps:$4 sm:$0xff]   ;;  %v10118_v23 = vld [vmem:[#allocation7 + $0x14c] ss:$16 sps:$4 sm:$0xff]   ;;  %v10155_v20 = vld [vmem:[#allocation7 + $0x520] ss:$16 sps:$4 sm:$0xff]  }
 0x2d8   :  { %6857 = vmatpush1.bf16.msra.mxu1 %v10092_v63  ;;  %v11856_v38 = vpack.c.bf16 %v4767_v53, %v4759_v43  ;;  %v10163_v14 = vld [vmem:[#allocation7 + $0x544] ss:$16 sps:$4 sm:$0xff]   ;;  %v10116_v63 = vld [vmem:[#allocation7 + $0x148] ss:$16 sps:$4 sm:$0xff]   ;;  %v10161_v39 = vld [vmem:[#allocation7 + $0x540] ss:$16 sps:$4 sm:$0xff]  }
 0x2d9   :  { %6858 = vmatprep.subr.bf16.mxu1 %v10097_v17  ;;  %v10169_v4 = vld [vmem:[#allocation7 + $0x564] ss:$16 sps:$4 sm:$0xff]   ;;  %v10122_v17 = vld [vmem:[#allocation7 + $0x168] ss:$16 sps:$4 sm:$0xff]   ;;  %v10130_v43 = vld [vmem:[#allocation7 + $0x18c] ss:$16 sps:$4 sm:$0xff]  }
 0x2da   :  { %6631 = vmatpush1.bf16.msra.mxu0 %v10131_v3  ;;  %v10167_v53 = vld [vmem:[#allocation7 + $0x560] ss:$16 sps:$4 sm:$0xff]   ;;  %v10175_v3 = vld [vmem:[#allocation7 + $0x584] ss:$16 sps:$4 sm:$0xff]  }
 0x2db   :  { %8794 = vmatmul.mubr.msk.bf16.gmra.mrb[76].mxu1 %vm2683_vm0, %v12562_v19  ;;  %6632 = vmatprep.subr.bf16.mxu0 %v10139_v21  ;;  %v10112_v19 = vld [vmem:[#allocation7 + $0x12c] ss:$16 sps:$4 sm:$0xff]   ;;  %v10128_v21 = vld [vmem:[#allocation7 + $0x188] ss:$16 sps:$4 sm:$0xff]  }
 0x2dc   :  { %6570 = vmatmul.mubr.bf16.gmra.mrb[76].mxu0 %v11804_v30  ;;  %6859 = vmatpush1.bf16.msra.mxu1 %v10095_v57  ;;  %v10173_v57 = vld [vmem:[#allocation7 + $0x580] ss:$16 sps:$4 sm:$0xff]  }
 0x2dd   :  { %6579 = vmatprep.mubr.bf16.mxu0 %v11819_v16  ;;  %6860 = vmatprep.subr.bf16.mxu1 %v10100_v27  ;;  %v10181_v27 = vld [vmem:[#allocation7 + $0x5a4] ss:$16 sps:$4 sm:$0xff]  }
 0x2de   :  { %4475 = vmatprep.mubr.bf16.mxu1 %v12471_v25  ;;  %6633 = vmatpush1.bf16.msra.mxu0 %v10137_v42  ;;  %v10134_v42 = vld [vmem:[#allocation7 + $0x1a8] ss:$16 sps:$4 sm:$0xff]  }
 0x2df   :  { %6634 = vmatprep.subr.bf16.mxu0 %v10145_v0  ;;  %v10142_v0 = vld [vmem:[#allocation7 + $0x1cc] ss:$16 sps:$4 sm:$0xff]  }
 0x2e0   :  { %6861 = vmatpush1.bf16.msra.mxu1 %v10098_v7  ;;  %v10179_v7 = vld [vmem:[#allocation7 + $0x5a0] ss:$16 sps:$4 sm:$0xff]  }
 0x2e1   :  { %6862 = vmatprep.subr.bf16.mxu1 %v10106_v2  ;;  %v10187_v2 = vld [vmem:[#allocation7 + $0x5c4] ss:$16 sps:$4 sm:$0xff]  }
 0x2e2   :  { %6635 = vmatpush1.bf16.msra.mxu0 %v10143_v18  ;;  %v10140_v18 = vld [vmem:[#allocation7 + $0x1c8] ss:$16 sps:$4 sm:$0xff]  }
 0x2e3   :  { %8795 = vmatmul.mubr.msk.bf16.gmra.mrb[80].mxu1 %vm2683_vm0, %v12563_v47  ;;  %6636 = vmatprep.subr.bf16.mxu0 %v10151_v31  ;;  %v10124_v47 = vld [vmem:[#allocation7 + $0x16c] ss:$16 sps:$4 sm:$0xff]   ;;  %v10185_v31 = vld [vmem:[#allocation7 + $0x5c0] ss:$16 sps:$4 sm:$0xff]  }
 0x2e4   :  { %6580 = vmatmul.mubr.bf16.gmra.mrb[80].mxu0 %v11816_v29  ;;  %6863 = vmatpush1.bf16.msra.mxu1 %v10104_v9  ;;  %v10193_v9 = vld [vmem:[#allocation7 + $0x5e4] ss:$16 sps:$4 sm:$0xff]  }
 0x2e5   :  { %6589 = vmatprep.mubr.bf16.mxu0 %v11832_v51  ;;  %6864 = vmatprep.subr.bf16.mxu1 %v10112_v19  ;;  %v10146_v19 = vld [vmem:[#allocation7 + $0x1e8] ss:$16 sps:$4 sm:$0xff]  }
 0x2e6   :  { %4485 = vmatprep.mubr.bf16.mxu1 %v12471_v25  ;;  %6637 = vmatpush1.bf16.msra.mxu0 %v10149_v34  ;;  %v10191_v34 = vld [vmem:[#allocation7 + $0x5e0] ss:$16 sps:$4 sm:$0xff]  }
 0x2e7   :  { %6638 = vmatprep.subr.bf16.mxu0 %v10157_v50  ;;  %v10247_v50 = vld [vmem:[#allocation7 + $0x604] ss:$16 sps:$4 sm:$0xff]  }
 0x2e8   :  { %6865 = vmatpush1.bf16.msra.mxu1 %v10110_v61  ;;  %v10152_v61 = vld [vmem:[#allocation7 + $0x208] ss:$16 sps:$4 sm:$0xff]  }
 0x2e9   :  { %6866 = vmatprep.subr.bf16.mxu1 %v10118_v23  ;;  %v10160_v23 = vld [vmem:[#allocation7 + $0x22c] ss:$16 sps:$4 sm:$0xff]  }
 0x2ea   :  { %6639 = vmatpush1.bf16.msra.mxu0 %v10155_v20  ;;  %v10164_v20 = vld [vmem:[#allocation7 + $0x248] ss:$16 sps:$4 sm:$0xff]  }
 0x2eb   :  { %8796 = vmatmul.mubr.msk.bf16.gmra.mrb[84].mxu1 %vm2683_vm0, %v12564_v48  ;;  %6640 = vmatprep.subr.bf16.mxu0 %v10163_v14  ;;  %v10136_v48 = vld [vmem:[#allocation7 + $0x1ac] ss:$16 sps:$4 sm:$0xff]  }
 0x2ec   :  { %6590 = vmatmul.mubr.bf16.gmra.mrb[84].mxu0 %v11829_v32  ;;  %6867 = vmatpush1.bf16.msra.mxu1 %v10116_v63  ;;  %v10172_v14 = vld [vmem:[#allocation7 + $0x26c] ss:$16 sps:$4 sm:$0xff]   ;;  %v10170_v63 = vld [vmem:[#allocation7 + $0x268] ss:$16 sps:$4 sm:$0xff]  }
 0x2ed   :  { %6599 = vmatprep.mubr.bf16.mxu0 %v11845_v58  ;;  %6868 = vmatprep.subr.bf16.mxu1 %v10124_v47  ;;  %v10178_v47 = vld [vmem:[#allocation7 + $0x28c] ss:$16 sps:$4 sm:$0xff]  }
 0x2ee   :  { %4495 = vmatprep.mubr.bf16.mxu1 %v12471_v25  ;;  %6641 = vmatpush1.bf16.msra.mxu0 %v10161_v39  ;;  %v705_v39 = vsub.s32 5, %v11553_v12 }
 0x2ef   :  { %6642 = vmatprep.subr.bf16.mxu0 %v10169_v4  ;;  %v10184_v4 = vld [vmem:[#allocation7 + $0x2ac] ss:$16 sps:$4 sm:$0xff]  }
 0x2f0   :  { %6869 = vmatpush1.bf16.msra.mxu1 %v10122_v17  ;;  %v10182_v17 = vld [vmem:[#allocation7 + $0x2a8] ss:$16 sps:$4 sm:$0xff]  }
 0x2f1   :  { %6870 = vmatprep.subr.bf16.mxu1 %v10130_v43 }
 0x2f2   :  { %6643 = vmatpush1.bf16.msra.mxu0 %v10167_v53  ;;  %v10190_v53 = vld [vmem:[#allocation7 + $0x2cc] ss:$16 sps:$4 sm:$0xff]  }
 0x2f3   :  { %8797 = vmatmul.mubr.msk.bf16.gmra.mrb[88].mxu1 %vm2683_vm0, %v12565_v11  ;;  %6644 = vmatprep.subr.bf16.mxu0 %v10175_v3  ;;  %v10148_v11 = vld [vmem:[#allocation7 + $0x1ec] ss:$16 sps:$4 sm:$0xff]  }
 0x2f4   :  { %6600 = vmatmul.mubr.bf16.gmra.mrb[88].mxu0 %v11842_v40  ;;  %6871 = vmatpush1.bf16.msra.mxu1 %v10128_v21 }
 0x2f5   :  { %6609 = vmatprep.mubr.bf16.mxu0 %v11856_v38  ;;  %6872 = vmatprep.subr.bf16.mxu1 %v10136_v48 }
 0x2f6   :  { %4505 = vmatprep.mubr.bf16.mxu1 %v12471_v25  ;;  %6645 = vmatpush1.bf16.msra.mxu0 %v10173_v57  ;;  %v10154_v25 = vld [vmem:[#allocation7 + $0x20c] ss:$16 sps:$4 sm:$0xff]  }
 0x2f7   :  { %6646 = vmatprep.subr.bf16.mxu0 %v10181_v27  ;;  %v10196_v27 = vld [vmem:[#allocation7 + $0x2ec] ss:$16 sps:$4 sm:$0xff]  }
 0x2f8   :  { %6873 = vmatpush1.bf16.msra.mxu1 %v10134_v42 }
 0x2f9   :  { %6874 = vmatprep.subr.bf16.mxu1 %v10142_v0 }
 0x2fa   :  { %6647 = vmatpush1.bf16.msra.mxu0 %v10179_v7 }
 0x2fb   :  { %8798 = vmatmul.mubr.msk.bf16.gmra.mrb[92].mxu1 %vm2683_vm0, %v11398_v6  ;;  %6648 = vmatprep.subr.bf16.mxu0 %v10187_v2  ;;  %v10158_v6 = vld [vmem:[#allocation7 + $0x228] ss:$16 sps:$4 sm:$0xff]  }
 0x2fc   :  { %6610 = vmatmul.mubr.bf16.gmra.mrb[92].mxu0 %v11854_v55  ;;  %6875 = vmatpush1.bf16.msra.mxu1 %v10140_v18 }
 0x2fd   :  { %6878 = vmatprep.mubr.bf16.mxu1 %v11601_v54  ;;  %6876 = vmatprep.subr.bf16.mxu1 %v10148_v11  ;;  %v10166_v54 = vld [vmem:[#allocation7 + $0x24c] ss:$16 sps:$4 sm:$0xff]  }
 0x2fe   :  { %6649 = vmatpush1.bf16.msra.mxu0 %v10185_v31  ;;  %v10194_v31 = vld [vmem:[#allocation7 + $0x2e8] ss:$16 sps:$4 sm:$0xff]  }
 0x2ff   :  { %6650 = vmatprep.subr.bf16.mxu0 %v10193_v9 }
 0x300   :  { %6877 = vmatpush1.bf16.msra.mxu1 %v10146_v19  ;;  %v10199_v19 = vld [vmem:[#allocation7 + $0x30c] ss:$16 sps:$4 sm:$0xff]  }
 0x301   :  { %6959 = vmatprep.subr.bf16.mxu1 %v10154_v25 }
 0x302   :  { %6651 = vmatpush1.bf16.msra.mxu0 %v10191_v34 }
 0x303   :  { %6879 = vmatmul.mubr.bf16.vlgmr.msra.gmra.mrb[96].mxu1 %v11597_v52  ;;  %6733 = vmatprep.subr.bf16.mxu0 %v10247_v50  ;;  %v10176_v52 = vld [vmem:[#allocation7 + $0x288] ss:$16 sps:$4 sm:$0xff]  }
 0x304   :  { %6888 = vmatprep.mubr.bf16.mxu1 %v11617_v35  ;;  %6960 = vmatpush1.bf16.msra.mxu1 %v10152_v61  ;;  %v701_v35 = vsub.s32 4, %v11553_v12 }
 0x305   :  { %6961 = vmatprep.subr.bf16.mxu1 %v10160_v23 }
 0x308   :  { %6962 = vmatpush1.bf16.msra.mxu1 %v10158_v6 }
 0x309   :  { %6963 = vmatprep.subr.bf16.mxu1 %v10166_v54 }
 0x30b   :  { %6889 = vmatmul.mubr.bf16.gmra.mrb[100].mxu1 %v11613_v36  ;;  %v11890_v36 = vld [vmem:[#allocation5] sm:$0xff] }
 0x30c   :  { %6898 = vmatprep.mubr.bf16.mxu1 %v11633_v49  ;;  %6964 = vmatpush1.bf16.msra.mxu1 %v10164_v20  ;;  %v11893_v49 = vrot.slane %v11890_v36, %v701_v35  ;;  %v11896_v43 = vrot.slane %v11890_v36, %v705_v39 }
 0x30d   :  { %6965 = vmatprep.subr.bf16.mxu1 %v10172_v14 }
 0x310   :  { %6966 = vmatpush1.bf16.msra.mxu1 %v10170_v63 }
 0x311   :  { %6967 = vmatprep.subr.bf16.mxu1 %v10178_v47  ;;  %v10202_v47 = vld [vmem:[#allocation7 + $0x32c] ss:$16 sps:$4 sm:$0xff]  }
 0x313   :  { %6899 = vmatmul.mubr.bf16.gmra.mrb[104].mxu1 %v11629_v62  ;;  %v10188_v62 = vld [vmem:[#allocation7 + $0x2c8] ss:$16 sps:$4 sm:$0xff]  }
 0x314   :  { %6908 = vmatprep.mubr.bf16.mxu1 %v11649_v46  ;;  %6968 = vmatpush1.bf16.msra.mxu1 %v10176_v52  ;;  %v10245_v52 = vld [vmem:[#allocation7 + $0x600] ss:$16 sps:$4 sm:$0xff]  }
 0x315   :  { %6969 = vmatprep.subr.bf16.mxu1 %v10184_v4 }
 0x317   :  { %v3985_v3 = vpop.f32.mrb[32].mxu0 }
 0x318   :  { %v9231_v21 = vadd.f32 %v3985_v3, %v11893_v49  ;;  %v3987_v48 = vpop.f32.mrb[33].mxu0  ;;  %6970 = vmatpush1.bf16.msra.mxu1 %v10182_v17  ;;  %v10253_v17 = vld [vmem:[#allocation7 + $0x624] ss:$16 sps:$4 sm:$0xff]  }
 0x319   :  { %v9232_v46 = vadd.f32 %v3987_v48, %v11896_v43  ;;  %v3989_v57 = vpop.f32.mrb[34].mxu0  ;;  %6971 = vmatprep.subr.bf16.mxu1 %v10190_v53 }
 0x31a   :  { %v4520_v42 = vmul.f32 0.2, %v9231_v21  ;;  %v9233_v0 = vadd.f32 %v3989_v57, %v11893_v49  ;;  %v3991_v7 = vpop.f32.mrb[35].mxu0 }
 0x31b   :  { %v4521_v2 = vmul.f32 0.2, %v9232_v46  ;;  %v9234_v18 = vadd.f32 %v3991_v7, %v11896_v43  ;;  %6909 = vmatmul.mubr.bf16.gmra.mrb[108].mxu1 %v12566_v28  ;;  %v10197_v28 = vld [vmem:[#allocation7 + $0x308] ss:$16 sps:$4 sm:$0xff]  }
 0x31c   :  { %v4528_v11 = vmul.f32 0.2, %v9233_v0  ;;  %6918 = vmatprep.mubr.bf16.mxu1 %v12568_v44  ;;  %6972 = vmatpush1.bf16.msra.mxu1 %v10188_v62  ;;  %v4648_v25 = vmax.f32 %v9231_v21, %v4520_v42  ;;  %v10200_v62 = vld [vmem:[#allocation7 + $0x328] ss:$16 sps:$4 sm:$0xff]   ;;  %v10205_v42 = vld [vmem:[#allocation7 + $0x34c] ss:$16 sps:$4 sm:$0xff]  }
 0x31d   :  { %v4529_v9 = vmul.f32 0.2, %v9234_v18  ;;  %6973 = vmatprep.subr.bf16.mxu1 %v10196_v27  ;;  %v4649_v50 = vmax.f32 %v9232_v46, %v4521_v2  ;;  %v10251_v46 = vld [vmem:[#allocation7 + $0x620] ss:$16 sps:$4 sm:$0xff]  }
 0x31e   :  { %v4656_v34 = vmax.f32 %v9233_v0, %v4528_v11  ;;  %v10259_v0 = vld [vmem:[#allocation7 + $0x644] ss:$16 sps:$4 sm:$0xff]  }
 0x31f   :  { %v4657_v61 = vmax.f32 %v9234_v18, %v4529_v9  ;;  %v3995_v23 = vpop.f32.mrb[36].mxu0 }
 0x320   :  { %v11904_v6 = vpack.c.bf16 %v4656_v34, %v4648_v25  ;;  %v9235_v54 = vadd.f32 %v3995_v23, %v11893_v49  ;;  %v3997_v20 = vpop.f32.mrb[37].mxu0  ;;  %6974 = vmatpush1.bf16.msra.mxu1 %v10194_v31  ;;  %v10208_v34 = vld [vmem:[#allocation7 + $0x36c] ss:$16 sps:$4 sm:$0xff]  }
 0x321   :  { %v9236_v14 = vadd.f32 %v3997_v20, %v11896_v43  ;;  %v3999_v44 = vpop.f32.mrb[38].mxu0  ;;  %v11908_v63 = vpack.c.bf16 %v4657_v61, %v4649_v50  ;;  %6975 = vmatprep.subr.bf16.mxu1 %v10199_v19  ;;  %v10257_v50 = vld [vmem:[#allocation7 + $0x640] ss:$16 sps:$4 sm:$0xff]   ;;  %v10265_v20 = vld [vmem:[#allocation7 + $0x664] ss:$16 sps:$4 sm:$0xff]  }
 0x322   :  { %v4536_v35 = vmul.f32 0.2, %v9235_v54  ;;  %v9237_v39 = vadd.f32 %v3999_v44, %v11893_v49  ;;  %v4001_v4 = vpop.f32.mrb[39].mxu0 }
 0x323   :  { %v4537_v53 = vmul.f32 0.2, %v9236_v14  ;;  %v9238_v3 = vadd.f32 %v4001_v4, %v11896_v43  ;;  %6652 = vmatprep.mubr.bf16.mxu0 %v11908_v63  ;;  %6919 = vmatmul.mubr.bf16.gmra.mrb[112].mxu1 %v12570_v41 }
 0x324   :  { %v4544_v21 = vmul.f32 0.2, %v9237_v39  ;;  %6653 = vmatmul.mubr.bf16.vlgmr.msra.gmra.mrb[64].mxu0 %v11904_v6  ;;  %6928 = vmatprep.mubr.bf16.mxu1 %v11682_v37  ;;  %v4664_v57 = vmax.f32 %v9235_v54, %v4536_v35  ;;  %v10203_v37 = vld [vmem:[#allocation7 + $0x348] ss:$16 sps:$4 sm:$0xff]   ;;  %v10263_v35 = vld [vmem:[#allocation7 + $0x660] ss:$16 sps:$4 sm:$0xff]  }
 0x325   :  { %v4545_v48 = vmul.f32 0.2, %v9238_v3  ;;  %6976 = vmatpush1.bf16.msra.mxu1 %v10197_v28  ;;  %6734 = vmatpush1.bf16.msra.mxu0 %v10245_v52  ;;  %v4665_v7 = vmax.f32 %v9236_v14, %v4537_v53  ;;  %v10206_v52 = vld [vmem:[#allocation7 + $0x368] ss:$16 sps:$4 sm:$0xff]   ;;  %v10271_v53 = vld [vmem:[#allocation7 + $0x684] ss:$16 sps:$4 sm:$0xff]  }
 0x326   :  { %v4672_v27 = vmax.f32 %v9237_v39, %v4544_v21  ;;  %6977 = vmatprep.subr.bf16.mxu1 %v10202_v47  ;;  %6735 = vmatprep.subr.bf16.mxu0 %v10253_v17  ;;  %v10211_v17 = vld [vmem:[#allocation7 + $0x38c] ss:$16 sps:$4 sm:$0xff]  }
 0x327   :  { %v4673_v2 = vmax.f32 %v9238_v3, %v4545_v48  ;;  %v4005_v18 = vpop.f32.mrb[40].mxu0 }
 0x328   :  { %v9239_v41 = vadd.f32 %v4005_v18, %v11893_v49  ;;  %v4007_v11 = vpop.f32.mrb[41].mxu0  ;;  %v11917_v31 = vpack.c.bf16 %v4672_v27, %v4664_v57 }
 0x329   :  { %v9240_v9 = vadd.f32 %v4007_v11, %v11896_v43  ;;  %v4009_v19 = vpop.f32.mrb[42].mxu0  ;;  %6978 = vmatpush1.bf16.msra.mxu1 %v10200_v62  ;;  %v11920_v25 = vpack.c.bf16 %v4673_v2, %v4665_v7  ;;  %6736 = vmatpush1.bf16.msra.mxu0 %v10251_v46  ;;  %v10269_v7 = vld [vmem:[#allocation7 + $0x680] ss:$16 sps:$4 sm:$0xff]   ;;  %v10277_v11 = vld [vmem:[#allocation7 + $0x6a4] ss:$16 sps:$4 sm:$0xff]  }
 0x32a   :  { %v4552_v61 = vmul.f32 0.2, %v9239_v41  ;;  %v9241_v23 = vadd.f32 %v4009_v19, %v11893_v49  ;;  %v4011_v54 = vpop.f32.mrb[43].mxu0  ;;  %6979 = vmatprep.subr.bf16.mxu1 %v10205_v42  ;;  %6737 = vmatprep.subr.bf16.mxu0 %v10259_v0  ;;  %v10214_v0 = vld [vmem:[#allocation7 + $0x3ac] ss:$16 sps:$4 sm:$0xff]  }
 0x32b   :  { %v4553_v28 = vmul.f32 0.2, %v9240_v9  ;;  %v9242_v14 = vadd.f32 %v4011_v54, %v11896_v43  ;;  %6662 = vmatprep.mubr.bf16.mxu0 %v11920_v25  ;;  %6929 = vmatmul.mubr.bf16.gmra.mrb[116].mxu1 %v11680_v33 }
 0x32c   :  { %v4560_v44 = vmul.f32 0.2, %v9241_v23  ;;  %6663 = vmatmul.mubr.bf16.gmra.mrb[68].mxu0 %v11917_v31  ;;  %6938 = vmatprep.mubr.bf16.mxu1 %v11699_v13  ;;  %v4680_v39 = vmax.f32 %v9239_v41, %v4552_v61  ;;  %v10209_v13 = vld [vmem:[#allocation7 + $0x388] ss:$16 sps:$4 sm:$0xff]   ;;  %v10275_v61 = vld [vmem:[#allocation7 + $0x6a0] ss:$16 sps:$4 sm:$0xff]  }
 0x32d   :  { %v4561_v47 = vmul.f32 0.2, %v9242_v14  ;;  %6980 = vmatpush1.bf16.msra.mxu1 %v10203_v37  ;;  %6738 = vmatpush1.bf16.msra.mxu0 %v10257_v50  ;;  %v4681_v3 = vmax.f32 %v9240_v9, %v4553_v28  ;;  %v10212_v50 = vld [vmem:[#allocation7 + $0x3a8] ss:$16 sps:$4 sm:$0xff]   ;;  %v10283_v28 = vld [vmem:[#allocation7 + $0x6c4] ss:$16 sps:$4 sm:$0xff]  }
 0x32e   :  { %v4688_v4 = vmax.f32 %v9241_v23, %v4560_v44  ;;  %6981 = vmatprep.subr.bf16.mxu1 %v10208_v34  ;;  %6739 = vmatprep.subr.bf16.mxu0 %v10265_v20  ;;  %v10217_v20 = vld [vmem:[#allocation7 + $0x3cc] ss:$16 sps:$4 sm:$0xff]  }
 0x32f   :  { %v4689_v21 = vmax.f32 %v9242_v14, %v4561_v47  ;;  %v4015_v48 = vpop.f32.mrb[44].mxu0 }
 0x330   :  { %v9243_v33 = vadd.f32 %v4015_v48, %v11893_v49  ;;  %v4017_v62 = vpop.f32.mrb[45].mxu0  ;;  %v11929_v46 = vpack.c.bf16 %v4688_v4, %v4680_v39 }
 0x331   :  { %v9244_v57 = vadd.f32 %v4017_v62, %v11896_v43  ;;  %v4019_v27 = vpop.f32.mrb[46].mxu0  ;;  %6982 = vmatpush1.bf16.msra.mxu1 %v10206_v52  ;;  %v11932_v42 = vpack.c.bf16 %v4689_v21, %v4681_v3  ;;  %6740 = vmatpush1.bf16.msra.mxu0 %v10263_v35  ;;  %v10281_v3 = vld [vmem:[#allocation7 + $0x6c0] ss:$16 sps:$4 sm:$0xff]   ;;  %v10289_v62 = vld [vmem:[#allocation7 + $0x6e4] ss:$16 sps:$4 sm:$0xff]  }
 0x332   :  { %v4568_v2 = vmul.f32 0.2, %v9243_v33  ;;  %v9245_v18 = vadd.f32 %v4019_v27, %v11893_v49  ;;  %v4021_v41 = vpop.f32.mrb[47].mxu0  ;;  %6983 = vmatprep.subr.bf16.mxu1 %v10211_v17  ;;  %6741 = vmatprep.subr.bf16.mxu0 %v10271_v53  ;;  %v10220_v53 = vld [vmem:[#allocation7 + $0x3ec] ss:$16 sps:$4 sm:$0xff]  }
 0x333   :  { %v4569_v37 = vmul.f32 0.2, %v9244_v57  ;;  %v9246_v9 = vadd.f32 %v4021_v41, %v11896_v43  ;;  %6672 = vmatprep.mubr.bf16.mxu0 %v11932_v42  ;;  %6939 = vmatmul.mubr.bf16.gmra.mrb[120].mxu1 %v11697_v45 }
 0x334   :  { %v4576_v19 = vmul.f32 0.2, %v9245_v18  ;;  %6673 = vmatmul.mubr.bf16.gmra.mrb[72].mxu0 %v11929_v46  ;;  %6948 = vmatprep.mubr.bf16.mxu1 %v11708_v26  ;;  %v4696_v23 = vmax.f32 %v9243_v33, %v4568_v2  ;;  %v10215_v26 = vld [vmem:[#allocation7 + $0x3c8] ss:$16 sps:$4 sm:$0xff]   ;;  %v10287_v2 = vld [vmem:[#allocation7 + $0x6e0] ss:$16 sps:$4 sm:$0xff]  }
 0x335   :  { %v4577_v34 = vmul.f32 0.2, %v9246_v9  ;;  %6984 = vmatpush1.bf16.msra.mxu1 %v10209_v13  ;;  %6742 = vmatpush1.bf16.msra.mxu0 %v10269_v7  ;;  %v4697_v14 = vmax.f32 %v9244_v57, %v4569_v37  ;;  %v10218_v7 = vld [vmem:[#allocation7 + $0x3e8] ss:$16 sps:$4 sm:$0xff]   ;;  %v10295_v37 = vld [vmem:[#allocation7 + $0x704] ss:$16 sps:$4 sm:$0xff]  }
 0x336   :  { %v4704_v54 = vmax.f32 %v9245_v18, %v4576_v19  ;;  %6985 = vmatprep.subr.bf16.mxu1 %v10214_v0  ;;  %6743 = vmatprep.subr.bf16.mxu0 %v10277_v11  ;;  %v10223_v11 = vld [vmem:[#allocation7 + $0x40c] ss:$16 sps:$4 sm:$0xff]  }
 0x337   :  { %v4705_v44 = vmax.f32 %v9246_v9, %v4577_v34  ;;  %v4025_v47 = vpop.f32.mrb[48].mxu0 }
 0x338   :  { %v9247_v45 = vadd.f32 %v4025_v47, %v11893_v49  ;;  %v4027_v52 = vpop.f32.mrb[49].mxu0  ;;  %v11941_v35 = vpack.c.bf16 %v4704_v54, %v4696_v23 }
 0x339   :  { %v9248_v39 = vadd.f32 %v4027_v52, %v11896_v43  ;;  %v4029_v4 = vpop.f32.mrb[50].mxu0  ;;  %6986 = vmatpush1.bf16.msra.mxu1 %v10212_v50  ;;  %v11944_v17 = vpack.c.bf16 %v4705_v44, %v4697_v14  ;;  %6744 = vmatpush1.bf16.msra.mxu0 %v10275_v61 }
 0x33a   :  { %v4584_v21 = vmul.f32 0.2, %v9247_v45  ;;  %v9249_v48 = vadd.f32 %v4029_v4, %v11893_v49  ;;  %v4031_v33 = vpop.f32.mrb[51].mxu0  ;;  %6987 = vmatprep.subr.bf16.mxu1 %v10217_v20  ;;  %6745 = vmatprep.subr.bf16.mxu0 %v10283_v28  ;;  %v10221_v20 = vld [vmem:[#allocation7 + $0x408] ss:$16 sps:$4 sm:$0xff]  }
 0x33b   :  { %v4585_v13 = vmul.f32 0.2, %v9248_v39  ;;  %v9250_v57 = vadd.f32 %v4031_v33, %v11896_v43  ;;  %6682 = vmatprep.mubr.bf16.mxu0 %v11944_v17  ;;  %6949 = vmatmul.mubr.bf16.gmra.mrb[124].mxu1 %v11706_v59  ;;  %v10226_v28 = vld [vmem:[#allocation7 + $0x42c] ss:$16 sps:$4 sm:$0xff]  }
 0x33c   :  { %v4592_v27 = vmul.f32 0.2, %v9249_v48  ;;  %6683 = vmatmul.mubr.bf16.gmra.mrb[76].mxu0 %v11941_v35  ;;  %6991 = vmatprep.mubr.bf16.mxu1 %v11771_v24  ;;  %v4712_v18 = vmax.f32 %v9247_v45, %v4584_v21  ;;  %v10293_v45 = vld [vmem:[#allocation7 + $0x700] ss:$16 sps:$4 sm:$0xff]   ;;  %v10229_v33 = vld [vmem:[#allocation7 + $0x44c] ss:$16 sps:$4 sm:$0xff]  }
 0x33d   :  { %v4593_v0 = vmul.f32 0.2, %v9250_v57  ;;  %6988 = vmatpush1.bf16.msra.mxu1 %v10215_v26  ;;  %6746 = vmatpush1.bf16.msra.mxu0 %v10281_v3  ;;  %v4713_v9 = vmax.f32 %v9248_v39, %v4585_v13  ;;  %v10301_v39 = vld [vmem:[#allocation7 + $0x724] ss:$16 sps:$4 sm:$0xff]   ;;  %v10224_v3 = vld [vmem:[#allocation7 + $0x428] ss:$16 sps:$4 sm:$0xff]  }
 0x33e   :  { %v4720_v41 = vmax.f32 %v9249_v48, %v4592_v27  ;;  %6989 = vmatprep.subr.bf16.mxu1 %v10220_v53  ;;  %6747 = vmatprep.subr.bf16.mxu0 %v10289_v62  ;;  %v10299_v62 = vld [vmem:[#allocation7 + $0x720] ss:$16 sps:$4 sm:$0xff]  }
 0x33f   :  { %v4721_v19 = vmax.f32 %v9250_v57, %v4593_v0  ;;  %v4035_v34 = vpop.f32.mrb[52].mxu0  ;;  %v10307_v0 = vld [vmem:[#allocation7 + $0x744] ss:$16 sps:$4 sm:$0xff]  }
 0x340   :  { %v9251_v59 = vadd.f32 %v4035_v34, %v11893_v49  ;;  %v4037_v50 = vpop.f32.mrb[53].mxu0  ;;  %v11953_v61 = vpack.c.bf16 %v4720_v41, %v4712_v18 }
 0x341   :  { %v9252_v24 = vadd.f32 %v4037_v50, %v11896_v43  ;;  %v4039_v23 = vpop.f32.mrb[54].mxu0  ;;  %6990 = vmatpush1.bf16.msra.mxu1 %v10218_v7  ;;  %v11956_v54 = vpack.c.bf16 %v4721_v19, %v4713_v9  ;;  %6748 = vmatpush1.bf16.msra.mxu0 %v10287_v2 }
 0x342   :  { %v4600_v14 = vmul.f32 0.2, %v9251_v59  ;;  %v9253_v44 = vadd.f32 %v4039_v23, %v11893_v49  ;;  %v4041_v47 = vpop.f32.mrb[55].mxu0  ;;  %7072 = vmatprep.subr.bf16.mxu1 %v10223_v11  ;;  %6749 = vmatprep.subr.bf16.mxu0 %v10295_v37  ;;  %v10227_v11 = vld [vmem:[#allocation7 + $0x448] ss:$16 sps:$4 sm:$0xff]  }
 0x343   :  { %v4601_v52 = vmul.f32 0.2, %v9252_v24  ;;  %v9254_v26 = vadd.f32 %v4041_v47, %v11896_v43  ;;  %6692 = vmatprep.mubr.bf16.mxu0 %v11956_v54  ;;  %v10232_v37 = vld [vmem:[#allocation7 + $0x46c] ss:$16 sps:$4 sm:$0xff]   ;;  %v10313_v23 = vld [vmem:[#allocation7 + $0x764] ss:$16 sps:$4 sm:$0xff]  }
 0x344   :  { %v4608_v4 = vmul.f32 0.2, %v9253_v44  ;;  %6693 = vmatmul.mubr.bf16.gmra.mrb[80].mxu0 %v11953_v61  ;;  %6992 = vmatmul.mubr.bf16.vlgmr.msra.gmra.mrb[96].mxu1 %v11767_v60  ;;  %v4728_v21 = vmax.f32 %v9251_v59, %v4600_v14  ;;  %v10305_v59 = vld [vmem:[#allocation7 + $0x740] ss:$16 sps:$4 sm:$0xff]   ;;  %v10230_v14 = vld [vmem:[#allocation7 + $0x468] ss:$16 sps:$4 sm:$0xff]  }
 0x345   :  { %v4609_v53 = vmul.f32 0.2, %v9254_v26  ;;  %7001 = vmatprep.mubr.bf16.mxu1 %v11783_v8  ;;  %7073 = vmatpush1.bf16.msra.mxu1 %v10221_v20  ;;  %v4729_v13 = vmax.f32 %v9252_v24, %v4601_v52  ;;  %v10311_v52 = vld [vmem:[#allocation7 + $0x760] ss:$16 sps:$4 sm:$0xff]  }
 0x346   :  { %v4736_v48 = vmax.f32 %v9253_v44, %v4608_v4  ;;  %7074 = vmatprep.subr.bf16.mxu1 %v10226_v28  ;;  %6750 = vmatpush1.bf16.msra.mxu0 %v10293_v45  ;;  %v10235_v45 = vld [vmem:[#allocation7 + $0x48c] ss:$16 sps:$4 sm:$0xff]  }
 0x347   :  { %v4737_v57 = vmax.f32 %v9254_v26, %v4609_v53  ;;  %v4045_v27 = vpop.f32.mrb[56].mxu0  ;;  %6751 = vmatprep.subr.bf16.mxu0 %v10301_v39  ;;  %v10319_v53 = vld [vmem:[#allocation7 + $0x784] ss:$16 sps:$4 sm:$0xff]  }
 0x348   :  { %v9255_v7 = vadd.f32 %v4045_v27, %v11893_v49  ;;  %v4047_v2 = vpop.f32.mrb[57].mxu0  ;;  %v11965_v60 = vpack.c.bf16 %v4736_v48, %v4728_v21 }
 0x349   :  { %v9256_v8 = vadd.f32 %v4047_v2, %v11896_v43  ;;  %v4049_v18 = vpop.f32.mrb[58].mxu0  ;;  %7075 = vmatpush1.bf16.msra.mxu1 %v10224_v3  ;;  %v11968_v41 = vpack.c.bf16 %v4737_v57, %v4729_v13  ;;  %v10238_v13 = vld [vmem:[#allocation7 + $0x4ac] ss:$16 sps:$4 sm:$0xff]  }
 0x34a   :  { %v4616_v9 = vmul.f32 0.2, %v9255_v7  ;;  %v9257_v19 = vadd.f32 %v4049_v18, %v11893_v49  ;;  %v4051_v34 = vpop.f32.mrb[59].mxu0  ;;  %7076 = vmatprep.subr.bf16.mxu1 %v10229_v33  ;;  %6752 = vmatpush1.bf16.msra.mxu0 %v10299_v62  ;;  %v10233_v62 = vld [vmem:[#allocation7 + $0x488] ss:$16 sps:$4 sm:$0xff]  }
 0x34b   :  { %v4617_v50 = vmul.f32 0.2, %v9256_v8  ;;  %v9258_v24 = vadd.f32 %v4051_v34, %v11896_v43  ;;  %6702 = vmatprep.mubr.bf16.mxu0 %v11968_v41  ;;  %6753 = vmatprep.subr.bf16.mxu0 %v10307_v0  ;;  %v10325_v18 = vld [vmem:[#allocation7 + $0x7a4] ss:$16 sps:$4 sm:$0xff]   ;;  %v10241_v34 = vld [vmem:[#allocation7 + $0x4cc] ss:$16 sps:$4 sm:$0xff]  }
 0x34c   :  { %v4624_v20 = vmul.f32 0.2, %v9257_v19  ;;  %6703 = vmatmul.mubr.bf16.gmra.mrb[84].mxu0 %v11965_v60  ;;  %7002 = vmatmul.mubr.bf16.gmra.mrb[100].mxu1 %v11780_v15  ;;  %v4744_v44 = vmax.f32 %v9255_v7, %v4616_v9  ;;  %v10317_v7 = vld [vmem:[#allocation7 + $0x780] ss:$16 sps:$4 sm:$0xff]  }
 0x34d   :  { %v4625_v28 = vmul.f32 0.2, %v9258_v24  ;;  %7011 = vmatprep.mubr.bf16.mxu1 %v11795_v22  ;;  %7077 = vmatpush1.bf16.msra.mxu1 %v10227_v11  ;;  %v4745_v26 = vmax.f32 %v9256_v8, %v4617_v50 }
 0x34e   :  { %v4752_v47 = vmax.f32 %v9257_v19, %v4624_v20  ;;  %7078 = vmatprep.subr.bf16.mxu1 %v10232_v37  ;;  %6754 = vmatpush1.bf16.msra.mxu0 %v10305_v59 }
 0x34f   :  { %v4753_v39 = vmax.f32 %v9258_v24, %v4625_v28  ;;  %v4055_v4 = vpop.f32.mrb[60].mxu0  ;;  %6755 = vmatprep.subr.bf16.mxu0 %v10313_v23  ;;  %v10331_v24 = vld [vmem:[#allocation7 + $0x7c4] ss:$16 sps:$4 sm:$0xff]   ;;  %v10329_v28 = vld [vmem:[#allocation7 + $0x7c0] ss:$16 sps:$4 sm:$0xff]  }
 0x350   :  { %v9259_v3 = vadd.f32 %v4055_v4, %v11893_v49  ;;  %v4057_v21 = vpop.f32.mrb[61].mxu0  ;;  %v11977_v15 = vpack.c.bf16 %v4752_v47, %v4744_v44  ;;  %v10242_v44 = vld [vmem:[#allocation7 + $0x4e8] ss:$16 sps:$4 sm:$0xff]   ;;  %v10250_v47 = vld [vmem:[#allocation7 + $0x50c] ss:$16 sps:$4 sm:$0xff]  }
 0x351   :  { %v9260_v22 = vadd.f32 %v4057_v21, %v11896_v43  ;;  %v4059_v48 = vpop.f32.mrb[62].mxu0  ;;  %7079 = vmatpush1.bf16.msra.mxu1 %v10230_v14  ;;  %v11980_v33 = vpack.c.bf16 %v4753_v39, %v4745_v26  ;;  %v10337_v14 = vld [vmem:[#allocation7 + $0x7e4] ss:$16 sps:$4 sm:$0xff]   ;;  %v10256_v26 = vld [vmem:[#allocation7 + $0x52c] ss:$16 sps:$4 sm:$0xff]  }
 0x352   :  { %v4632_v57 = vmul.f32 0.2, %v9259_v3  ;;  %v9261_v27 = vadd.f32 %v4059_v48, %v11893_v49  ;;  %v4061_v0 = vpop.f32.mrb[63].mxu0  ;;  %7080 = vmatprep.subr.bf16.mxu1 %v10235_v45  ;;  %6756 = vmatpush1.bf16.msra.mxu0 %v10311_v52  ;;  %v10236_v49 = vld [vmem:[#allocation7 + $0x4a8] ss:$16 sps:$4 sm:$0xff]  }
 0x353   :  { %v4633_v2 = vmul.f32 0.2, %v9260_v22  ;;  %v9262_v8 = vadd.f32 %v4061_v0, %v11896_v43  ;;  %6712 = vmatprep.mubr.bf16.mxu0 %v11980_v33  ;;  %6757 = vmatprep.subr.bf16.mxu0 %v10319_v53  ;;  %v10323_v43 = vld [vmem:[#allocation7 + $0x7a0] ss:$16 sps:$4 sm:$0xff]   ;;  %v10248_v52 = vld [vmem:[#allocation7 + $0x508] ss:$16 sps:$4 sm:$0xff]  }
 0x354   :  { %v4640_v11 = vmul.f32 0.2, %v9261_v27  ;;  %6713 = vmatmul.mubr.bf16.gmra.mrb[88].mxu0 %v11977_v15  ;;  %7012 = vmatmul.mubr.bf16.gmra.mrb[104].mxu1 %v11792_v1  ;;  %v4760_v9 = vmax.f32 %v9259_v3, %v4632_v57  ;;  %v10239_v1 = vld [vmem:[#allocation7 + $0x4c8] ss:$16 sps:$4 sm:$0xff]   ;;  %v10335_v45 = vld [vmem:[#allocation7 + $0x7e0] ss:$16 sps:$4 sm:$0xff]  }
 0x355   :  { %v4641_v37 = vmul.f32 0.2, %v9262_v8  ;;  %7021 = vmatprep.mubr.bf16.mxu1 %v11807_v56  ;;  %7081 = vmatpush1.bf16.msra.mxu1 %v10233_v62  ;;  %v4761_v59 = vmax.f32 %v9260_v22, %v4633_v2  ;;  %v10244_v56 = vld [vmem:[#allocation7 + $0x4ec] ss:$16 sps:$4 sm:$0xff]   ;;  %v10260_v39 = vld [vmem:[#allocation7 + $0x548] ss:$16 sps:$4 sm:$0xff]  }
 0x356   :  { %v4768_v19 = vmax.f32 %v9261_v27, %v4640_v11  ;;  %7082 = vmatprep.subr.bf16.mxu1 %v10238_v13  ;;  %6758 = vmatpush1.bf16.msra.mxu0 %v10317_v7  ;;  %v10268_v4 = vld [vmem:[#allocation7 + $0x56c] ss:$16 sps:$4 sm:$0xff]   ;;  %v10266_v53 = vld [vmem:[#allocation7 + $0x568] ss:$16 sps:$4 sm:$0xff]  }
 0x357   :  { %v4769_v50 = vmax.f32 %v9262_v8, %v4641_v37  ;;  %6759 = vmatprep.subr.bf16.mxu0 %v10325_v18  ;;  %v10274_v3 = vld [vmem:[#allocation7 + $0x58c] ss:$16 sps:$4 sm:$0xff]   ;;  %v10278_v21 = vld [vmem:[#allocation7 + $0x5a8] ss:$16 sps:$4 sm:$0xff]  }
 0x358   :  { %v11988_v23 = vpack.c.bf16 %v4768_v19, %v4760_v9  ;;  %v10286_v22 = vld [vmem:[#allocation7 + $0x5cc] ss:$16 sps:$4 sm:$0xff]   ;;  %v10367_v48 = vld [vmem:[#allocation10 + $0x4] ss:$8 sps:$4 sm:$0xff]  }
 0x359   :  { %7083 = vmatpush1.bf16.msra.mxu1 %v10236_v49  ;;  %v11990_v20 = vpack.c.bf16 %v4769_v50, %v4761_v59  ;;  %v10290_v62 = vld [vmem:[#allocation7 + $0x5e8] ss:$16 sps:$4 sm:$0xff]   ;;  %v10298_v13 = vld [vmem:[#allocation7 + $0x60c] ss:$16 sps:$4 sm:$0xff]  }
 0x35a   :  { %7084 = vmatprep.subr.bf16.mxu1 %v10241_v34  ;;  %6760 = vmatpush1.bf16.msra.mxu0 %v10323_v43  ;;  %v10302_v57 = vld [vmem:[#allocation7 + $0x628] ss:$16 sps:$4 sm:$0xff]   ;;  %v10322_v7 = vld [vmem:[#allocation7 + $0x68c] ss:$16 sps:$4 sm:$0xff]  }
 0x35b   :  { %6722 = vmatprep.mubr.bf16.mxu0 %v11990_v20  ;;  %6761 = vmatprep.subr.bf16.mxu0 %v10331_v24  ;;  %v10308_v27 = vld [vmem:[#allocation7 + $0x648] ss:$16 sps:$4 sm:$0xff]   ;;  %v10328_v8 = vld [vmem:[#allocation7 + $0x6ac] ss:$16 sps:$4 sm:$0xff]  }
 0x35c   :  { %6723 = vmatmul.mubr.bf16.gmra.mrb[92].mxu0 %v11988_v23  ;;  %7022 = vmatmul.mubr.bf16.gmra.mrb[108].mxu1 %v11804_v30  ;;  %v10254_v30 = vld [vmem:[#allocation7 + $0x528] ss:$16 sps:$4 sm:$0xff]   ;;  %v10334_v37 = vld [vmem:[#allocation7 + $0x6cc] ss:$16 sps:$4 sm:$0xff]  }
 0x35d   :  { %7031 = vmatprep.mubr.bf16.mxu1 %v11819_v16  ;;  %7085 = vmatpush1.bf16.msra.mxu1 %v10239_v1  ;;  %v10262_v16 = vld [vmem:[#allocation7 + $0x54c] ss:$16 sps:$4 sm:$0xff]   ;;  %v10314_v0 = vld [vmem:[#allocation7 + $0x668] ss:$16 sps:$4 sm:$0xff]  }
 0x35e   :  { %7086 = vmatprep.subr.bf16.mxu1 %v10244_v56  ;;  %6762 = vmatpush1.bf16.msra.mxu0 %v10329_v28  ;;  %v10320_v2 = vld [vmem:[#allocation7 + $0x688] ss:$16 sps:$4 sm:$0xff]   ;;  %v10340_v24 = vld [vmem:[#allocation7 + $0x6ec] ss:$16 sps:$4 sm:$0xff]  }
 0x35f   :  { %6763 = vmatprep.subr.bf16.mxu0 %v10337_v14 }
 0x361   :  { %7087 = vmatpush1.bf16.msra.mxu1 %v10242_v44  ;;  %v10338_v44 = vld [vmem:[#allocation7 + $0x6e8] ss:$16 sps:$4 sm:$0xff]  }
 0x362   :  { %7088 = vmatprep.subr.bf16.mxu1 %v10250_v47  ;;  %6764 = vmatpush1.bf16.msra.mxu0 %v10335_v45 }
 0x363   :  { %7854 = vmatprep.subr.bf16.mxu0 %v10367_v48  ;;  %v10370_v48 = vld [vmem:[#allocation10 + $0x14] ss:$8 sps:$4 sm:$0xff]  }
 0x364   :  { %7032 = vmatmul.mubr.bf16.gmra.mrb[112].mxu1 %v11816_v29  ;;  %v10272_v29 = vld [vmem:[#allocation7 + $0x588] ss:$16 sps:$4 sm:$0xff]  }
 0x365   :  { %7041 = vmatprep.mubr.bf16.mxu1 %v11832_v51  ;;  %7089 = vmatpush1.bf16.msra.mxu1 %v10248_v52  ;;  %v10280_v51 = vld [vmem:[#allocation7 + $0x5ac] ss:$16 sps:$4 sm:$0xff]  }
 0x366   :  { %7090 = vmatprep.subr.bf16.mxu1 %v10256_v26  ;;  %v10343_v26 = vld [vmem:[#allocation7 + $0x70c] ss:$16 sps:$4 sm:$0xff]  }
 0x369   :  { %7091 = vmatpush1.bf16.msra.mxu1 %v10254_v30 }
 0x36a   :  { %7092 = vmatprep.subr.bf16.mxu1 %v10262_v16 }
 0x36c   :  { %7042 = vmatmul.mubr.bf16.gmra.mrb[116].mxu1 %v11829_v32  ;;  %v10284_v32 = vld [vmem:[#allocation7 + $0x5c8] ss:$16 sps:$4 sm:$0xff]  }
 0x36d   :  { %7051 = vmatprep.mubr.bf16.mxu1 %v11845_v58  ;;  %7093 = vmatpush1.bf16.msra.mxu1 %v10260_v39  ;;  %v10292_v58 = vld [vmem:[#allocation7 + $0x5ec] ss:$16 sps:$4 sm:$0xff]  }
 0x36e   :  { %7094 = vmatprep.subr.bf16.mxu1 %v10268_v4 }
 0x371   :  { %7095 = vmatpush1.bf16.msra.mxu1 %v10266_v53 }
 0x372   :  { %7096 = vmatprep.subr.bf16.mxu1 %v10274_v3  ;;  %v10365_v3 = vld [vmem:[#allocation10] ss:$8 sps:$4 sm:$0xff]  }
 0x374   :  { %7052 = vmatmul.mubr.bf16.gmra.mrb[120].mxu1 %v11842_v40  ;;  %v10296_v40 = vld [vmem:[#allocation7 + $0x608] ss:$16 sps:$4 sm:$0xff]  }
 0x375   :  { %7061 = vmatprep.mubr.bf16.mxu1 %v11856_v38  ;;  %7097 = vmatpush1.bf16.msra.mxu1 %v10272_v29  ;;  %v10304_v38 = vld [vmem:[#allocation7 + $0x62c] ss:$16 sps:$4 sm:$0xff]  }
 0x376   :  { %7098 = vmatprep.subr.bf16.mxu1 %v10280_v51 }
 0x379   :  { %7099 = vmatpush1.bf16.msra.mxu1 %v10278_v21  ;;  %v10341_v21 = vld [vmem:[#allocation7 + $0x708] ss:$16 sps:$4 sm:$0xff]  }
 0x37a   :  { %7100 = vmatprep.subr.bf16.mxu1 %v10286_v22 }
 0x37c   :  { %7062 = vmatmul.mubr.bf16.gmra.mrb[124].mxu1 %v11854_v55  ;;  %v10310_v55 = vld [vmem:[#allocation7 + $0x64c] ss:$16 sps:$4 sm:$0xff]  }
 0x37d   :  { %7101 = vmatpush1.bf16.msra.mxu1 %v10284_v32  ;;  %7104 = vmatprep.mubr.bf16.mxu1 %v11908_v63  ;;  %v10316_v63 = vld [vmem:[#allocation7 + $0x66c] ss:$16 sps:$4 sm:$0xff]  }
 0x37e   :  { %7102 = vmatprep.subr.bf16.mxu1 %v10292_v58  ;;  %v10346_v58 = vld [vmem:[#allocation7 + $0x72c] ss:$16 sps:$4 sm:$0xff]  }
 0x381   :  { %7103 = vmatpush1.bf16.msra.mxu1 %v10290_v62 }
 0x382   :  { %7185 = vmatprep.subr.bf16.mxu1 %v10298_v13 }
 0x384   :  { %7105 = vmatmul.mubr.bf16.vlgmr.msra.gmra.mrb[96].mxu1 %v11904_v6  ;;  %v709_v6 = vsub.s32 6, %v11553_v12 }
 0x385   :  { %7114 = vmatprep.mubr.bf16.mxu1 %v11920_v25  ;;  %7186 = vmatpush1.bf16.msra.mxu1 %v10296_v40  ;;  %v713_v25 = vsub.s32 7, %v11553_v12  ;;  %v10368_v40 = vld [vmem:[#allocation10 + $0x10] ss:$8 sps:$4 sm:$0xff]  }
 0x386   :  { %7187 = vmatprep.subr.bf16.mxu1 %v10304_v38  ;;  %v12011_v18 = vrot.slane %v11890_v36, %v709_v6  ;;  %v10349_v6 = vld [vmem:[#allocation7 + $0x74c] ss:$16 sps:$4 sm:$0xff]  }
 0x389   :  { %7188 = vmatpush1.bf16.msra.mxu1 %v10302_v57 }
 0x38a   :  { %7189 = vmatprep.subr.bf16.mxu1 %v10310_v55  ;;  %v10344_v55 = vld [vmem:[#allocation7 + $0x728] ss:$16 sps:$4 sm:$0xff]  }
 0x38c   :  { %7115 = vmatmul.mubr.bf16.gmra.mrb[100].mxu1 %v11917_v31  ;;  %v12015_v31 = vrot.slane %v11890_v36, %v713_v25  ;;  %v10332_v36 = vld [vmem:[#allocation7 + $0x6c8] ss:$16 sps:$4 sm:$0xff]  }
 0x38d   :  { %7124 = vmatprep.mubr.bf16.mxu1 %v11932_v42  ;;  %7190 = vmatpush1.bf16.msra.mxu1 %v10308_v27  ;;  %v10326_v42 = vld [vmem:[#allocation7 + $0x6a8] ss:$16 sps:$4 sm:$0xff]  }
 0x38e   :  { %7191 = vmatprep.subr.bf16.mxu1 %v10316_v63  ;;  %v10373_v27 = vld [vmem:[#allocation10 + $0x24] ss:$8 sps:$4 sm:$0xff]  }
 0x391   :  { %7192 = vmatpush1.bf16.msra.mxu1 %v10314_v0 }
 0x392   :  { %7193 = vmatprep.subr.bf16.mxu1 %v10322_v7 }
 0x394   :  { %7125 = vmatmul.mubr.bf16.gmra.mrb[104].mxu1 %v11929_v46 }
 0x395   :  { %7134 = vmatprep.mubr.bf16.mxu1 %v11944_v17  ;;  %7194 = vmatpush1.bf16.msra.mxu1 %v10320_v2 }
 0x396   :  { %v4437_v11 = vpop.f32.mrb[64].mxu1  ;;  %7195 = vmatprep.subr.bf16.mxu1 %v10328_v8 }
 0x397   :  { %v9263_v49 = vadd.f32 %v4437_v11, %v12011_v18  ;;  %v4439_v9 = vpop.f32.mrb[65].mxu1 }
 0x398   :  { %v9264_v19 = vadd.f32 %v4439_v9, %v12015_v31  ;;  %v4441_v34 = vpop.f32.mrb[66].mxu1 }
 0x399   :  { %v4522_v43 = vmul.f32 0.2, %v9263_v49  ;;  %v9265_v59 = vadd.f32 %v4441_v34, %v12011_v18  ;;  %7196 = vmatpush1.bf16.msra.mxu1 %v10326_v42  ;;  %v4443_v46 = vpop.f32.mrb[67].mxu1 }
 0x39a   :  { %v4523_v50 = vmul.f32 0.2, %v9264_v19  ;;  %v9266_v17 = vadd.f32 %v4443_v46, %v12015_v31  ;;  %7197 = vmatprep.subr.bf16.mxu1 %v10334_v37  ;;  %v10376_v46 = vld [vmem:[#allocation10 + $0x34] ss:$8 sps:$4 sm:$0xff]  }
 0x39b   :  { %v4530_v1 = vmul.f32 0.2, %v9265_v59  ;;  %v4650_v28 = vmax.f32 %v9263_v49, %v4522_v43 }
 0x39c   :  { %v4531_v56 = vmul.f32 0.2, %v9266_v17  ;;  %7135 = vmatmul.mubr.bf16.gmra.mrb[108].mxu1 %v11941_v35  ;;  %v4651_v47 = vmax.f32 %v9264_v19, %v4523_v50  ;;  %v10347_v19 = vld [vmem:[#allocation7 + $0x748] ss:$16 sps:$4 sm:$0xff]  }
 0x39d   :  { %v4658_v14 = vmax.f32 %v9265_v59, %v4530_v1  ;;  %7144 = vmatprep.mubr.bf16.mxu1 %v11956_v54  ;;  %7198 = vmatpush1.bf16.msra.mxu1 %v10332_v36  ;;  %v10352_v59 = vld [vmem:[#allocation7 + $0x76c] ss:$16 sps:$4 sm:$0xff]  }
 0x39e   :  { %v4659_v45 = vmax.f32 %v9266_v17, %v4531_v56  ;;  %v4447_v52 = vpop.f32.mrb[68].mxu1  ;;  %7199 = vmatprep.subr.bf16.mxu1 %v10340_v24  ;;  %v10374_v17 = vld [vmem:[#allocation10 + $0x30] ss:$8 sps:$4 sm:$0xff]   ;;  %v10350_v56 = vld [vmem:[#allocation7 + $0x768] ss:$16 sps:$4 sm:$0xff]  }
 0x39f   :  { %v12024_v30 = vpack.c.bf16 %v4658_v14, %v4650_v28  ;;  %v9267_v16 = vadd.f32 %v4447_v52, %v12011_v18  ;;  %v4449_v39 = vpop.f32.mrb[69].mxu1  ;;  %v10379_v28 = vld [vmem:[#allocation10 + $0x44] ss:$8 sps:$4 sm:$0xff]  }
 0x3a0   :  { %v9268_v4 = vadd.f32 %v4449_v39, %v12015_v31  ;;  %v4451_v53 = vpop.f32.mrb[70].mxu1  ;;  %v12028_v35 = vpack.c.bf16 %v4659_v45, %v4651_v47  ;;  %v10355_v45 = vld [vmem:[#allocation7 + $0x78c] ss:$16 sps:$4 sm:$0xff]  }
 0x3a1   :  { %v4538_v29 = vmul.f32 0.2, %v9267_v16  ;;  %v9269_v54 = vadd.f32 %v4451_v53, %v12011_v18  ;;  %7200 = vmatpush1.bf16.msra.mxu1 %v10338_v44  ;;  %v4453_v51 = vpop.f32.mrb[71].mxu1 }
 0x3a2   :  { %v4539_v22 = vmul.f32 0.2, %v9268_v4  ;;  %v9270_v32 = vadd.f32 %v4453_v51, %v12015_v31  ;;  %6765 = vmatprep.mubr.bf16.mxu0 %v12028_v35  ;;  %7201 = vmatprep.subr.bf16.mxu1 %v10343_v26 }
 0x3a3   :  { %v4546_v62 = vmul.f32 0.2, %v9269_v54  ;;  %6766 = vmatmul.mubr.bf16.vlgmr.msra.gmra.mrb[64].mxu0 %v12024_v30  ;;  %v4666_v38 = vmax.f32 %v9267_v16, %v4538_v29 }
 0x3a4   :  { %v4547_v13 = vmul.f32 0.2, %v9270_v32  ;;  %7145 = vmatmul.mubr.bf16.gmra.mrb[112].mxu1 %v11953_v61  ;;  %7855 = vmatpush1.bf16.msra.mxu0 %v10365_v3  ;;  %v4667_v63 = vmax.f32 %v9268_v4, %v4539_v22  ;;  %v10358_v22 = vld [vmem:[#allocation7 + $0x7ac] ss:$16 sps:$4 sm:$0xff]  }
 0x3a5   :  { %v4674_v57 = vmax.f32 %v9269_v54, %v4546_v62  ;;  %7154 = vmatprep.mubr.bf16.mxu1 %v11968_v41  ;;  %7202 = vmatpush1.bf16.msra.mxu1 %v10341_v21  ;;  %v10371_v41 = vld [vmem:[#allocation10 + $0x20] ss:$8 sps:$4 sm:$0xff]   ;;  %v10353_v54 = vld [vmem:[#allocation7 + $0x788] ss:$16 sps:$4 sm:$0xff]   ;;  %v10380_v62 = vld [vmem:[#allocation10 + $0x50] ss:$8 sps:$4 sm:$0xff]  }
 0x3a6   :  { %v4675_v0 = vmax.f32 %v9270_v32, %v4547_v13  ;;  %v4457_v7 = vpop.f32.mrb[72].mxu1  ;;  %7203 = vmatprep.subr.bf16.mxu1 %v10346_v58  ;;  %7856 = vmatprep.subr.bf16.mxu0 %v10370_v48  ;;  %v10382_v32 = vld [vmem:[#allocation10 + $0x54] ss:$8 sps:$4 sm:$0xff]  }
 0x3a7   :  { %v9271_v25 = vadd.f32 %v4457_v7, %v12011_v18  ;;  %v4459_v2 = vpop.f32.mrb[73].mxu1  ;;  %v12037_v8 = vpack.c.bf16 %v4674_v57, %v4666_v38  ;;  %v10356_v38 = vld [vmem:[#allocation7 + $0x7a8] ss:$16 sps:$4 sm:$0xff]  }
 0x3a8   :  { %v9272_v61 = vadd.f32 %v4459_v2, %v12015_v31  ;;  %v4461_v42 = vpop.f32.mrb[74].mxu1  ;;  %v12040_v11 = vpack.c.bf16 %v4675_v0, %v4667_v63  ;;  %7857 = vmatpush1.bf16.msra.mxu0 %v10368_v40  ;;  %v10385_v57 = vld [vmem:[#allocation10 + $0x64] ss:$8 sps:$4 sm:$0xff]   ;;  %v10361_v0 = vld [vmem:[#allocation7 + $0x7cc] ss:$16 sps:$4 sm:$0xff]  }
 0x3a9   :  { %v4554_v37 = vmul.f32 0.2, %v9271_v25  ;;  %v9273_v49 = vadd.f32 %v4461_v42, %v12011_v18  ;;  %7204 = vmatpush1.bf16.msra.mxu1 %v10344_v55  ;;  %v4463_v9 = vpop.f32.mrb[75].mxu1  ;;  %7858 = vmatprep.subr.bf16.mxu0 %v10373_v27 }
 0x3aa   :  { %v4555_v34 = vmul.f32 0.2, %v9272_v61  ;;  %v9274_v43 = vadd.f32 %v4463_v9, %v12015_v31  ;;  %6775 = vmatprep.mubr.bf16.mxu0 %v12040_v11  ;;  %7205 = vmatprep.subr.bf16.mxu1 %v10349_v6 }
 0x3ab   :  { %v4562_v36 = vmul.f32 0.2, %v9273_v49  ;;  %6776 = vmatmul.mubr.bf16.gmra.mrb[68].mxu0 %v12037_v8  ;;  %v4682_v24 = vmax.f32 %v9271_v25, %v4554_v37 }
 0x3ac   :  { %v4563_v50 = vmul.f32 0.2, %v9274_v43  ;;  %7155 = vmatmul.mubr.bf16.gmra.mrb[116].mxu1 %v11965_v60  ;;  %7859 = vmatpush1.bf16.msra.mxu0 %v10371_v41  ;;  %v4683_v14 = vmax.f32 %v9272_v61, %v4555_v34  ;;  %v10364_v34 = vld [vmem:[#allocation7 + $0x7ec] ss:$16 sps:$4 sm:$0xff]  }
 0x3ad   :  { %v4690_v1 = vmax.f32 %v9273_v49, %v4562_v36  ;;  %7164 = vmatprep.mubr.bf16.mxu1 %v11980_v33  ;;  %7206 = vmatpush1.bf16.msra.mxu1 %v10347_v19  ;;  %v10377_v33 = vld [vmem:[#allocation10 + $0x40] ss:$8 sps:$4 sm:$0xff]   ;;  %v10359_v49 = vld [vmem:[#allocation7 + $0x7c8] ss:$16 sps:$4 sm:$0xff]   ;;  %v10386_v36 = vld [vmem:[#allocation10 + $0x70] ss:$8 sps:$4 sm:$0xff]  }
 0x3ae   :  { %v4691_v44 = vmax.f32 %v9274_v43, %v4563_v50  ;;  %v4467_v47 = vpop.f32.mrb[76].mxu1  ;;  %7207 = vmatprep.subr.bf16.mxu1 %v10352_v59  ;;  %7860 = vmatprep.subr.bf16.mxu0 %v10376_v46  ;;  %v10388_v43 = vld [vmem:[#allocation10 + $0x74] ss:$8 sps:$4 sm:$0xff]  }
 0x3af   :  { %v9275_v52 = vadd.f32 %v4467_v47, %v12011_v18  ;;  %v4469_v26 = vpop.f32.mrb[77].mxu1  ;;  %v12049_v16 = vpack.c.bf16 %v4690_v1, %v4682_v24  ;;  %v10362_v24 = vld [vmem:[#allocation7 + $0x7e8] ss:$16 sps:$4 sm:$0xff]  }
 0x3b0   :  { %v9276_v60 = vadd.f32 %v4469_v26, %v12015_v31  ;;  %v4471_v39 = vpop.f32.mrb[78].mxu1  ;;  %v12052_v4 = vpack.c.bf16 %v4691_v44, %v4683_v14  ;;  %7861 = vmatpush1.bf16.msra.mxu0 %v10374_v17  ;;  %v10391_v1 = vld [vmem:[#allocation10 + $0x84] ss:$8 sps:$4 sm:$0xff]  }
 0x3b1   :  { %v4570_v53 = vmul.f32 0.2, %v9275_v52  ;;  %v9277_v3 = vadd.f32 %v4471_v39, %v12011_v18  ;;  %7208 = vmatpush1.bf16.msra.mxu1 %v10350_v56  ;;  %v4473_v29 = vpop.f32.mrb[79].mxu1  ;;  %7862 = vmatprep.subr.bf16.mxu0 %v10379_v28 }
 0x3b2   :  { %v4571_v51 = vmul.f32 0.2, %v9276_v60  ;;  %v9278_v21 = vadd.f32 %v4473_v29, %v12015_v31  ;;  %6785 = vmatprep.mubr.bf16.mxu0 %v12052_v4  ;;  %7209 = vmatprep.subr.bf16.mxu1 %v10355_v45 }
 0x3b3   :  { %v4578_v58 = vmul.f32 0.2, %v9277_v3  ;;  %6786 = vmatmul.mubr.bf16.gmra.mrb[72].mxu0 %v12049_v16  ;;  %v4698_v13 = vmax.f32 %v9275_v52, %v4570_v53  ;;  %v10394_v53 = vld [vmem:[#allocation10 + $0x94] ss:$8 sps:$4 sm:$0xff]  }
 0x3b4   :  { %v4579_v48 = vmul.f32 0.2, %v9278_v21  ;;  %7165 = vmatmul.mubr.bf16.gmra.mrb[120].mxu1 %v11977_v15  ;;  %7863 = vmatpush1.bf16.msra.mxu0 %v10377_v33  ;;  %v4699_v55 = vmax.f32 %v9276_v60, %v4571_v51  ;;  %v10389_v60 = vld [vmem:[#allocation10 + $0x80] ss:$8 sps:$4 sm:$0xff]  }
 0x3b5   :  { %v4706_v40 = vmax.f32 %v9277_v3, %v4578_v58  ;;  %7174 = vmatprep.mubr.bf16.mxu1 %v11990_v20  ;;  %7210 = vmatpush1.bf16.msra.mxu1 %v10353_v54  ;;  %v10383_v20 = vld [vmem:[#allocation10 + $0x60] ss:$8 sps:$4 sm:$0xff]   ;;  %v10397_v58 = vld [vmem:[#allocation10 + $0xa4] ss:$8 sps:$4 sm:$0xff]  }
 0x3b6   :  { %v4707_v27 = vmax.f32 %v9278_v21, %v4579_v48  ;;  %v4477_v63 = vpop.f32.mrb[80].mxu1  ;;  %7211 = vmatprep.subr.bf16.mxu1 %v10358_v22  ;;  %7864 = vmatprep.subr.bf16.mxu0 %v10382_v32  ;;  %v10392_v21 = vld [vmem:[#allocation10 + $0x90] ss:$8 sps:$4 sm:$0xff]  }
 0x3b7   :  { %v9279_v7 = vadd.f32 %v4477_v63, %v12011_v18  ;;  %v4479_v6 = vpop.f32.mrb[81].mxu1  ;;  %v12061_v25 = vpack.c.bf16 %v4706_v40, %v4698_v13 }
 0x3b8   :  { %v9280_v15 = vadd.f32 %v4479_v6, %v12015_v31  ;;  %v4481_v2 = vpop.f32.mrb[82].mxu1  ;;  %v12064_v61 = vpack.c.bf16 %v4707_v27, %v4699_v55  ;;  %7865 = vmatpush1.bf16.msra.mxu0 %v10380_v62 }
 0x3b9   :  { %v4586_v42 = vmul.f32 0.2, %v9279_v7  ;;  %v9281_v41 = vadd.f32 %v4481_v2, %v12011_v18  ;;  %7212 = vmatpush1.bf16.msra.mxu1 %v10356_v38  ;;  %v4483_v37 = vpop.f32.mrb[83].mxu1  ;;  %7866 = vmatprep.subr.bf16.mxu0 %v10385_v57 }
 0x3ba   :  { %v4587_v9 = vmul.f32 0.2, %v9280_v15  ;;  %v9282_v19 = vadd.f32 %v4483_v37, %v12015_v31  ;;  %6795 = vmatprep.mubr.bf16.mxu0 %v12064_v61  ;;  %7213 = vmatprep.subr.bf16.mxu1 %v10361_v0 }
 0x3bb   :  { %v4594_v59 = vmul.f32 0.2, %v9281_v41  ;;  %6796 = vmatmul.mubr.bf16.gmra.mrb[76].mxu0 %v12061_v25  ;;  %v4714_v50 = vmax.f32 %v9279_v7, %v4586_v42 }
 0x3bc   :  { %v4595_v46 = vmul.f32 0.2, %v9282_v19  ;;  %7175 = vmatmul.mubr.bf16.gmra.mrb[124].mxu1 %v11988_v23  ;;  %7867 = vmatpush1.bf16.msra.mxu0 %v10383_v20  ;;  %v4715_v56 = vmax.f32 %v9280_v15, %v4587_v9  ;;  %v10403_v9 = vld [vmem:[#allocation10 + $0xc4] ss:$8 sps:$4 sm:$0xff]  }
 0x3bd   :  { %v4722_v17 = vmax.f32 %v9281_v41, %v4594_v59  ;;  %7214 = vmatpush1.bf16.msra.mxu1 %v10359_v49  ;;  %7217 = vmatprep.mubr.bf16.mxu1 %v12028_v35  ;;  %v10398_v41 = vld [vmem:[#allocation10 + $0xb0] ss:$8 sps:$4 sm:$0xff]  }
 0x3be   :  { %v4723_v28 = vmax.f32 %v9282_v19, %v4595_v46  ;;  %v4487_v14 = vpop.f32.mrb[84].mxu1  ;;  %7215 = vmatprep.subr.bf16.mxu1 %v10364_v34  ;;  %7868 = vmatprep.subr.bf16.mxu0 %v10388_v43 }
 0x3bf   :  { %v9283_v44 = vadd.f32 %v4487_v14, %v12011_v18  ;;  %v4489_v47 = vpop.f32.mrb[85].mxu1  ;;  %v12073_v45 = vpack.c.bf16 %v4722_v17, %v4714_v50 }
 0x3c0   :  { %v9284_v23 = vadd.f32 %v4489_v47, %v12015_v31  ;;  %v4491_v52 = vpop.f32.mrb[86].mxu1  ;;  %v12076_v26 = vpack.c.bf16 %v4723_v28, %v4715_v56  ;;  %7869 = vmatpush1.bf16.msra.mxu0 %v10386_v36 }
 0x3c1   :  { %v4602_v35 = vmul.f32 0.2, %v9283_v44  ;;  %v9285_v39 = vadd.f32 %v4491_v52, %v12011_v18  ;;  %7216 = vmatpush1.bf16.msra.mxu1 %v10362_v24  ;;  %v4493_v33 = vpop.f32.mrb[87].mxu1  ;;  %7870 = vmatprep.subr.bf16.mxu0 %v10391_v1 }
 0x3c2   :  { %v4603_v3 = vmul.f32 0.2, %v9284_v23  ;;  %v9286_v29 = vadd.f32 %v4493_v33, %v12015_v31  ;;  %6805 = vmatprep.mubr.bf16.mxu0 %v12076_v26  ;;  %v10407_v33 = vld [vmem:[#allocation10 + $0xe0] ss:$8 sps:$4 sm:$0xff]  }
 0x3c3   :  { %v4610_v54 = vmul.f32 0.2, %v9285_v39  ;;  %6806 = vmatmul.mubr.bf16.gmra.mrb[80].mxu0 %v12073_v45  ;;  %v4730_v22 = vmax.f32 %v9283_v44, %v4602_v35 }
 0x3c4   :  { %v4611_v51 = vmul.f32 0.2, %v9286_v29  ;;  %7218 = vmatmul.mubr.bf16.vlgmr.msra.gmra.mrb[96].mxu1 %v12024_v30  ;;  %7871 = vmatpush1.bf16.msra.mxu0 %v10389_v60  ;;  %v4731_v48 = vmax.f32 %v9284_v23, %v4603_v3  ;;  %v10395_v30 = vld [vmem:[#allocation10 + $0xa0] ss:$8 sps:$4 sm:$0xff]   ;;  %v12579_v3 = vld [vmem:[#allocation24_spill] sm:$0xff] }
 0x3c5   :  { %v4738_v32 = vmax.f32 %v9285_v39, %v4610_v54  ;;  %7227 = vmatprep.mubr.bf16.mxu1 %v12040_v11  ;;  %7872 = vmatprep.subr.bf16.mxu0 %v10394_v53  ;;  %v10400_v11 = vld [vmem:[#allocation10 + $0xb4] ss:$8 sps:$4 sm:$0xff]   ;;  %v12580_v54 = vld [vmem:[#allocation26_spill] sm:$0xff] }
 0x3c6   :  { %v4739_v62 = vmax.f32 %v9286_v29, %v4611_v51  ;;  %v4497_v13 = vpop.f32.mrb[88].mxu1  ;;  %v10412_v53 = vld [vmem:[#allocation10 + $0xf4] ss:$8 sps:$4 sm:$0xff]  }
 0x3c7   :  { %v9287_v40 = vadd.f32 %v4497_v13, %v12011_v18  ;;  %v4499_v38 = vpop.f32.mrb[89].mxu1  ;;  %v4818_v57 = vpack.c.bf16 %v4738_v32, %v4730_v22 }
 0x3c8   :  { %v9288_v55 = vadd.f32 %v4499_v38, %v12015_v31  ;;  %v4501_v27 = vpop.f32.mrb[90].mxu1  ;;  %v4819_v63 = vpack.c.bf16 %v4739_v62, %v4731_v48  ;;  %7873 = vmatpush1.bf16.msra.mxu0 %v10392_v21 }
 0x3c9   :  { %v4618_v0 = vmul.f32 0.2, %v9287_v40  ;;  %v9289_v7 = vadd.f32 %v4501_v27, %v12011_v18  ;;  %v4503_v6 = vpop.f32.mrb[91].mxu1  ;;  %7874 = vmatprep.subr.bf16.mxu0 %v10397_v58 }
 0x3ca   :  { %v4619_v15 = vmul.f32 0.2, %v9288_v55  ;;  %v9290_v2 = vadd.f32 %v4503_v6, %v12015_v31  ;;  %6815 = vmatprep.mubr.bf16.mxu0 %v4819_v63 }
 0x3cb   :  { %v4626_v20 = vmul.f32 0.2, %v9289_v7  ;;  %6816 = vmatmul.mubr.bf16.gmra.mrb[84].mxu0 %v4818_v57  ;;  %v4746_v37 = vmax.f32 %v9287_v40, %v4618_v0 }
 0x3cc   :  { %v4627_v42 = vmul.f32 0.2, %v9290_v2  ;;  %7228 = vmatmul.mubr.bf16.gmra.mrb[100].mxu1 %v12037_v8  ;;  %7875 = vmatpush1.bf16.msra.mxu0 %v10395_v30  ;;  %v4747_v19 = vmax.f32 %v9288_v55, %v4619_v15  ;;  %v10401_v8 = vld [vmem:[#allocation10 + $0xc0] ss:$8 sps:$4 sm:$0xff]  }
 0x3cd   :  { %v4754_v49 = vmax.f32 %v9289_v7, %v4626_v20  ;;  %7237 = vmatprep.mubr.bf16.mxu1 %v12052_v4  ;;  %7876 = vmatprep.subr.bf16.mxu0 %v10400_v11 }
 0x3ce   :  { %v4755_v34 = vmax.f32 %v9290_v2, %v4627_v42  ;;  %v4507_v43 = vpop.f32.mrb[92].mxu1 }
 0x3cf   :  { %v9291_v59 = vadd.f32 %v4507_v43, %v12011_v18  ;;  %v4509_v46 = vpop.f32.mrb[93].mxu1  ;;  %v4826_v36 = vpack.c.bf16 %v4754_v49, %v4746_v37  ;;  %v10413_v37 = vld [vmem:[#allocation10 + $0x100] ss:$8 sps:$4 sm:$0xff]  }
 0x3d0   :  { %v9292_v50 = vadd.f32 %v4509_v46, %v12015_v31  ;;  %v4511_v17 = vpop.f32.mrb[94].mxu1  ;;  %v4827_v24 = vpack.c.bf16 %v4755_v34, %v4747_v19  ;;  %7877 = vmatpush1.bf16.msra.mxu0 %v10398_v41  ;;  %v10418_v34 = vld [vmem:[#allocation10 + $0x114] ss:$8 sps:$4 sm:$0xff]  }
 0x3d1   :  { %v4634_v1 = vmul.f32 0.2, %v9291_v59  ;;  %v9293_v56 = vadd.f32 %v4511_v17, %v12011_v18  ;;  %v4513_v28 = vpop.f32.mrb[95].mxu1  ;;  %7878 = vmatprep.subr.bf16.mxu0 %v10403_v9 }
 0x3d2   :  { %v4635_v4 = vmul.f32 0.2, %v9292_v50  ;;  %v9294_v14 = vadd.f32 %v4513_v28, %v12015_v31  ;;  %6825 = vmatprep.mubr.bf16.mxu0 %v4827_v24  ;;  %v10406_v31 = vld [vmem:[#allocation10 + $0xd4] ss:$8 sps:$4 sm:$0xff]  }
 0x3d3   :  { %v4642_v44 = vmul.f32 0.2, %v9293_v56  ;;  %6826 = vmatmul.mubr.bf16.gmra.mrb[88].mxu0 %v4826_v36  ;;  %v4762_v23 = vmax.f32 %v9291_v59, %v4634_v1 }
 0x3d4   :  { %v4643_v47 = vmul.f32 0.2, %v9294_v14  ;;  %7238 = vmatmul.mubr.bf16.gmra.mrb[104].mxu1 %v12049_v16  ;;  %7879 = vmatpush1.bf16.msra.mxu0 %v10401_v8  ;;  %v4763_v60 = vmax.f32 %v9292_v50, %v4635_v4  ;;  %v10404_v16 = vld [vmem:[#allocation10 + $0xd0] ss:$8 sps:$4 sm:$0xff]   ;;  %v10421_v8 = vld [vmem:[#allocation10 + $0x124] ss:$8 sps:$4 sm:$0xff]  }
 0x3d5   :  { %v4770_v52 = vmax.f32 %v9293_v56, %v4642_v44  ;;  %7247 = vmatprep.mubr.bf16.mxu1 %v12064_v61  ;;  %7880 = vmatprep.subr.bf16.mxu0 %v10406_v31  ;;  %v10409_v61 = vld [vmem:[#allocation10 + $0xe4] ss:$8 sps:$4 sm:$0xff]   ;;  %v10416_v50 = vld [vmem:[#allocation10 + $0x110] ss:$8 sps:$4 sm:$0xff]   ;;  %v10424_v31 = vld [vmem:[#allocation10 + $0x134] ss:$8 sps:$4 sm:$0xff]  }
 0x3d6   :  { %v4771_v35 = vmax.f32 %v9294_v14, %v4643_v47 }
 0x3d7   :  { %v4834_v39 = vpack.c.bf16 %v4770_v52, %v4762_v23 }
 0x3d8   :  { %v4835_v18 = vpack.c.bf16 %v4771_v35, %v4763_v60  ;;  %7881 = vmatpush1.bf16.msra.mxu0 %v10404_v16  ;;  %v10419_v60 = vld [vmem:[#allocation10 + $0x120] ss:$8 sps:$4 sm:$0xff]  }
 0x3d9   :  { %7882 = vmatprep.subr.bf16.mxu0 %v10409_v61 }
 0x3da   :  { %6835 = vmatprep.mubr.bf16.mxu0 %v4835_v18 }
 0x3db   :  { %6836 = vmatmul.mubr.bf16.gmra.mrb[92].mxu0 %v4834_v39 }
 0x3dc   :  { %7248 = vmatmul.mubr.bf16.gmra.mrb[108].mxu1 %v12061_v25  ;;  %7883 = vmatpush1.bf16.msra.mxu0 %v10407_v33  ;;  %v10410_v25 = vld [vmem:[#allocation10 + $0xf0] ss:$8 sps:$4 sm:$0xff]  }
 0x3dd   :  { %7257 = vmatprep.mubr.bf16.mxu1 %v12076_v26  ;;  %7884 = vmatprep.subr.bf16.mxu0 %v10412_v53  ;;  %v10415_v26 = vld [vmem:[#allocation10 + $0x104] ss:$8 sps:$4 sm:$0xff]  }
 0x3e0   :  { %7885 = vmatpush1.bf16.msra.mxu0 %v10410_v25  ;;  %v10422_v25 = vld [vmem:[#allocation10 + $0x130] ss:$8 sps:$4 sm:$0xff]  }
 0x3e1   :  { %7967 = vmatprep.subr.bf16.mxu0 %v10415_v26 }
 0x3e4   :  { %7258 = vmatmul.mubr.bf16.gmra.mrb[112].mxu1 %v12073_v45  ;;  %v12099_v45 = vld [vmem:[#allocation8] sm:$0xf] }
 0x3e5   :  { %7267 = vmatprep.mubr.bf16.mxu1 %v4819_v63  ;;  %v12103_v29 = vrot.slane %v12099_v45, %v12579_v3  ;;  %v12107_v51 = vrot.slane %v12099_v45, %v12580_v54 }
 0x3ec   :  { %7268 = vmatmul.mubr.bf16.gmra.mrb[116].mxu1 %v4818_v57 }
 0x3ed   :  { %7277 = vmatprep.mubr.bf16.mxu1 %v4827_v24 }
 0x3f4   :  { %7278 = vmatmul.mubr.bf16.gmra.mrb[120].mxu1 %v4826_v36 }
 0x3f5   :  { %7287 = vmatprep.mubr.bf16.mxu1 %v4835_v18 }
 0x3fc   :  { %7288 = vmatmul.mubr.bf16.gmra.mrb[124].mxu1 %v4834_v39 }
 0x476   :  { %v6767_v21 = vpop.f32.mrb[64].mxu0 }
 0x477   :  { %v9295_v22 = vadd.f32 %v6767_v21, %v12103_v29  ;;  %v6769_v32 = vpop.f32.mrb[65].mxu0 }
 0x478   :  { %v9296_v58 = vadd.f32 %v6769_v32, %v12107_v51  ;;  %v6771_v48 = vpop.f32.mrb[66].mxu0 }
 0x479   :  { %v7298_v62 = vmul.f32 0.2, %v9295_v22  ;;  %v9297_v13 = vadd.f32 %v6771_v48, %v12103_v29  ;;  %v6773_v40 = vpop.f32.mrb[67].mxu0 }
 0x47a   :  { %v7299_v38 = vmul.f32 0.2, %v9296_v58  ;;  %v9298_v57 = vadd.f32 %v6773_v40, %v12107_v51 }
 0x47b   :  { %v7302_v55 = vmul.f32 0.2, %v9297_v13  ;;  %v7362_v63 = vmax.f32 %v9295_v22, %v7298_v62  ;;  %v10427_v22 = vld [vmem:[#allocation10 + $0x144] ss:$8 sps:$4 sm:$0xff]  }
 0x47c   :  { %v7303_v27 = vmul.f32 0.2, %v9298_v57  ;;  %v7363_v0 = vmax.f32 %v9296_v58, %v7299_v38 }
 0x47d   :  { %v7366_v30 = vmax.f32 %v9297_v13, %v7302_v55 }
 0x47e   :  { %v7367_v7 = vmax.f32 %v9298_v57, %v7303_v27  ;;  %v6777_v6 = vpop.f32.mrb[68].mxu0  ;;  %v10425_v27 = vld [vmem:[#allocation10 + $0x140] ss:$8 sps:$4 sm:$0xff]  }
 0x47f   :  { %v7426_v11 = vpack.c.bf16 %v7366_v30, %v7362_v63  ;;  %v9299_v15 = vadd.f32 %v6777_v6, %v12103_v29  ;;  %v6779_v2 = vpop.f32.mrb[69].mxu0 }
 0x480   :  { %v9300_v20 = vadd.f32 %v6779_v2, %v12107_v51  ;;  %v6781_v42 = vpop.f32.mrb[70].mxu0  ;;  %v7427_v41 = vpack.c.bf16 %v7367_v7, %v7363_v0  ;;  %v10430_v7 = vld [vmem:[#allocation10 + $0x154] ss:$8 sps:$4 sm:$0xff]  }
 0x481   :  { %v7306_v49 = vmul.f32 0.2, %v9299_v15  ;;  %v9301_v9 = vadd.f32 %v6781_v42, %v12103_v29  ;;  %v6783_v19 = vpop.f32.mrb[71].mxu0  ;;  %v10428_v42 = vld [vmem:[#allocation10 + $0x150] ss:$8 sps:$4 sm:$0xff]  }
 0x482   :  { %v7307_v43 = vmul.f32 0.2, %v9300_v20  ;;  %v9302_v59 = vadd.f32 %v6783_v19, %v12107_v51  ;;  %7886 = vmatprep.mubr.bf16.mxu0 %v7427_v41 }
 0x483   :  { %v7310_v46 = vmul.f32 0.2, %v9301_v9  ;;  %7887 = vmatmul.mubr.bf16.vlgmr.msra.gmra.mrb[96].mxu0 %v7426_v11  ;;  %v7370_v17 = vmax.f32 %v9299_v15, %v7306_v49  ;;  %v12133_v49 = vrot.slane %v12099_v45, %v697_v5  ;;  %v10431_v5 = vld [vmem:[#allocation10 + $0x160] ss:$8 sps:$4 sm:$0xff]  }
 0x484   :  { %v7311_v36 = vmul.f32 0.2, %v9302_v59  ;;  %7968 = vmatpush1.bf16.msra.mxu0 %v10413_v37  ;;  %v7371_v1 = vmax.f32 %v9300_v20, %v7307_v43  ;;  %v12128_v20 = vrot.slane %v12099_v45, %v693_v10 }
 0x485   :  { %v7374_v24 = vmax.f32 %v9301_v9, %v7310_v46  ;;  %7969 = vmatprep.subr.bf16.mxu0 %v10418_v34  ;;  %v10433_v9 = vld [vmem:[#allocation10 + $0x164] ss:$8 sps:$4 sm:$0xff]  }
 0x486   :  { %v7375_v56 = vmax.f32 %v9302_v59, %v7311_v36  ;;  %v6787_v28 = vpop.f32.mrb[72].mxu0 }
 0x487   :  { %v9303_v4 = vadd.f32 %v6787_v28, %v12103_v29  ;;  %v6789_v14 = vpop.f32.mrb[73].mxu0  ;;  %v7430_v44 = vpack.c.bf16 %v7374_v24, %v7370_v17 }
 0x488   :  { %v9304_v47 = vadd.f32 %v6789_v14, %v12107_v51  ;;  %v6791_v23 = vpop.f32.mrb[74].mxu0  ;;  %7970 = vmatpush1.bf16.msra.mxu0 %v10416_v50  ;;  %v7431_v52 = vpack.c.bf16 %v7375_v56, %v7371_v1  ;;  %v10436_v14 = vld [vmem:[#allocation10 + $0x174] ss:$8 sps:$4 sm:$0xff]  }
 0x489   :  { %v7314_v35 = vmul.f32 0.2, %v9303_v4  ;;  %v9305_v39 = vadd.f32 %v6791_v23, %v12103_v29  ;;  %v6793_v18 = vpop.f32.mrb[75].mxu0  ;;  %7971 = vmatprep.subr.bf16.mxu0 %v10421_v8 }
 0x48a   :  { %v7315_v16 = vmul.f32 0.2, %v9304_v47  ;;  %v9306_v61 = vadd.f32 %v6793_v18, %v12107_v51  ;;  %7896 = vmatprep.mubr.bf16.mxu0 %v7431_v52 }
 0x48b   :  { %v7318_v33 = vmul.f32 0.2, %v9305_v39  ;;  %7897 = vmatmul.mubr.bf16.gmra.mrb[100].mxu0 %v7430_v44  ;;  %v7378_v26 = vmax.f32 %v9303_v4, %v7314_v35 }
 0x48c   :  { %v7319_v53 = vmul.f32 0.2, %v9306_v61  ;;  %7972 = vmatpush1.bf16.msra.mxu0 %v10419_v60  ;;  %v7379_v32 = vmax.f32 %v9304_v47, %v7315_v16 }
 0x48d   :  { %v7382_v21 = vmax.f32 %v9305_v39, %v7318_v33  ;;  %7973 = vmatprep.subr.bf16.mxu0 %v10424_v31 }
 0x48e   :  { %v7383_v58 = vmax.f32 %v9306_v61, %v7319_v53  ;;  %v6797_v48 = vpop.f32.mrb[76].mxu0  ;;  %v10434_v61 = vld [vmem:[#allocation10 + $0x170] ss:$8 sps:$4 sm:$0xff]  }
 0x48f   :  { %v9307_v62 = vadd.f32 %v6797_v48, %v12103_v29  ;;  %v6799_v13 = vpop.f32.mrb[77].mxu0  ;;  %v7434_v40 = vpack.c.bf16 %v7382_v21, %v7378_v26  ;;  %v10439_v26 = vld [vmem:[#allocation10 + $0x184] ss:$8 sps:$4 sm:$0xff]  }
 0x490   :  { %v9308_v38 = vadd.f32 %v6799_v13, %v12107_v51  ;;  %v6801_v57 = vpop.f32.mrb[78].mxu0  ;;  %7974 = vmatpush1.bf16.msra.mxu0 %v10422_v25  ;;  %v7435_v55 = vpack.c.bf16 %v7383_v58, %v7379_v32 }
 0x491   :  { %v7322_v63 = vmul.f32 0.2, %v9307_v62  ;;  %v9309_v30 = vadd.f32 %v6801_v57, %v12103_v29  ;;  %v6803_v0 = vpop.f32.mrb[79].mxu0  ;;  %7975 = vmatprep.subr.bf16.mxu0 %v10427_v22 }
 0x492   :  { %v7323_v6 = vmul.f32 0.2, %v9308_v38  ;;  %v9310_v11 = vadd.f32 %v6803_v0, %v12107_v51  ;;  %7906 = vmatprep.mubr.bf16.mxu0 %v7435_v55 }
 0x493   :  { %v7326_v15 = vmul.f32 0.2, %v9309_v30  ;;  %7907 = vmatmul.mubr.bf16.gmra.mrb[104].mxu0 %v7434_v40  ;;  %v7386_v41 = vmax.f32 %v9307_v62, %v7322_v63 }
 0x494   :  { %v7327_v2 = vmul.f32 0.2, %v9310_v11  ;;  %7976 = vmatpush1.bf16.msra.mxu0 %v10425_v27  ;;  %v7387_v19 = vmax.f32 %v9308_v38, %v7323_v6 }
 0x495   :  { %v7390_v37 = vmax.f32 %v9309_v30, %v7326_v15  ;;  %7977 = vmatprep.subr.bf16.mxu0 %v10430_v7 }
 0x496   :  { %v7391_v34 = vmax.f32 %v9310_v11, %v7327_v2  ;;  %v6807_v43 = vpop.f32.mrb[80].mxu0  ;;  %v10437_v11 = vld [vmem:[#allocation10 + $0x180] ss:$8 sps:$4 sm:$0xff]  }
 0x497   :  { %v9311_v59 = vadd.f32 %v6807_v43, %v12103_v29  ;;  %v7219_v46 = vpop.f32.mrb[96].mxu1  ;;  %v6809_v36 = vpop.f32.mrb[81].mxu0  ;;  %v7438_v50 = vpack.c.bf16 %v7390_v37, %v7386_v41 }
 0x498   :  { %v9327_v10 = vadd.f32 %v7219_v46, %v12128_v20  ;;  %v9312_v17 = vadd.f32 %v6809_v36, %v12107_v51  ;;  %v7221_v24 = vpop.f32.mrb[97].mxu1  ;;  %v6811_v8 = vpop.f32.mrb[82].mxu0  ;;  %7978 = vmatpush1.bf16.msra.mxu0 %v10428_v42  ;;  %v7439_v12 = vpack.c.bf16 %v7391_v34, %v7387_v19 }
 0x499   :  { %v7330_v45 = vmul.f32 0.2, %v9311_v59  ;;  %v9328_v1 = vadd.f32 %v7221_v24, %v12133_v49  ;;  %v9313_v56 = vadd.f32 %v6811_v8, %v12103_v29  ;;  %v7223_v28 = vpop.f32.mrb[98].mxu1  ;;  %v6813_v4 = vpop.f32.mrb[83].mxu0  ;;  %7979 = vmatprep.subr.bf16.mxu0 %v10433_v9  ;;  %v10442_v9 = vld [vmem:[#allocation10 + $0x194] ss:$8 sps:$4 sm:$0xff]  }
 0x49a   :  { %v7300_v44 = vmul.f32 0.2, %v9327_v10  ;;  %v7331_v47 = vmul.f32 0.2, %v9312_v17  ;;  %v9329_v23 = vadd.f32 %v7223_v28, %v12128_v20  ;;  %v9314_v52 = vadd.f32 %v6813_v4, %v12107_v51  ;;  %v7225_v60 = vpop.f32.mrb[99].mxu1  ;;  %7916 = vmatprep.mubr.bf16.mxu0 %v7439_v12 }
 0x49b   :  { %v7301_v35 = vmul.f32 0.2, %v9328_v1  ;;  %v7334_v39 = vmul.f32 0.2, %v9313_v56  ;;  %v9330_v18 = vadd.f32 %v7225_v60, %v12133_v49  ;;  %7917 = vmatmul.mubr.bf16.gmra.mrb[108].mxu0 %v7438_v50  ;;  %v7394_v33 = vmax.f32 %v9311_v59, %v7330_v45  ;;  %v10440_v12 = vld [vmem:[#allocation10 + $0x190] ss:$8 sps:$4 sm:$0xff]  }
 0x49c   :  { %v7304_v31 = vmul.f32 0.2, %v9329_v23  ;;  %v7335_v16 = vmul.f32 0.2, %v9314_v52  ;;  %7980 = vmatpush1.bf16.msra.mxu0 %v10431_v5  ;;  %v7364_v21 = vmax.f32 %v9327_v10, %v7300_v44  ;;  %v7395_v22 = vmax.f32 %v9312_v17, %v7331_v47 }
 0x49d   :  { %v7398_v53 = vmax.f32 %v9313_v56, %v7334_v39  ;;  %v7305_v25 = vmul.f32 0.2, %v9330_v18  ;;  %7981 = vmatprep.subr.bf16.mxu0 %v10436_v14  ;;  %v7365_v62 = vmax.f32 %v9328_v1, %v7301_v35  ;;  %v10445_v56 = vld [vmem:[#allocation10 + $0x1a4] ss:$8 sps:$4 sm:$0xff]  }
 0x49e   :  { %v7368_v32 = vmax.f32 %v9329_v23, %v7304_v31  ;;  %v7399_v58 = vmax.f32 %v9314_v52, %v7335_v16  ;;  %v6817_v48 = vpop.f32.mrb[84].mxu0 }
 0x49f   :  { %v7369_v13 = vmax.f32 %v9330_v18, %v7305_v25  ;;  %v9315_v40 = vadd.f32 %v6817_v48, %v12103_v29  ;;  %v7229_v38 = vpop.f32.mrb[100].mxu1  ;;  %v6819_v57 = vpop.f32.mrb[85].mxu0  ;;  %v7442_v55 = vpack.c.bf16 %v7398_v53, %v7394_v33  ;;  %v10443_v25 = vld [vmem:[#allocation10 + $0x1a0] ss:$8 sps:$4 sm:$0xff]  }
 0x4a0   :  { %v12144_v27 = vpack.c.bf16 %v7368_v32, %v7364_v21  ;;  %v9331_v63 = vadd.f32 %v7229_v38, %v12128_v20  ;;  %v9316_v30 = vadd.f32 %v6819_v57, %v12107_v51  ;;  %v7231_v0 = vpop.f32.mrb[101].mxu1  ;;  %v6821_v7 = vpop.f32.mrb[86].mxu0  ;;  %7982 = vmatpush1.bf16.msra.mxu0 %v10434_v61  ;;  %v7443_v6 = vpack.c.bf16 %v7399_v58, %v7395_v22 }
 0x4a1   :  { %v7338_v15 = vmul.f32 0.2, %v9315_v40  ;;  %v9332_v2 = vadd.f32 %v7231_v0, %v12133_v49  ;;  %v9317_v42 = vadd.f32 %v6821_v7, %v12103_v29  ;;  %v7233_v41 = vpop.f32.mrb[102].mxu1  ;;  %v6823_v37 = vpop.f32.mrb[87].mxu0  ;;  %7983 = vmatprep.subr.bf16.mxu0 %v10439_v26  ;;  %v12150_v19 = vpack.c.bf16 %v7369_v13, %v7365_v62  ;;  %v10448_v62 = vld [vmem:[#allocation10 + $0x1b4] ss:$8 sps:$4 sm:$0xff]  }
 0x4a2   :  { %v7308_v34 = vmul.f32 0.2, %v9331_v63  ;;  %v7339_v43 = vmul.f32 0.2, %v9316_v30  ;;  %v9333_v59 = vadd.f32 %v7233_v41, %v12128_v20  ;;  %v9318_v46 = vadd.f32 %v6823_v37, %v12107_v51  ;;  %v7235_v36 = vpop.f32.mrb[103].mxu1  ;;  %7926 = vmatprep.mubr.bf16.mxu0 %v7443_v6 }
 0x4a3   :  { %v7309_v50 = vmul.f32 0.2, %v9332_v2  ;;  %v7342_v10 = vmul.f32 0.2, %v9317_v42  ;;  %v9334_v17 = vadd.f32 %v7235_v36, %v12133_v49  ;;  %7927 = vmatmul.mubr.bf16.gmra.mrb[112].mxu0 %v7442_v55  ;;  %v7402_v5 = vmax.f32 %v9315_v40, %v7338_v15  ;;  %v10446_v15 = vld [vmem:[#allocation10 + $0x1b0] ss:$8 sps:$4 sm:$0xff]  }
 0x4a4   :  { %v7312_v24 = vmul.f32 0.2, %v9333_v59  ;;  %v7343_v8 = vmul.f32 0.2, %v9318_v46  ;;  %7984 = vmatpush1.bf16.msra.mxu0 %v10437_v11  ;;  %v7372_v28 = vmax.f32 %v9331_v63, %v7308_v34  ;;  %v7403_v4 = vmax.f32 %v9316_v30, %v7339_v43  ;;  %v10451_v37 = vld [vmem:[#allocation10 + $0x1c4] ss:$8 sps:$4 sm:$0xff]  }
 0x4a5   :  { %v7406_v45 = vmax.f32 %v9317_v42, %v7342_v10  ;;  %v7313_v1 = vmul.f32 0.2, %v9334_v17  ;;  %7985 = vmatprep.subr.bf16.mxu0 %v10442_v9  ;;  %v7373_v23 = vmax.f32 %v9332_v2, %v7309_v50 }
 0x4a6   :  { %v7376_v14 = vmax.f32 %v9333_v59, %v7312_v24  ;;  %v7407_v44 = vmax.f32 %v9318_v46, %v7343_v8  ;;  %v6827_v47 = vpop.f32.mrb[88].mxu0 }
 0x4a7   :  { %v7377_v52 = vmax.f32 %v9334_v17, %v7313_v1  ;;  %v9319_v60 = vadd.f32 %v6827_v47, %v12103_v29  ;;  %v7239_v35 = vpop.f32.mrb[104].mxu1  ;;  %v6829_v39 = vpop.f32.mrb[89].mxu0  ;;  %v7446_v18 = vpack.c.bf16 %v7406_v45, %v7402_v5 }
 0x4a8   :  { %v9335_v31 = vadd.f32 %v7239_v35, %v12128_v20  ;;  %v9320_v16 = vadd.f32 %v6829_v39, %v12107_v51  ;;  %v7241_v61 = vpop.f32.mrb[105].mxu1  ;;  %v6831_v33 = vpop.f32.mrb[90].mxu0  ;;  %7986 = vmatpush1.bf16.msra.mxu0 %v10440_v12  ;;  %v7447_v53 = vpack.c.bf16 %v7407_v44, %v7403_v4  ;;  %v12158_v26 = vpack.c.bf16 %v7376_v14, %v7372_v28  ;;  %v10449_v28 = vld [vmem:[#allocation10 + $0x1c0] ss:$8 sps:$4 sm:$0xff]  }
 0x4a9   :  { %v7346_v21 = vmul.f32 0.2, %v9319_v60  ;;  %v9336_v22 = vadd.f32 %v7241_v61, %v12133_v49  ;;  %v9321_v32 = vadd.f32 %v6831_v33, %v12103_v29  ;;  %v7243_v58 = vpop.f32.mrb[106].mxu1  ;;  %v6833_v48 = vpop.f32.mrb[91].mxu0  ;;  %7987 = vmatprep.subr.bf16.mxu0 %v10445_v56  ;;  %v12162_v13 = vpack.c.bf16 %v7377_v52, %v7373_v23 }
 0x4aa   :  { %v7316_v40 = vmul.f32 0.2, %v9335_v31  ;;  %v7347_v38 = vmul.f32 0.2, %v9320_v16  ;;  %v9337_v57 = vadd.f32 %v7243_v58, %v12128_v20  ;;  %v9322_v55 = vadd.f32 %v6833_v48, %v12107_v51  ;;  %v7245_v63 = vpop.f32.mrb[107].mxu1  ;;  %7936 = vmatprep.mubr.bf16.mxu0 %v7447_v53 }
 0x4ab   :  { %v7317_v30 = vmul.f32 0.2, %v9336_v22  ;;  %v7350_v0 = vmul.f32 0.2, %v9321_v32  ;;  %v9338_v7 = vadd.f32 %v7245_v63, %v12133_v49  ;;  %7937 = vmatmul.mubr.bf16.gmra.mrb[116].mxu0 %v7446_v18  ;;  %v7410_v2 = vmax.f32 %v9319_v60, %v7346_v21  ;;  %v10454_v60 = vld [vmem:[#allocation10 + $0x1d4] ss:$8 sps:$4 sm:$0xff]  }
 0x4ac   :  { %v7320_v6 = vmul.f32 0.2, %v9337_v57  ;;  %v7351_v11 = vmul.f32 0.2, %v9322_v55  ;;  %7988 = vmatpush1.bf16.msra.mxu0 %v10443_v25  ;;  %v7380_v9 = vmax.f32 %v9335_v31, %v7316_v40  ;;  %v7411_v34 = vmax.f32 %v9320_v16, %v7347_v38 }
 0x4ad   :  { %v7414_v42 = vmax.f32 %v9321_v32, %v7350_v0  ;;  %v7321_v41 = vmul.f32 0.2, %v9338_v7  ;;  %7989 = vmatprep.subr.bf16.mxu0 %v10448_v62  ;;  %v7381_v36 = vmax.f32 %v9336_v22, %v7317_v30  ;;  %v10452_v22 = vld [vmem:[#allocation10 + $0x1d0] ss:$8 sps:$4 sm:$0xff]   ;;  %v10457_v62 = vld [vmem:[#allocation10 + $0x1e4] ss:$8 sps:$4 sm:$0xff]  }
 0x4ae   :  { %v7384_v43 = vmax.f32 %v9337_v57, %v7320_v6  ;;  %v7415_v59 = vmax.f32 %v9322_v55, %v7351_v11  ;;  %v6837_v46 = vpop.f32.mrb[92].mxu0 }
 0x4af   :  { %v7385_v50 = vmax.f32 %v9338_v7, %v7321_v41  ;;  %v9323_v10 = vadd.f32 %v6837_v46, %v12103_v29  ;;  %v7249_v17 = vpop.f32.mrb[108].mxu1  ;;  %v6839_v24 = vpop.f32.mrb[93].mxu0  ;;  %v7450_v8 = vpack.c.bf16 %v7414_v42, %v7410_v2 }
 0x4b0   :  { %v9339_v12 = vadd.f32 %v7249_v17, %v12128_v20  ;;  %v9324_v5 = vadd.f32 %v6839_v24, %v12107_v51  ;;  %v7251_v45 = vpop.f32.mrb[109].mxu1  ;;  %v6841_v1 = vpop.f32.mrb[94].mxu0  ;;  %7990 = vmatpush1.bf16.msra.mxu0 %v10446_v15  ;;  %v7451_v56 = vpack.c.bf16 %v7415_v59, %v7411_v34  ;;  %v12170_v4 = vpack.c.bf16 %v7384_v43, %v7380_v9  ;;  %v10455_v15 = vld [vmem:[#allocation10 + $0x1e0] ss:$8 sps:$4 sm:$0xff]  }
 0x4b1   :  { %v7354_v14 = vmul.f32 0.2, %v9323_v10  ;;  %v9340_v44 = vadd.f32 %v7251_v45, %v12133_v49  ;;  %v9325_v47 = vadd.f32 %v6841_v1, %v12103_v29  ;;  %v7253_v23 = vpop.f32.mrb[110].mxu1  ;;  %v6843_v52 = vpop.f32.mrb[95].mxu0  ;;  %7991 = vmatprep.subr.bf16.mxu0 %v10451_v37  ;;  %v12174_v35 = vpack.c.bf16 %v7385_v50, %v7381_v36  ;;  %v10460_v37 = vld [vmem:[#allocation10 + $0x1f4] ss:$8 sps:$4 sm:$0xff]  }
 0x4b2   :  { %v7324_v39 = vmul.f32 0.2, %v9339_v12  ;;  %v7355_v18 = vmul.f32 0.2, %v9324_v5  ;;  %v9341_v31 = vadd.f32 %v7253_v23, %v12128_v20  ;;  %v9326_v16 = vadd.f32 %v6843_v52, %v12107_v51  ;;  %v7255_v61 = vpop.f32.mrb[111].mxu1  ;;  %7946 = vmatprep.mubr.bf16.mxu0 %v7451_v56 }
 0x4b3   :  { %v7325_v33 = vmul.f32 0.2, %v9340_v44  ;;  %v7358_v53 = vmul.f32 0.2, %v9325_v47  ;;  %v9342_v25 = vadd.f32 %v7255_v61, %v12133_v49  ;;  %7947 = vmatmul.mubr.bf16.gmra.mrb[120].mxu0 %v7450_v8  ;;  %v7418_v32 = vmax.f32 %v9323_v10, %v7354_v14  ;;  %v10458_v10 = vld [vmem:[#allocation10 + $0x1f0] ss:$8 sps:$4 sm:$0xff]  }
 0x4b4   :  { %v7328_v29 = vmul.f32 0.2, %v9341_v31  ;;  %v7359_v21 = vmul.f32 0.2, %v9326_v16  ;;  %7992 = vmatpush1.bf16.msra.mxu0 %v10449_v28  ;;  %v7388_v40 = vmax.f32 %v9339_v12, %v7324_v39  ;;  %v7419_v38 = vmax.f32 %v9324_v5, %v7355_v18 }
 0x4b5   :  { %v7422_v58 = vmax.f32 %v9325_v47, %v7358_v53  ;;  %v7329_v48 = vmul.f32 0.2, %v9342_v25  ;;  %7993 = vmatprep.subr.bf16.mxu0 %v10454_v60  ;;  %v7389_v55 = vmax.f32 %v9340_v44, %v7325_v33 }
 0x4b6   :  { %v7392_v57 = vmax.f32 %v9341_v31, %v7328_v29  ;;  %v7423_v51 = vmax.f32 %v9326_v16, %v7359_v21 }
 0x4b7   :  { %v7393_v63 = vmax.f32 %v9342_v25, %v7329_v48  ;;  %v7259_v30 = vpop.f32.mrb[112].mxu1  ;;  %v7454_v0 = vpack.c.bf16 %v7422_v58, %v7418_v32 }
 0x4b8   :  { %v9343_v7 = vadd.f32 %v7259_v30, %v12128_v20  ;;  %v7261_v6 = vpop.f32.mrb[113].mxu1  ;;  %7994 = vmatpush1.bf16.msra.mxu0 %v10452_v22  ;;  %v7455_v11 = vpack.c.bf16 %v7423_v51, %v7419_v38  ;;  %v12180_v2 = vpack.c.bf16 %v7392_v57, %v7388_v40 }
 0x4b9   :  { %v9344_v42 = vadd.f32 %v7261_v6, %v12133_v49  ;;  %v7263_v41 = vpop.f32.mrb[114].mxu1  ;;  %7995 = vmatprep.subr.bf16.mxu0 %v10457_v62  ;;  %v12183_v9 = vpack.c.bf16 %v7393_v63, %v7389_v55 }
 0x4ba   :  { %v7332_v34 = vmul.f32 0.2, %v9343_v7  ;;  %v9345_v43 = vadd.f32 %v7263_v41, %v12128_v20  ;;  %v7265_v59 = vpop.f32.mrb[115].mxu1  ;;  %7956 = vmatprep.mubr.bf16.mxu0 %v7455_v11 }
 0x4bb   :  { %v7333_v46 = vmul.f32 0.2, %v9344_v42  ;;  %v9346_v36 = vadd.f32 %v7265_v59, %v12133_v49  ;;  %7957 = vmatmul.mubr.bf16.gmra.mrb[124].mxu0 %v7454_v0 }
 0x4bc   :  { %v7336_v50 = vmul.f32 0.2, %v9345_v43  ;;  %7996 = vmatpush1.bf16.msra.mxu0 %v10455_v15  ;;  %7999 = vmatprep.mubr.bf16.mxu0 %v12150_v19  ;;  %v7396_v24 = vmax.f32 %v9343_v7, %v7332_v34 }
 0x4bd   :  { %v7337_v17 = vmul.f32 0.2, %v9346_v36  ;;  %7997 = vmatprep.subr.bf16.mxu0 %v10460_v37  ;;  %v7397_v12 = vmax.f32 %v9344_v42, %v7333_v46 }
 0x4be   :  { %v7400_v8 = vmax.f32 %v9345_v43, %v7336_v50 }
 0x4bf   :  { %v7401_v5 = vmax.f32 %v9346_v36, %v7337_v17  ;;  %v7269_v45 = vpop.f32.mrb[116].mxu1 }
 0x4c0   :  { %v9347_v1 = vadd.f32 %v7269_v45, %v12128_v20  ;;  %v7271_v56 = vpop.f32.mrb[117].mxu1  ;;  %7998 = vmatpush1.bf16.msra.mxu0 %v10458_v10  ;;  %v7444_v28 = vpack.c.bf16 %v7400_v8, %v7396_v24 }
 0x4c1   :  { %v9348_v14 = vadd.f32 %v7271_v56, %v12133_v49  ;;  %v7273_v44 = vpop.f32.mrb[118].mxu1  ;;  %v7445_v47 = vpack.c.bf16 %v7401_v5, %v7397_v12  ;;  %v8144_v5 = vld [vmem:[#allocation13] sm:$0x3] }
 0x4c2   :  { %v7340_v23 = vmul.f32 0.2, %v9347_v1  ;;  %v9349_v19 = vadd.f32 %v7273_v44, %v12128_v20  ;;  %v7275_v52 = vpop.f32.mrb[119].mxu1 }
 0x4c3   :  { %v7341_v60 = vmul.f32 0.2, %v9348_v14  ;;  %v9350_v39 = vadd.f32 %v7275_v52, %v12133_v49  ;;  %8000 = vmatmul.mubr.bf16.vlgmr.msra.gmra.mrb[96].mxu0 %v12144_v27  ;;  %v12221_v52 = vrot.slane %v8144_v5, %v12580_v54 }
 0x4c4   :  { %v7344_v18 = vmul.f32 0.2, %v9349_v19  ;;  %8009 = vmatprep.mubr.bf16.mxu0 %v12162_v13  ;;  %v7404_v16 = vmax.f32 %v9347_v1, %v7340_v23 }
 0x4c5   :  { %v7345_v31 = vmul.f32 0.2, %v9350_v39  ;;  %v7405_v33 = vmax.f32 %v9348_v14, %v7341_v60 }
 0x4c6   :  { %v7408_v61 = vmax.f32 %v9349_v19, %v7344_v18 }
 0x4c7   :  { %v7409_v53 = vmax.f32 %v9350_v39, %v7345_v31  ;;  %v7279_v25 = vpop.f32.mrb[120].mxu1 }
 0x4c8   :  { %v9351_v29 = vadd.f32 %v7279_v25, %v12128_v20  ;;  %v7281_v21 = vpop.f32.mrb[121].mxu1  ;;  %v7448_v22 = vpack.c.bf16 %v7408_v61, %v7404_v16 }
 0x4c9   :  { %v9352_v32 = vadd.f32 %v7281_v21, %v12133_v49  ;;  %v7283_v58 = vpop.f32.mrb[122].mxu1  ;;  %v7449_v48 = vpack.c.bf16 %v7409_v53, %v7405_v33 }
 0x4ca   :  { %v7348_v62 = vmul.f32 0.2, %v9351_v29  ;;  %v9353_v27 = vadd.f32 %v7283_v58, %v12128_v20  ;;  %v7285_v40 = vpop.f32.mrb[123].mxu1 }
 0x4cb   :  { %v7349_v38 = vmul.f32 0.2, %v9352_v32  ;;  %v9354_v13 = vadd.f32 %v7285_v40, %v12133_v49  ;;  %8010 = vmatmul.mubr.bf16.gmra.mrb[100].mxu0 %v12158_v26 }
 0x4cc   :  { %v7352_v57 = vmul.f32 0.2, %v9353_v27  ;;  %8019 = vmatprep.mubr.bf16.mxu0 %v12174_v35  ;;  %v7412_v55 = vmax.f32 %v9351_v29, %v7348_v62 }
 0x4cd   :  { %v7353_v51 = vmul.f32 0.2, %v9354_v13  ;;  %v7413_v30 = vmax.f32 %v9352_v32, %v7349_v38 }
 0x4ce   :  { %v7416_v63 = vmax.f32 %v9353_v27, %v7352_v57 }
 0x4cf   :  { %v7417_v0 = vmax.f32 %v9354_v13, %v7353_v51  ;;  %v7289_v7 = vpop.f32.mrb[124].mxu1 }
 0x4d0   :  { %v9355_v6 = vadd.f32 %v7289_v7, %v12128_v20  ;;  %v7291_v11 = vpop.f32.mrb[125].mxu1  ;;  %v7452_v15 = vpack.c.bf16 %v7416_v63, %v7412_v55 }
 0x4d1   :  { %v9356_v42 = vadd.f32 %v7291_v11, %v12133_v49  ;;  %v7293_v41 = vpop.f32.mrb[126].mxu1  ;;  %v7453_v37 = vpack.c.bf16 %v7417_v0, %v7413_v30 }
 0x4d2   :  { %v7356_v34 = vmul.f32 0.2, %v9355_v6  ;;  %v9357_v26 = vadd.f32 %v7293_v41, %v12128_v20  ;;  %v7295_v43 = vpop.f32.mrb[127].mxu1  ;;  %v7522_v20 = vld [vmem:[#allocation11] sm:$0x3] }
 0x4d3   :  { %v7357_v59 = vmul.f32 0.2, %v9356_v42  ;;  %v9358_v35 = vadd.f32 %v7295_v43, %v12133_v49  ;;  %8020 = vmatmul.mubr.bf16.gmra.mrb[104].mxu0 %v12170_v4  ;;  %v12208_v49 = vrot.slane %v7522_v20, %v12579_v3  ;;  %v12211_v4 = vrot.slane %v7522_v20, %v12580_v54 }
 0x4d4   :  { %v7360_v46 = vmul.f32 0.2, %v9357_v26  ;;  %8029 = vmatprep.mubr.bf16.mxu0 %v12183_v9  ;;  %v7420_v50 = vmax.f32 %v9355_v6, %v7356_v34 }
 0x4d5   :  { %v7361_v36 = vmul.f32 0.2, %v9358_v35  ;;  %v7421_v17 = vmax.f32 %v9356_v42, %v7357_v59 }
 0x4d6   :  { %v7424_v10 = vmax.f32 %v9357_v26, %v7360_v46 }
 0x4d7   :  { %v7425_v24 = vmax.f32 %v9358_v35, %v7361_v36 }
 0x4d8   :  { %v7456_v8 = vpack.c.bf16 %v7424_v10, %v7420_v50 }
 0x4d9   :  { %v7457_v12 = vpack.c.bf16 %v7425_v24, %v7421_v17 }
 0x4db   :  { %8030 = vmatmul.mubr.bf16.gmra.mrb[108].mxu0 %v12180_v2 }
 0x4dc   :  { %8039 = vmatprep.mubr.bf16.mxu0 %v7445_v47  ;;  %v12217_v47 = vrot.slane %v8144_v5, %v12579_v3 }
 0x4e3   :  { %8040 = vmatmul.mubr.bf16.gmra.mrb[112].mxu0 %v7444_v28 }
 0x4e4   :  { %8049 = vmatprep.mubr.bf16.mxu0 %v7449_v48 }
 0x4eb   :  { %8050 = vmatmul.mubr.bf16.gmra.mrb[116].mxu0 %v7448_v22 }
 0x4ec   :  { %8059 = vmatprep.mubr.bf16.mxu0 %v7453_v37 }
 0x4f3   :  { %8060 = vmatmul.mubr.bf16.gmra.mrb[120].mxu0 %v7452_v15 }
 0x4f4   :  { %8069 = vmatprep.mubr.bf16.mxu0 %v7457_v12 }
 0x4fb   :  { %8070 = vmatmul.mubr.bf16.gmra.mrb[124].mxu0 %v7456_v8 }
 0x596   :  { %v8001_v9 = vpop.f32.mrb[96].mxu0 }
 0x597   :  { %v9359_v45 = vadd.f32 %v8001_v9, %v12208_v49  ;;  %v8003_v2 = vpop.f32.mrb[97].mxu0 }
 0x598   :  { %v9360_v1 = vadd.f32 %v8003_v2, %v12211_v4  ;;  %v8005_v56 = vpop.f32.mrb[98].mxu0 }
 0x599   :  { %v8080_v28 = vmul.f32 0.2, %v9359_v45  ;;  %v9361_v14 = vadd.f32 %v8005_v56, %v12208_v49  ;;  %v8007_v44 = vpop.f32.mrb[99].mxu0 }
 0x59a   :  { %v8081_v23 = vmul.f32 0.2, %v9360_v1  ;;  %v9362_v19 = vadd.f32 %v8007_v44, %v12211_v4 }
 0x59b   :  { %v8112_v60 = vmax.f32 %v9359_v45, %v8080_v28  ;;  %v8082_v39 = vmul.f32 0.2, %v9361_v14 }
 0x59c   :  { %v8113_v18 = vmax.f32 %v9360_v1, %v8081_v23  ;;  %v8083_v31 = vmul.f32 0.2, %v9362_v19 }
 0x59d   :  { %v8114_v16 = vmax.f32 %v9361_v14, %v8082_v39  ;;  %v8156_v61 = vmul.f32 %v12217_v47, %v8112_v60 }
 0x59e   :  { %v8115_v33 = vmax.f32 %v9362_v19, %v8083_v31  ;;  %v8011_v53 = vpop.f32.mrb[100].mxu0  ;;  %v8157_v25 = vmul.f32 %v12221_v52, %v8113_v18 }
 0x59f   :  { %v9363_v3 = vadd.f32 %v8011_v53, %v12208_v49  ;;  %v8013_v29 = vpop.f32.mrb[101].mxu0  ;;  %v8158_v21 = vmul.f32 %v12217_v47, %v8114_v16 }
 0x5a0   :  { %v9364_v22 = vadd.f32 %v8013_v29, %v12211_v4  ;;  %v8015_v54 = vpop.f32.mrb[102].mxu0  ;;  %v8188_v32 = vadd.f32 %v8157_v25, %v8156_v61  ;;  %v8159_v58 = vmul.f32 %v12221_v52, %v8115_v33 }
 0x5a1   :  { %v8084_v48 = vmul.f32 0.2, %v9363_v3  ;;  %v9365_v62 = vadd.f32 %v8015_v54, %v12208_v49  ;;  %v8017_v27 = vpop.f32.mrb[103].mxu0 }
 0x5a2   :  { %v8085_v40 = vmul.f32 0.2, %v9364_v22  ;;  %v9366_v38 = vadd.f32 %v8017_v27, %v12211_v4  ;;  %8189 = vadd.xlane.f32.xlu0 %v8188_v32  ;;  %v8191_v13 = vadd.f32 %v8159_v58, %v8158_v21 }
 0x5a3   :  { %v8116_v57 = vmax.f32 %v9363_v3, %v8084_v48  ;;  %v8086_v51 = vmul.f32 0.2, %v9365_v62 }
 0x5a4   :  { %v8117_v55 = vmax.f32 %v9364_v22, %v8085_v40  ;;  %v8087_v63 = vmul.f32 0.2, %v9366_v38 }
 0x5a5   :  { %v8118_v30 = vmax.f32 %v9365_v62, %v8086_v51  ;;  %v8160_v0 = vmul.f32 %v12217_v47, %v8116_v57 }
 0x5a6   :  { %v8119_v7 = vmax.f32 %v9366_v38, %v8087_v63  ;;  %v8021_v6 = vpop.f32.mrb[104].mxu0  ;;  %8192 = vadd.xlane.f32.xlu0 %v8191_v13  ;;  %v8161_v11 = vmul.f32 %v12221_v52, %v8117_v55 }
 0x5a7   :  { %v9367_v15 = vadd.f32 %v8021_v6, %v12208_v49  ;;  %v8023_v42 = vpop.f32.mrb[105].mxu0  ;;  %v8162_v41 = vmul.f32 %v12217_v47, %v8118_v30 }
 0x5a8   :  { %v9368_v37 = vadd.f32 %v8023_v42, %v12211_v4  ;;  %v8025_v34 = vpop.f32.mrb[106].mxu0  ;;  %v8194_v26 = vadd.f32 %v8161_v11, %v8160_v0  ;;  %v8163_v43 = vmul.f32 %v12221_v52, %v8119_v7 }
 0x5a9   :  { %v8088_v59 = vmul.f32 0.2, %v9367_v15  ;;  %v9369_v35 = vadd.f32 %v8025_v34, %v12208_v49  ;;  %v8027_v46 = vpop.f32.mrb[107].mxu0 }
 0x5aa   :  { %v8089_v36 = vmul.f32 0.2, %v9368_v37  ;;  %v9370_v50 = vadd.f32 %v8027_v46, %v12211_v4  ;;  %8195 = vadd.xlane.f32.xlu1 %v8194_v26  ;;  %v8197_v10 = vadd.f32 %v8163_v43, %v8162_v41 }
 0x5ab   :  { %v8120_v17 = vmax.f32 %v9367_v15, %v8088_v59  ;;  %v8090_v24 = vmul.f32 0.2, %v9369_v35 }
 0x5ac   :  { %v8121_v8 = vmax.f32 %v9368_v37, %v8089_v36  ;;  %v8091_v12 = vmul.f32 0.2, %v9370_v50 }
 0x5ad   :  { %v8122_v20 = vmax.f32 %v9369_v35, %v8090_v24  ;;  %v8164_v9 = vmul.f32 %v12217_v47, %v8120_v17 }
 0x5ae   :  { %v8123_v5 = vmax.f32 %v9370_v50, %v8091_v12  ;;  %v8031_v45 = vpop.f32.mrb[108].mxu0  ;;  %8198 = vadd.xlane.f32.xlu1 %v8197_v10  ;;  %v8165_v2 = vmul.f32 %v12221_v52, %v8121_v8 }
 0x5af   :  { %v9371_v1 = vadd.f32 %v8031_v45, %v12208_v49  ;;  %v8033_v56 = vpop.f32.mrb[109].mxu0  ;;  %v8166_v28 = vmul.f32 %v12217_v47, %v8122_v20 }
 0x5b0   :  { %v9372_v14 = vadd.f32 %v8033_v56, %v12211_v4  ;;  %v8035_v44 = vpop.f32.mrb[110].mxu0  ;;  %v8200_v23 = vadd.f32 %v8165_v2, %v8164_v9  ;;  %v8167_v19 = vmul.f32 %v12221_v52, %v8123_v5 }
 0x5b1   :  { %v8092_v60 = vmul.f32 0.2, %v9371_v1  ;;  %v9373_v39 = vadd.f32 %v8035_v44, %v12208_v49  ;;  %v8037_v18 = vpop.f32.mrb[111].mxu0 }
 0x5b2   :  { %v8093_v31 = vmul.f32 0.2, %v9372_v14  ;;  %v9374_v16 = vadd.f32 %v8037_v18, %v12211_v4  ;;  %8201 = vadd.xlane.f32.xlu0 %v8200_v23  ;;  %v8203_v61 = vadd.f32 %v8167_v19, %v8166_v28 }
 0x5b3   :  { %v8124_v33 = vmax.f32 %v9371_v1, %v8092_v60  ;;  %v8094_v53 = vmul.f32 0.2, %v9373_v39 }
 0x5b4   :  { %v8125_v25 = vmax.f32 %v9372_v14, %v8093_v31  ;;  %v8095_v3 = vmul.f32 0.2, %v9374_v16  ;;  %8204 = vadd.xlane.f32.xlu1 %v8203_v61 }
 0x5b5   :  { %v8126_v29 = vmax.f32 %v9373_v39, %v8094_v53  ;;  %v8168_v21 = vmul.f32 %v12217_v47, %v8124_v33 }
 0x5b6   :  { %v8127_v22 = vmax.f32 %v9374_v16, %v8095_v3  ;;  %v8041_v54 = vpop.f32.mrb[112].mxu0  ;;  %v8169_v32 = vmul.f32 %v12221_v52, %v8125_v25 }
 0x5b7   :  { %v9375_v58 = vadd.f32 %v8041_v54, %v12208_v49  ;;  %v8043_v48 = vpop.f32.mrb[113].mxu0  ;;  %v8170_v62 = vmul.f32 %v12217_v47, %v8126_v29 }
 0x5b8   :  { %v9376_v27 = vadd.f32 %v8043_v48, %v12211_v4  ;;  %v8045_v40 = vpop.f32.mrb[114].mxu0  ;;  %v8206_v38 = vadd.f32 %v8169_v32, %v8168_v21  ;;  %v8171_v13 = vmul.f32 %v12221_v52, %v8127_v22 }
 0x5b9   :  { %v8096_v57 = vmul.f32 0.2, %v9375_v58  ;;  %v9377_v51 = vadd.f32 %v8045_v40, %v12208_v49  ;;  %v8047_v55 = vpop.f32.mrb[115].mxu0 }
 0x5ba   :  { %v8097_v63 = vmul.f32 0.2, %v9376_v27  ;;  %v9378_v30 = vadd.f32 %v8047_v55, %v12211_v4  ;;  %8207 = vadd.xlane.f32.xlu0 %v8206_v38  ;;  %v8209_v0 = vadd.f32 %v8171_v13, %v8170_v62 }
 0x5bb   :  { %v8128_v7 = vmax.f32 %v9375_v58, %v8096_v57  ;;  %v8098_v6 = vmul.f32 0.2, %v9377_v51 }
 0x5bc   :  { %v8129_v11 = vmax.f32 %v9376_v27, %v8097_v63  ;;  %v8099_v15 = vmul.f32 0.2, %v9378_v30  ;;  %8210 = vadd.xlane.f32.xlu1 %v8209_v0 }
 0x5bd   :  { %v8130_v42 = vmax.f32 %v9377_v51, %v8098_v6  ;;  %v8172_v41 = vmul.f32 %v12217_v47, %v8128_v7 }
 0x5be   :  { %v8131_v37 = vmax.f32 %v9378_v30, %v8099_v15  ;;  %v8051_v34 = vpop.f32.mrb[116].mxu0  ;;  %v8173_v26 = vmul.f32 %v12221_v52, %v8129_v11 }
 0x5bf   :  { %v9379_v43 = vadd.f32 %v8051_v34, %v12208_v49  ;;  %v8053_v59 = vpop.f32.mrb[117].mxu0  ;;  %v8174_v35 = vmul.f32 %v12217_v47, %v8130_v42 }
 0x5c0   :  { %v9380_v46 = vadd.f32 %v8053_v59, %v12211_v4  ;;  %v8055_v36 = vpop.f32.mrb[118].mxu0  ;;  %v8212_v50 = vadd.f32 %v8173_v26, %v8172_v41  ;;  %v8175_v10 = vmul.f32 %v12221_v52, %v8131_v37 }
 0x5c1   :  { %v8100_v17 = vmul.f32 0.2, %v9379_v43  ;;  %v9381_v24 = vadd.f32 %v8055_v36, %v12208_v49  ;;  %v8057_v8 = vpop.f32.mrb[119].mxu0 }
 0x5c2   :  { %v8101_v12 = vmul.f32 0.2, %v9380_v46  ;;  %v9382_v20 = vadd.f32 %v8057_v8, %v12211_v4  ;;  %8213 = vadd.xlane.f32.xlu0 %v8212_v50  ;;  %v8215_v9 = vadd.f32 %v8175_v10, %v8174_v35 }
 0x5c3   :  { %v8132_v5 = vmax.f32 %v9379_v43, %v8100_v17  ;;  %v8102_v45 = vmul.f32 0.2, %v9381_v24  ;;  %v12286_v17 = vstv %s12376_s8 }
 0x5c4   :  { %v8133_v2 = vmax.f32 %v9380_v46, %v8101_v12  ;;  %v8103_v1 = vmul.f32 0.2, %v9382_v20  ;;  %8216 = vadd.xlane.f32.xlu1 %v8215_v9 }
 0x5c5   :  { %v8134_v56 = vmax.f32 %v9381_v24, %v8102_v45  ;;  %v8176_v28 = vmul.f32 %v12217_v47, %v8132_v5 }
 0x5c6   :  { %v8135_v14 = vmax.f32 %v9382_v20, %v8103_v1  ;;  %v8061_v44 = vpop.f32.mrb[120].mxu0  ;;  %v8177_v23 = vmul.f32 %v12221_v52, %v8133_v2 }
 0x5c7   :  { %v9383_v19 = vadd.f32 %v8061_v44, %v12208_v49  ;;  %v8063_v60 = vpop.f32.mrb[121].mxu0  ;;  %v8178_v39 = vmul.f32 %v12217_v47, %v8134_v56 }
 0x5c8   :  { %v9384_v18 = vadd.f32 %v8063_v60, %v12211_v4  ;;  %v8065_v31 = vpop.f32.mrb[122].mxu0  ;;  %v8218_v16 = vadd.f32 %v8177_v23, %v8176_v28  ;;  %v8179_v61 = vmul.f32 %v12221_v52, %v8135_v14 }
 0x5c9   :  { %v8104_v33 = vmul.f32 0.2, %v9383_v19  ;;  %v9385_v53 = vadd.f32 %v8065_v31, %v12208_v49  ;;  %v8067_v25 = vpop.f32.mrb[123].mxu0 }
 0x5ca   :  { %v8105_v3 = vmul.f32 0.2, %v9384_v18  ;;  %v9386_v29 = vadd.f32 %v8067_v25, %v12211_v4  ;;  %8219 = vadd.xlane.f32.xlu0 %v8218_v16  ;;  %v8221_v21 = vadd.f32 %v8179_v61, %v8178_v39 }
 0x5cb   :  { %v8136_v22 = vmax.f32 %v9383_v19, %v8104_v33  ;;  %v8106_v54 = vmul.f32 0.2, %v9385_v53 }
 0x5cc   :  { %v8137_v32 = vmax.f32 %v9384_v18, %v8105_v3  ;;  %v8107_v58 = vmul.f32 0.2, %v9386_v29  ;;  %8222 = vadd.xlane.f32.xlu1 %v8221_v21 }
 0x5cd   :  { %v8138_v48 = vmax.f32 %v9385_v53, %v8106_v54  ;;  %v8180_v62 = vmul.f32 %v12217_v47, %v8136_v22 }
 0x5ce   :  { %v8139_v27 = vmax.f32 %v9386_v29, %v8107_v58  ;;  %v8071_v40 = vpop.f32.mrb[124].mxu0  ;;  %v8181_v38 = vmul.f32 %v12221_v52, %v8137_v32 }
 0x5cf   :  { %v9387_v13 = vadd.f32 %v8071_v40, %v12208_v49  ;;  %v8073_v57 = vpop.f32.mrb[125].mxu0  ;;  %v8182_v51 = vmul.f32 %v12217_v47, %v8138_v48 }
 0x5d0   :  { %v9388_v55 = vadd.f32 %v8073_v57, %v12211_v4  ;;  %v8075_v63 = vpop.f32.mrb[126].mxu0  ;;  %v8224_v30 = vadd.f32 %v8181_v38, %v8180_v62  ;;  %v8183_v0 = vmul.f32 %v12221_v52, %v8139_v27 }
 0x5d1   :  { %v8108_v7 = vmul.f32 0.2, %v9387_v13  ;;  %v9389_v6 = vadd.f32 %v8075_v63, %v12208_v49  ;;  %v8077_v11 = vpop.f32.mrb[127].mxu0 }
 0x5d2   :  { %v8109_v15 = vmul.f32 0.2, %v9388_v55  ;;  %v9390_v42 = vadd.f32 %v8077_v11, %v12211_v4  ;;  %8225 = vadd.xlane.f32.xlu0 %v8224_v30  ;;  %v8227_v41 = vadd.f32 %v8183_v0, %v8182_v51 }
 0x5d3   :  { %v8140_v37 = vmax.f32 %v9387_v13, %v8108_v7  ;;  %v8110_v34 = vmul.f32 0.2, %v9389_v6 }
 0x5d4   :  { %v8141_v26 = vmax.f32 %v9388_v55, %v8109_v15  ;;  %v8111_v43 = vmul.f32 0.2, %v9390_v42  ;;  %8228 = vadd.xlane.f32.xlu1 %v8227_v41 }
 0x5d5   :  { %v8142_v59 = vmax.f32 %v9389_v6, %v8110_v34  ;;  %v8184_v35 = vmul.f32 %v12217_v47, %v8140_v37 }
 0x5d6   :  { %v8143_v46 = vmax.f32 %v9390_v42, %v8111_v43  ;;  %v8185_v36 = vmul.f32 %v12221_v52, %v8141_v26 }
 0x5d7   :  { %v8186_v50 = vmul.f32 %v12217_v47, %v8142_v59 }
 0x5d8   :  { %v8230_v49 = vadd.f32 %v8185_v36, %v8184_v35  ;;  %v8187_v10 = vmul.f32 %v12221_v52, %v8143_v46 }
 0x5da   :  { %8231 = vadd.xlane.f32.xlu0 %v8230_v49  ;;  %v8233_v4 = vadd.f32 %v8187_v10, %v8186_v50 }
 0x5dc   :  { %8234 = vadd.xlane.f32.xlu1 %v8233_v4 }
 0x62f   :  { %v8190_v24 = vpop.xlane.xlu0 %8189 }
 0x630   :  { %v8238_v8 = vadd.f32 %v12286_v17, %v8190_v24 }
 0x632   :  { %v9119_v12 = vmul.f32 -1.442695, %v8238_v8 }
 0x633   :  { %v8193_v20 = vpop.xlane.xlu0 %8192 }
 0x634   :  { %10461 = vpow2.f32 %v9119_v12  ;;  %v8239_v9 = vadd.f32 %v12286_v17, %v8193_v20 }
 0x636   :  { %v9120_v47 = vmul.f32 -1.442695, %v8239_v9 }
 0x637   :  { %v8196_v5 = vpop.xlane.xlu1 %8195 }
 0x638   :  { %10463 = vpow2.f32 %v9120_v47  ;;  %v8240_v52 = vadd.f32 %v12286_v17, %v8196_v5 }
 0x63a   :  { %v9121_v45 = vmul.f32 -1.442695, %v8240_v52 }
 0x63b   :  { %v8199_v2 = vpop.xlane.xlu1 %8198 }
 0x63c   :  { %10465 = vpow2.f32 %v9121_v45  ;;  %v8241_v1 = vadd.f32 %v12286_v17, %v8199_v2 }
 0x63e   :  { %v10462_v56 = vpop.eup %10461  ;;  %v9122_v28 = vmul.f32 -1.442695, %v8241_v1 }
 0x63f   :  { %v8302_v14 = vadd.f32 1.0, %v10462_v56  ;;  %v8202_v44 = vpop.xlane.xlu0 %8201 }
 0x640   :  { %10467 = vpow2.f32 %v9122_v28  ;;  %v8242_v23 = vadd.f32 %v12286_v17, %v8202_v44 }
 0x641   :  { %10469 = vrcp.f32 %v8302_v14  ;;  %v8205_v19 = vpop.xlane.xlu1 %8204 }
 0x642   :  { %v10464_v60 = vpop.eup %10463  ;;  %v9123_v39 = vmul.f32 -1.442695, %v8242_v23  ;;  %v8243_v18 = vadd.f32 %v12286_v17, %v8205_v19 }
 0x643   :  { %v8303_v31 = vadd.f32 1.0, %v10464_v60 }
 0x644   :  { %10471 = vpow2.f32 %v9123_v39  ;;  %v9124_v16 = vmul.f32 -1.442695, %v8243_v18 }
 0x645   :  { %10473 = vrcp.f32 %v8303_v31 }
 0x646   :  { %v10466_v61 = vpop.eup %10465  ;;  %10475 = vpow2.f32 %v9124_v16 }
 0x647   :  { %v8304_v33 = vadd.f32 1.0, %v10466_v61  ;;  %v8208_v53 = vpop.xlane.xlu0 %8207 }
 0x648   :  { %v8244_v25 = vadd.f32 %v12286_v17, %v8208_v53 }
 0x649   :  { %10477 = vrcp.f32 %v8304_v33  ;;  %v8211_v3 = vpop.xlane.xlu1 %8210 }
 0x64a   :  { %v10468_v29 = vpop.eup %10467  ;;  %v9125_v21 = vmul.f32 -1.442695, %v8244_v25  ;;  %v8245_v22 = vadd.f32 %v12286_v17, %v8211_v3 }
 0x64b   :  { %v10470_v54 = vpop.eup %10469  ;;  %v8305_v32 = vadd.f32 1.0, %v10468_v29 }
 0x64c   :  { %8351 = vst.msk [vmem:[%s12377_s9] sm:$0xff] %vm8350_vm1, %v10470_v54  ;;  %10479 = vpow2.f32 %v9125_v21  ;;  %v9126_v58 = vmul.f32 -1.442695, %v8245_v22 }
 0x64d   :  { %10481 = vrcp.f32 %v8305_v32 }
 0x64e   :  { %v10472_v48 = vpop.eup %10471  ;;  %10483 = vpow2.f32 %v9126_v58 }
 0x64f   :  { %v10474_v62 = vpop.eup %10473  ;;  %v8306_v27 = vadd.f32 1.0, %v10472_v48  ;;  %v8214_v40 = vpop.xlane.xlu0 %8213 }
 0x650   :  { %v10476_v38 = vpop.eup %10475  ;;  %8352 = vst.msk [vmem:[%s12377_s9 + $0x8] sm:$0xff] %vm8350_vm1, %v10474_v62  ;;  %v8246_v13 = vadd.f32 %v12286_v17, %v8214_v40 }
 0x651   :  { %10485 = vrcp.f32 %v8306_v27  ;;  %v8307_v57 = vadd.f32 1.0, %v10476_v38  ;;  %v8217_v51 = vpop.xlane.xlu1 %8216 }
 0x652   :  { %v9127_v55 = vmul.f32 -1.442695, %v8246_v13  ;;  %v8247_v63 = vadd.f32 %v12286_v17, %v8217_v51 }
 0x653   :  { %v10478_v30 = vpop.eup %10477  ;;  %10487 = vrcp.f32 %v8307_v57 }
 0x654   :  { %8353 = vst.msk [vmem:[%s12377_s9 + $0x10] sm:$0xff] %vm8350_vm1, %v10478_v30  ;;  %10489 = vpow2.f32 %v9127_v55  ;;  %v9128_v0 = vmul.f32 -1.442695, %v8247_v63 }
 0x656   :  { %v10480_v7 = vpop.eup %10479  ;;  %10491 = vpow2.f32 %v9128_v0 }
 0x657   :  { %v10482_v6 = vpop.eup %10481  ;;  %v8308_v11 = vadd.f32 1.0, %v10480_v7  ;;  %v8220_v15 = vpop.xlane.xlu0 %8219 }
 0x658   :  { %v10484_v42 = vpop.eup %10483  ;;  %8354 = vst.msk [vmem:[%s12377_s9 + $0x18] sm:$0xff] %vm8350_vm1, %v10482_v6  ;;  %v8248_v41 = vadd.f32 %v12286_v17, %v8220_v15 }
 0x659   :  { %10493 = vrcp.f32 %v8308_v11  ;;  %v8309_v37 = vadd.f32 1.0, %v10484_v42  ;;  %v8223_v34 = vpop.xlane.xlu1 %8222 }
 0x65a   :  { %v9129_v26 = vmul.f32 -1.442695, %v8248_v41  ;;  %v8249_v43 = vadd.f32 %v12286_v17, %v8223_v34 }
 0x65b   :  { %v10486_v59 = vpop.eup %10485  ;;  %10495 = vrcp.f32 %v8309_v37 }
 0x65c   :  { %8355 = vst.msk [vmem:[%s12377_s9 + $0x20] sm:$0xff] %vm8350_vm1, %v10486_v59  ;;  %10497 = vpow2.f32 %v9129_v26  ;;  %v9130_v35 = vmul.f32 -1.442695, %v8249_v43 }
 0x65d   :  { %v10488_v46 = vpop.eup %10487 }
 0x65e   :  { %v10490_v36 = vpop.eup %10489  ;;  %8356 = vst.msk [vmem:[%s12377_s9 + $0x28] sm:$0xff] %vm8350_vm1, %v10488_v46  ;;  %10499 = vpow2.f32 %v9130_v35 }
 0x65f   :  { %v8310_v50 = vadd.f32 1.0, %v10490_v36  ;;  %v8226_v49 = vpop.xlane.xlu0 %8225 }
 0x660   :  { %v10492_v10 = vpop.eup %10491  ;;  %v8250_v4 = vadd.f32 %v12286_v17, %v8226_v49 }
 0x661   :  { %10501 = vrcp.f32 %v8310_v50  ;;  %v8311_v24 = vadd.f32 1.0, %v10492_v10  ;;  %v8229_v8 = vpop.xlane.xlu1 %8228 }
 0x662   :  { %v9131_v12 = vmul.f32 -1.442695, %v8250_v4  ;;  %v8251_v20 = vadd.f32 %v12286_v17, %v8229_v8 }
 0x663   :  { %v10494_v9 = vpop.eup %10493  ;;  %10503 = vrcp.f32 %v8311_v24 }
 0x664   :  { %8357 = vst.msk [vmem:[%s12377_s9 + $0x30] sm:$0xff] %vm8350_vm1, %v10494_v9  ;;  %10505 = vpow2.f32 %v9131_v12  ;;  %v9132_v47 = vmul.f32 -1.442695, %v8251_v20 }
 0x665   :  { %v10496_v5 = vpop.eup %10495 }
 0x666   :  { %v10498_v52 = vpop.eup %10497  ;;  %8358 = vst.msk [vmem:[%s12377_s9 + $0x38] sm:$0xff] %vm8350_vm1, %v10496_v5  ;;  %10507 = vpow2.f32 %v9132_v47 }
 0x667   :  { %v8312_v45 = vadd.f32 1.0, %v10498_v52  ;;  %v8232_v2 = vpop.xlane.xlu0 %8231 }
 0x668   :  { %v10500_v1 = vpop.eup %10499  ;;  %v8252_v56 = vadd.f32 %v12286_v17, %v8232_v2 }
 0x669   :  { %10509 = vrcp.f32 %v8312_v45  ;;  %v8313_v28 = vadd.f32 1.0, %v10500_v1  ;;  %v8235_v14 = vpop.xlane.xlu1 %8234 }
 0x66a   :  { %v9133_v44 = vmul.f32 -1.442695, %v8252_v56  ;;  %v8253_v23 = vadd.f32 %v12286_v17, %v8235_v14 }
 0x66b   :  { %v10502_v19 = vpop.eup %10501  ;;  %10511 = vrcp.f32 %v8313_v28 }
 0x66c   :  { %8359 = vst.msk [vmem:[%s12377_s9 + $0x40] sm:$0xff] %vm8350_vm1, %v10502_v19  ;;  %10513 = vpow2.f32 %v9133_v44  ;;  %v9134_v60 = vmul.f32 -1.442695, %v8253_v23 }
 0x66d   :  { %v10504_v39 = vpop.eup %10503 }
 0x66e   :  { %v10506_v18 = vpop.eup %10505  ;;  %8360 = vst.msk [vmem:[%s12377_s9 + $0x48] sm:$0xff] %vm8350_vm1, %v10504_v39  ;;  %10515 = vpow2.f32 %v9134_v60 }
 0x66f   :  { %v8314_v31 = vadd.f32 1.0, %v10506_v18 }
 0x670   :  { %v10508_v16 = vpop.eup %10507 }
 0x671   :  { %10517 = vrcp.f32 %v8314_v31  ;;  %v8315_v17 = vadd.f32 1.0, %v10508_v16 }
 0x673   :  { %v10510_v61 = vpop.eup %10509  ;;  %10519 = vrcp.f32 %v8315_v17 }
 0x674   :  { %8361 = vst.msk [vmem:[%s12377_s9 + $0x50] sm:$0xff] %vm8350_vm1, %v10510_v61 }
 0x675   :  { %v10512_v33 = vpop.eup %10511 }
 0x676   :  { %v10514_v53 = vpop.eup %10513  ;;  %8362 = vst.msk [vmem:[%s12377_s9 + $0x58] sm:$0xff] %vm8350_vm1, %v10512_v33 }
 0x677   :  { %v8316_v25 = vadd.f32 1.0, %v10514_v53 }
 0x678   :  { %v10516_v3 = vpop.eup %10515 }
 0x679   :  { %10521 = vrcp.f32 %v8316_v25  ;;  %v8317_v29 = vadd.f32 1.0, %v10516_v3 }
 0x67b   :  { %v10518_v21 = vpop.eup %10517  ;;  %10523 = vrcp.f32 %v8317_v29 }
 0x67c   :  { %8363 = vst.msk [vmem:[%s12377_s9 + $0x60] sm:$0xff] %vm8350_vm1, %v10518_v21 }
 0x67d   :  { %v10520_v22 = vpop.eup %10519 }
 0x67e   :  { %8364 = vst.msk [vmem:[%s12377_s9 + $0x68] sm:$0xff] %vm8350_vm1, %v10520_v22 }
 0x683   :  { %v10522_v54 = vpop.eup %10521 }
 0x684   :  { %8365 = vst.msk [vmem:[%s12377_s9 + $0x70] sm:$0xff] %vm8350_vm1, %v10522_v54 }
 0x685   :  { %v10524_v32 = vpop.eup %10523 }
 0x686   :  { %8366 = vst.msk [vmem:[%s12377_s9 + $0x78] sm:$0xff] %vm8350_vm1, %v10524_v32 }
 0x687   :  { %8371 = vsyncpa [#allocation4], 1 }
 0x688   :  { %8372 = vsyncpa [#allocation6], 1 }
 0x689   :  { %8373 = vsyncpa [#allocation9], 1 }
 0x68a   :  { %8374 = vsyncpa [#allocation12], 1 }

</bundles_post_ra>
